<compile_context>
chip_gen: v7x
topology: tpu7x:2x2x1
jax: 0.10.0
libtpu: 0.0.40
codegen_flags: <defaults>
</compile_context>

<pallas_src>
import functools
import math

import jax
import jax.numpy as jnp
from jax.experimental import pallas as pl
from jax.experimental.pallas import tpu as pltpu

# ----------------------------------------------------------------------------
# Config (small synthetic shapes consistent with the module)
# ----------------------------------------------------------------------------
B = 2                    # batch
C_IN = 3                 # RGB image channels
IMG = 16                 # image H = W
PATCH = 8                # patch size -> 2x2 = 4 patches
GRID_SIDE = IMG // PATCH
N_PATCH = GRID_SIDE * GRID_SIDE
WIDTH = 32               # vision transformer width == args['embd_dim']
V_LAYERS = 2
V_HEADS = 2
EMBED = 32               # CLIP joint embedding dim
SHARE_LEN = 4            # args['share_prompt_length']
PREFIX_LEN = 4           # args['prefix_prompt_length']
PREFIX_LAYERS = 1        # args['prefix_prompt_layers']
TOTAL_SESSIONS = 2       # args['total_sessions']
N_CLS = 2                # dataset == 'cddb' -> class_num = 2
T_WIDTH = 32             # text transformer width
T_LAYERS = 1
T_HEADS = 2
TEXT_SEQ = 8             # tokenized prompt length

T_TOTAL = 1 + N_PATCH + SHARE_LEN       # vision tokens: cls + patches + instance
PATCH_DIM = C_IN * PATCH * PATCH        # flattened patch length

# Small-vector pack layout: one parameter vector per sublane row, 128 lanes wide.
VEC_LANES = 128
VR_LNPRE = 0             # ln_pre  gamma/beta    (2 rows)
VR_LNPOST = 2            # ln_post gamma/beta    (2 rows)
VR_LAYER0 = 4            # 8 rows per vision layer
TR_LNF = 0               # ln_final gamma/beta   (2 rows)
TR_SCALE = 2             # logit_scale (lane 0)  (1 row)
TR_LAYER0 = 3            # 8 rows per text layer
# per-layer row order: 0 ln1_g, 1 ln1_b, 2 ln2_g, 3 ln2_b, 4 b_qkv, 5 b_o,
#                      6 b_fc1, 7 b_fc2


def _pad8(n):
    return ((n + 7) // 8) * 8


# ----------------------------------------------------------------------------
# In-kernel math helpers (operate on VMEM *values*, all f32)
# ----------------------------------------------------------------------------
def _layernorm(x, g, b, eps=1e-5):
    """LayerNorm via sum / sum-of-squares: two independent lane reductions."""
    inv_n = 1.0 / x.shape[-1]
    s1 = jnp.sum(x, axis=-1, keepdims=True)
    s2 = jnp.sum(x * x, axis=-1, keepdims=True)
    mu = s1 * inv_n
    var = s2 * inv_n - mu * mu
    return (x - mu) * jax.lax.rsqrt(var + eps) * g + b


def _block_mask(n_seq, seq_len, causal):
    """Block-diagonal (optionally causal) mask over n_seq folded sequences.

    Built once per tower from iota comparisons only (no integer division)."""
    rows = n_seq * seq_len
    rr = jax.lax.broadcasted_iota(jnp.int32, (rows, rows), 0)
    cc = jax.lax.broadcasted_iota(jnp.int32, (rows, rows), 1)
    mask = None
    for s in range(n_seq):
        lo, hi = s * seq_len, (s + 1) * seq_len
        blk = (rr >= lo) & (rr < hi) & (cc >= lo) & (cc < hi)
        mask = blk if mask is None else (mask | blk)
    if causal:
        mask = mask & (cc <= rr)
    return mask


def _mha(x, p, heads, mask, prefix):
    """Batch-folded multi-head self-attention on one [rows, D] slab.

    * mask: block-diagonal (+causal) so folded sequences never attend across.
    * prefix (PrefixKeqV, K-prompt == V-prompt): second score block, never
      concatenated/broadcast with the self K/V.
    * per-head score tiles are stacked on a new leading axis so max / exp /
      sum / reciprocal run once for all heads.
    * head merge folded into W_o as a sum of per-head row blocks.
    """
    rows, d = x.shape
    dh = d // heads
    qkv = jnp.dot(x, p["wqkv"], preferred_element_type=jnp.float32) + p["bqkv"]
    q = qkv[:, 0:d] * (1.0 / math.sqrt(dh))          # scale once, whole Q block
    neg = jnp.float32(-1e30)
    s_parts, sp_parts = [], []
    for h in range(heads):
        qh = q[:, h * dh:(h + 1) * dh]
        kh = qkv[:, d + h * dh:d + (h + 1) * dh]
        s = jax.lax.dot_general(qh, kh, (((1,), (1,)), ((), ())),
                                preferred_element_type=jnp.float32)
        s_parts.append(jnp.where(mask, s, neg))
        if prefix is not None:
            sp_parts.append(jax.lax.dot_general(
                qh, prefix[:, h * dh:(h + 1) * dh], (((1,), (1,)), ((), ())),
                preferred_element_type=jnp.float32))
    s3 = jnp.stack(s_parts, axis=0)                   # [heads, rows, rows]
    if prefix is not None:
        sp3 = jnp.stack(sp_parts, axis=0)             # [heads, rows, Lp]
        m3 = jnp.maximum(jnp.max(s3, axis=-1, keepdims=True),
                         jnp.max(sp3, axis=-1, keepdims=True))
        es3 = jnp.exp(s3 - m3)
        ep3 = jnp.exp(sp3 - m3)
        den3 = (jnp.sum(es3, axis=-1, keepdims=True)
                + jnp.sum(ep3, axis=-1, keepdims=True))
    else:
        m3 = jnp.max(s3, axis=-1, keepdims=True)
        es3 = jnp.exp(s3 - m3)
        den3 = jnp.sum(es3, axis=-1, keepdims=True)
    inv3 = pl.reciprocal(den3, approx=True)           # EUP slot, ~2^-12 rel err
    out = None
    for h in range(heads):
        vh = qkv[:, 2 * d + h * dh:2 * d + (h + 1) * dh]
        attn = jnp.dot(es3[h], vh, preferred_element_type=jnp.float32)
        if prefix is not None:
            attn = attn + jnp.dot(ep3[h], prefix[:, h * dh:(h + 1) * dh],
                                  preferred_element_type=jnp.float32)
        oh = attn * inv3[h]
        contrib = jnp.dot(oh, p["wo"][h * dh:(h + 1) * dh, :],
                          preferred_element_type=jnp.float32)
        out = contrib if out is None else out + contrib
    return out + p["bo"]


def _resblock(x, p, heads, mask, prefix):
    h = _layernorm(x, p["ln1_g"], p["ln1_b"])
    x = x + _mha(h, p, heads, mask, prefix)
    h = _layernorm(x, p["ln2_g"], p["ln2_b"])
    h = jnp.dot(h, p["wfc1"], preferred_element_type=jnp.float32) + p["bfc1"]
    h = h * jax.nn.sigmoid(1.702 * h)                 # CLIP QuickGELU
    h = jnp.dot(h, p["wfc2"], preferred_element_type=jnp.float32) + p["bfc2"]
    return x + h


def _layer_params(big_ref, wfc2_ref, vec_ref, base_row, l, d):
    """Unpack layer l from the packed weight / small-vector inputs."""
    big = big_ref[l]                                  # [d, 8d] = wqkv|wo|wfc1
    r0 = base_row + 8 * l
    return dict(
        wqkv=big[:, 0:3 * d], wo=big[:, 3 * d:4 * d], wfc1=big[:, 4 * d:8 * d],
        wfc2=wfc2_ref[l],
        ln1_g=vec_ref[r0 + 0:r0 + 1, 0:d], ln1_b=vec_ref[r0 + 1:r0 + 2, 0:d],
        ln2_g=vec_ref[r0 + 2:r0 + 3, 0:d], ln2_b=vec_ref[r0 + 3:r0 + 4, 0:d],
        bqkv=vec_ref[r0 + 4:r0 + 5, 0:3 * d], bo=vec_ref[r0 + 5:r0 + 6, 0:d],
        bfc1=vec_ref[r0 + 6:r0 + 7, 0:4 * d], bfc2=vec_ref[r0 + 7:r0 + 8, 0:d],
    )


# ----------------------------------------------------------------------------
# The single fused kernel: vision tower + text tower + normalize + logits
# ----------------------------------------------------------------------------
def _fused_kernel(patches_ref, conv_w_ref, v_base_ref, prefix_ref,
                  v_big_ref, v_wfc2_ref, v_vec_ref, vproj_ref,
                  prompts_ref, t_big_ref, t_wfc2_ref, t_vec_ref, tproj_ref,
                  logits_ref, feat_ref, *, eot_pos):
    # ---------------- vision tower: one [B*T_TOTAL, WIDTH] slab ----------------
    # Patch rows are pre-padded with zero rows at the cls / instance slots, so a
    # single matmul + the precomputed base slab assembles the folded sequence.
    x = jnp.dot(patches_ref[...], conv_w_ref[...],
                preferred_element_type=jnp.float32) + v_base_ref[...]
    x = _layernorm(x, v_vec_ref[VR_LNPRE:VR_LNPRE + 1, 0:WIDTH],
                   v_vec_ref[VR_LNPRE + 1:VR_LNPRE + 2, 0:WIDTH])
    v_mask = _block_mask(B, T_TOTAL, causal=False)            # built once
    prefix_all = prefix_ref[...]                              # [Lp*layers, W]
    for l in range(V_LAYERS):
        p = _layer_params(v_big_ref, v_wfc2_ref, v_vec_ref, VR_LAYER0, l, WIDTH)
        pre = (prefix_all[l * PREFIX_LEN:(l + 1) * PREFIX_LEN, :]
               if l < PREFIX_LAYERS else None)
        x = _resblock(x, p, V_HEADS, v_mask, pre)
    cls = jnp.concatenate(
        [x[b * T_TOTAL:b * T_TOTAL + 1, :] for b in range(B)], axis=0)  # [B, W]
    cls = _layernorm(cls, v_vec_ref[VR_LNPOST:VR_LNPOST + 1, 0:WIDTH],
                     v_vec_ref[VR_LNPOST + 1:VR_LNPOST + 2, 0:WIDTH])
    img = jnp.dot(cls, vproj_ref[...], preferred_element_type=jnp.float32)

    # ---------------- text tower: one [N_CLS*TEXT_SEQ, T_WIDTH] slab ------------
    t = prompts_ref[...]                    # positional embedding folded at pack
    t_mask = _block_mask(N_CLS, TEXT_SEQ, causal=True)        # built once
    for l in range(T_LAYERS):
        p = _layer_params(t_big_ref, t_wfc2_ref, t_vec_ref, TR_LAYER0, l, T_WIDTH)
        t = _resblock(t, p, T_HEADS, t_mask, None)
    t = _layernorm(t, t_vec_ref[TR_LNF:TR_LNF + 1, 0:T_WIDTH],
                   t_vec_ref[TR_LNF + 1:TR_LNF + 2, 0:T_WIDTH])
    # EOT rows: static positions baked from the fixed tokenized prompts.
    eot = jnp.concatenate(
        [t[c * TEXT_SEQ + eot_pos[c]:c * TEXT_SEQ + eot_pos[c] + 1, :]
         for c in range(N_CLS)], axis=0)                       # [N_CLS, Tw]
    txt = jnp.dot(eot, tproj_ref[...], preferred_element_type=jnp.float32)

    # ---------------- logits epilogue (single store per output) -----------------
    img_n = img * jax.lax.rsqrt(jnp.sum(img * img, axis=-1, keepdims=True))
    txt_n = txt * jax.lax.rsqrt(jnp.sum(txt * txt, axis=-1, keepdims=True))
    scale = jnp.exp(t_vec_ref[TR_SCALE:TR_SCALE + 1, 0:1])     # logit_scale.exp()
    logits_ref[...] = scale * jax.lax.dot_general(
        img_n, txt_n, (((1,), (1,)), ((), ())), preferred_element_type=jnp.float32)
    feat_ref[...] = img_n


# ----------------------------------------------------------------------------
# PrefixOnePromptNet.forward
# ----------------------------------------------------------------------------
def forward(image, packed, eot_pos, task_id=0):
    bsz, c, h, w = image.shape
    gh, gw = h // PATCH, w // PATCH
    n_patch = gh * gw
    # patchify (one relayout) and pad with zero rows at the cls / instance-token
    # slots so the in-kernel patch-embed matmul writes directly into the folded
    # sequence slab (conv1 has no bias, so padded rows stay exactly zero).
    patches = image.reshape(bsz, c, gh, PATCH, gw, PATCH)
    patches = patches.transpose(0, 2, 4, 1, 3, 5).reshape(bsz, n_patch, c * PATCH * PATCH)
    pad_cls = jnp.zeros((bsz, 1, c * PATCH * PATCH), patches.dtype)
    pad_share = jnp.zeros((bsz, SHARE_LEN, c * PATCH * PATCH), patches.dtype)
    patches = jnp.concatenate([pad_cls, patches, pad_share], axis=1)
    patches = patches.reshape(bsz * (1 + n_patch + SHARE_LEN),
                              c * PATCH * PATCH).astype(jnp.float32)

    # PrefixKeqV prompt for the current task (numtask is a static attribute).
    prefix = packed["prefix_pool"][:, task_id].reshape(PREFIX_LAYERS * PREFIX_LEN, WIDTH)

    inputs = (patches, packed["conv_w"], packed["v_base"], prefix,
              packed["v_big"], packed["v_wfc2"], packed["v_vec"],
              packed["visual_proj"],
              packed["prompts"], packed["t_big"], packed["t_wfc2"],
              packed["t_vec"], packed["text_proj"])

    vmem = pltpu.MemorySpace.VMEM
    logits, feats = pl.pallas_call(
        functools.partial(_fused_kernel, eot_pos=tuple(eot_pos)),
        out_shape=(jax.ShapeDtypeStruct((B, N_CLS), jnp.float32),
                   jax.ShapeDtypeStruct((B, EMBED), jnp.float32)),
        in_specs=[pl.BlockSpec(memory_space=vmem)] * len(inputs),
        out_specs=(pl.BlockSpec(memory_space=vmem),
                   pl.BlockSpec(memory_space=vmem)),
    )(*inputs)
    return {"logits": logits, "features": feats}


# ----------------------------------------------------------------------------
# Deterministic synthetic parameters (module __init__ shapes, not a checkpoint)
# ----------------------------------------------------------------------------
def _init_raw_params(key):
    keys = iter(jax.random.split(key, 256))
    p02 = lambda shape: 0.02 * jax.random.normal(next(keys), shape, jnp.float32)

    def block(width):
        return dict(
            ln1_g=jnp.ones((width,), jnp.float32), ln1_b=jnp.zeros((width,), jnp.float32),
            ln2_g=jnp.ones((width,), jnp.float32), ln2_b=jnp.zeros((width,), jnp.float32),
            w_qkv=p02((width, 3 * width)), b_qkv=jnp.zeros((3 * width,), jnp.float32),
            w_o=p02((width, width)), b_o=jnp.zeros((width,), jnp.float32),
            w_fc1=p02((width, 4 * width)), b_fc1=jnp.zeros((4 * width,), jnp.float32),
            w_fc2=p02((4 * width, width)), b_fc2=jnp.zeros((width,), jnp.float32),
        )

    tokenized = jnp.zeros((N_CLS, TEXT_SEQ), jnp.int32)
    tokenized = tokenized.at[:, 0].set(49406)                                   # SOS
    tokenized = tokenized.at[jnp.arange(N_CLS), jnp.array([5, 7])].set(49407)   # EOT

    return dict(
        conv_w=p02((PATCH_DIM, WIDTH)),
        cls_emb=p02((WIDTH,)),
        v_pos=p02((1 + N_PATCH, WIDTH)),
        ln_pre_g=jnp.ones((WIDTH,), jnp.float32), ln_pre_b=jnp.zeros((WIDTH,), jnp.float32),
        v_blocks=[block(WIDTH) for _ in range(V_LAYERS)],
        ln_post_g=jnp.ones((WIDTH,), jnp.float32), ln_post_b=jnp.zeros((WIDTH,), jnp.float32),
        visual_proj=p02((WIDTH, EMBED)),
        share_prompt_w=p02((SHARE_LEN, WIDTH)),          # nn.Linear(embd, L).weight
        prefix_pool=p02((PREFIX_LAYERS, TOTAL_SESSIONS, PREFIX_LEN, WIDTH)),  # PrefixKeqV
        prompts=p02((N_CLS, TEXT_SEQ, T_WIDTH)),         # PromptLearner() output
        tokenized_prompts=tokenized,
        t_pos=p02((TEXT_SEQ, T_WIDTH)),
        t_blocks=[block(T_WIDTH) for _ in range(T_LAYERS)],
        ln_final_g=jnp.ones((T_WIDTH,), jnp.float32), ln_final_b=jnp.zeros((T_WIDTH,), jnp.float32),
        text_projection=p02((T_WIDTH, EMBED)),
        logit_scale=jnp.full((1, 1), math.log(1.0 / 0.07), jnp.float32),
    )


def _pack_params(raw):
    """Pack/stack params once at init: big per-layer weight slabs + one small
    sublane-padded [rows, 128] vector pack per tower (13 kernel inputs total)."""
    def vec_pack(rows):
        mat = jnp.zeros((_pad8(len(rows)), VEC_LANES), jnp.float32)
        for i, v in enumerate(rows):
            v = jnp.asarray(v, jnp.float32).reshape(-1)
            mat = mat.at[i, :v.shape[0]].set(v)
        return mat

    def layer_rows(blk):
        return [blk["ln1_g"], blk["ln1_b"], blk["ln2_g"], blk["ln2_b"],
                blk["b_qkv"], blk["b_o"], blk["b_fc1"], blk["b_fc2"]]

    def big_stack(blocks):      # [L, W, 8W] = wqkv | wo | wfc1 along lanes
        return jnp.stack(
            [jnp.concatenate([b["w_qkv"], b["w_o"], b["w_fc1"]], axis=1)
             for b in blocks], axis=0)

    def fc2_stack(blocks):      # [L, 4W, W]
        return jnp.stack([b["w_fc2"] for b in blocks], axis=0)

    vb, tb = raw["v_blocks"], raw["t_blocks"]

    v_rows = [raw["ln_pre_g"], raw["ln_pre_b"], raw["ln_post_g"], raw["ln_post_b"]]
    for blk in vb:
        v_rows += layer_rows(blk)
    t_rows = [raw["ln_final_g"], raw["ln_final_b"], raw["logit_scale"].reshape(-1)]
    for blk in tb:
        t_rows += layer_rows(blk)

    # folded-sequence base: [cls_emb + pos0 ; pos[1:] ; share_prompt.weight]
    base_seq = jnp.concatenate(
        [(raw["cls_emb"] + raw["v_pos"][0]).reshape(1, WIDTH),
         raw["v_pos"][1:], raw["share_prompt_w"]], axis=0)        # [T_TOTAL, W]
    v_base = jnp.tile(base_seq, (B, 1))                           # [B*T_TOTAL, W]

    # text positional embedding folded into the (parameter) prompts at pack time
    prompts = (raw["prompts"] + raw["t_pos"][None]).reshape(N_CLS * TEXT_SEQ, T_WIDTH)

    # EOT positions are static (tokenized prompts are fixed buffers)
    eot_pos = tuple(int(i) for i in jnp.argmax(raw["tokenized_prompts"], axis=-1))

    packed = dict(
        conv_w=raw["conv_w"],
        v_base=v_base,
        prefix_pool=raw["prefix_pool"],
        v_big=big_stack(vb), v_wfc2=fc2_stack(vb), v_vec=vec_pack(v_rows),
        visual_proj=raw["visual_proj"],
        prompts=prompts,
        t_big=big_stack(tb), t_wfc2=fc2_stack(tb), t_vec=vec_pack(t_rows),
        text_proj=raw["text_projection"],
    )
    return packed, eot_pos


if __name__ == "__main__":
    key = jax.random.PRNGKey(0)
    pkey, ikey = jax.random.split(key)
    raw = _init_raw_params(pkey)
    packed, eot_pos = _pack_params(raw)
    image = jax.random.normal(ikey, (B, C_IN, IMG, IMG), jnp.float32)

    fwd = jax.jit(forward, static_argnames=("task_id", "eot_pos"))
    out = fwd(image, packed, eot_pos=eot_pos, task_id=0)          # numtask = 0
    logits = jax.block_until_ready(out["logits"])
    feats = jax.block_until_ready(out["features"])

    assert logits.shape == (B, N_CLS), logits.shape
    assert feats.shape == (B, EMBED), feats.shape
    assert bool(jnp.all(jnp.isfinite(logits))) and bool(jnp.all(jnp.isfinite(feats)))
    # image features are L2-normalized
    assert bool(jnp.all(jnp.abs(jnp.sum(feats * feats, axis=-1) - 1.0) < 1e-4))
    print("KERNEL_OK")
</pallas_src>

<mosaic_0001>
module attributes {stable_mosaic.version = 11 : i64} {
  func.func @_fused_kernel(%arg0: memref<18x192xf32, #tpu.memory_space<vmem>>, %arg1: memref<192x32xf32, #tpu.memory_space<vmem>>, %arg2: memref<18x32xf32, #tpu.memory_space<vmem>>, %arg3: memref<4x32xf32, #tpu.memory_space<vmem>>, %arg4: memref<2x32x256xf32, #tpu.memory_space<vmem>>, %arg5: memref<2x128x32xf32, #tpu.memory_space<vmem>>, %arg6: memref<24x128xf32, #tpu.memory_space<vmem>>, %arg7: memref<32x32xf32, #tpu.memory_space<vmem>>, %arg8: memref<16x32xf32, #tpu.memory_space<vmem>>, %arg9: memref<1x32x256xf32, #tpu.memory_space<vmem>>, %arg10: memref<1x128x32xf32, #tpu.memory_space<vmem>>, %arg11: memref<16x128xf32, #tpu.memory_space<vmem>>, %arg12: memref<32x32xf32, #tpu.memory_space<vmem>>, %arg13: memref<2x2xf32, #tpu.memory_space<vmem>>, %arg14: memref<2x32xf32, #tpu.memory_space<vmem>>) attributes {dimension_semantics = [], scalar_prefetch = 0 : i64, scratch_operands = 0 : i64, tpu.core_type = #tpu.core_type<tc>} {
    %c0 = arith.constant 0 : index
    %c0_0 = arith.constant 0 : index
    %0 = vector.load %arg0[%c0, %c0_0] : memref<18x192xf32, #tpu.memory_space<vmem>>, vector<18x192xf32>
    %c0_1 = arith.constant 0 : index
    %c0_2 = arith.constant 0 : index
    %1 = vector.load %arg1[%c0_1, %c0_2] : memref<192x32xf32, #tpu.memory_space<vmem>>, vector<192x32xf32>
    %cst = arith.constant dense<0.000000e+00> : vector<18x32xf32>
    %2 = tpu.matmul %0, %1, %cst {dimension_numbers = #tpu.dot_dimension_numbers<[1], [0], [0], [1], [0, 0, 1, 1], [], []>} : vector<18x192xf32>, vector<192x32xf32>, vector<18x32xf32> -> vector<18x32xf32>
    %c0_3 = arith.constant 0 : index
    %c0_4 = arith.constant 0 : index
    %3 = vector.load %arg2[%c0_3, %c0_4] : memref<18x32xf32, #tpu.memory_space<vmem>>, vector<18x32xf32>
    %4 = arith.addf %2, %3 : vector<18x32xf32>
    %c0_5 = arith.constant 0 : index
    %c0_6 = arith.constant 0 : index
    %5 = vector.load %arg6[%c0_5, %c0_6] : memref<24x128xf32, #tpu.memory_space<vmem>>, vector<1x32xf32>
    %c1 = arith.constant 1 : index
    %c0_7 = arith.constant 0 : index
    %6 = vector.load %arg6[%c1, %c0_7] : memref<24x128xf32, #tpu.memory_space<vmem>>, vector<1x32xf32>
    %cst_8 = arith.constant dense<0.000000e+00> : vector<18xf32>
    %7 = vector.multi_reduction <add>, %4, %cst_8 [1] : vector<18x32xf32> to vector<18xf32>
    %8 = vector.shape_cast %7 : vector<18xf32> to vector<18x1xf32>
    %9 = arith.mulf %4, %4 : vector<18x32xf32>
    %cst_9 = arith.constant dense<0.000000e+00> : vector<18xf32>
    %10 = vector.multi_reduction <add>, %9, %cst_9 [1] : vector<18x32xf32> to vector<18xf32>
    %11 = vector.shape_cast %10 : vector<18xf32> to vector<18x1xf32>
    %cst_10 = arith.constant 3.125000e-02 : f32
    %12 = vector.broadcast %cst_10 : f32 to vector<18x1xf32>
    %13 = arith.mulf %8, %12 : vector<18x1xf32>
    %cst_11 = arith.constant 3.125000e-02 : f32
    %14 = vector.broadcast %cst_11 : f32 to vector<18x1xf32>
    %15 = arith.mulf %11, %14 : vector<18x1xf32>
    %16 = arith.mulf %13, %13 : vector<18x1xf32>
    %17 = arith.subf %15, %16 : vector<18x1xf32>
    %18 = vector.broadcast %13 : vector<18x1xf32> to vector<18x32xf32>
    %19 = arith.subf %4, %18 : vector<18x32xf32>
    %cst_12 = arith.constant 9.99999974E-6 : f32
    %20 = vector.broadcast %cst_12 : f32 to vector<18x1xf32>
    %21 = arith.addf %17, %20 : vector<18x1xf32>
    %22 = math.rsqrt %21 : vector<18x1xf32>
    %23 = vector.broadcast %22 : vector<18x1xf32> to vector<18x32xf32>
    %24 = arith.mulf %19, %23 : vector<18x32xf32>
    %25 = vector.broadcast %5 : vector<1x32xf32> to vector<18x32xf32>
    %26 = arith.mulf %24, %25 : vector<18x32xf32>
    %27 = vector.broadcast %6 : vector<1x32xf32> to vector<18x32xf32>
    %28 = arith.addf %26, %27 : vector<18x32xf32>
    %29 = tpu.iota {dimensions = array<i32: 0>} : vector<18x18xi32>
    %30 = tpu.iota {dimensions = array<i32: 1>} : vector<18x18xi32>
    %c0_i32 = arith.constant 0 : i32
    %31 = vector.broadcast %c0_i32 : i32 to vector<18x18xi32>
    %32 = arith.cmpi sge, %29, %31 : vector<18x18xi32>
    %c9_i32 = arith.constant 9 : i32
    %33 = vector.broadcast %c9_i32 : i32 to vector<18x18xi32>
    %34 = arith.cmpi slt, %29, %33 : vector<18x18xi32>
    %35 = arith.andi %32, %34 : vector<18x18xi1>
    %c0_i32_13 = arith.constant 0 : i32
    %36 = vector.broadcast %c0_i32_13 : i32 to vector<18x18xi32>
    %37 = arith.cmpi sge, %30, %36 : vector<18x18xi32>
    %38 = arith.andi %35, %37 : vector<18x18xi1>
    %c9_i32_14 = arith.constant 9 : i32
    %39 = vector.broadcast %c9_i32_14 : i32 to vector<18x18xi32>
    %40 = arith.cmpi slt, %30, %39 : vector<18x18xi32>
    %41 = arith.andi %38, %40 : vector<18x18xi1>
    %c9_i32_15 = arith.constant 9 : i32
    %42 = vector.broadcast %c9_i32_15 : i32 to vector<18x18xi32>
    %43 = arith.cmpi sge, %29, %42 : vector<18x18xi32>
    %c18_i32 = arith.constant 18 : i32
    %44 = vector.broadcast %c18_i32 : i32 to vector<18x18xi32>
    %45 = arith.cmpi slt, %29, %44 : vector<18x18xi32>
    %46 = arith.andi %43, %45 : vector<18x18xi1>
    %c9_i32_16 = arith.constant 9 : i32
    %47 = vector.broadcast %c9_i32_16 : i32 to vector<18x18xi32>
    %48 = arith.cmpi sge, %30, %47 : vector<18x18xi32>
    %49 = arith.andi %46, %48 : vector<18x18xi1>
    %c18_i32_17 = arith.constant 18 : i32
    %50 = vector.broadcast %c18_i32_17 : i32 to vector<18x18xi32>
    %51 = arith.cmpi slt, %30, %50 : vector<18x18xi32>
    %52 = arith.andi %49, %51 : vector<18x18xi1>
    %53 = arith.ori %41, %52 : vector<18x18xi1>
    %c0_18 = arith.constant 0 : index
    %c0_19 = arith.constant 0 : index
    %54 = vector.load %arg3[%c0_18, %c0_19] : memref<4x32xf32, #tpu.memory_space<vmem>>, vector<4x32xf32>
    %c0_20 = arith.constant 0 : index
    %c0_21 = arith.constant 0 : index
    %c0_22 = arith.constant 0 : index
    %55 = vector.load %arg4[%c0_20, %c0_21, %c0_22] : memref<2x32x256xf32, #tpu.memory_space<vmem>>, vector<1x32x256xf32>
    %56 = vector.shape_cast %55 : vector<1x32x256xf32> to vector<32x256xf32>
    %57 = vector.extract_strided_slice %56 {offsets = [0, 0], sizes = [32, 96], strides = [1, 1]} : vector<32x256xf32> to vector<32x96xf32>
    %58 = vector.extract_strided_slice %56 {offsets = [0, 96], sizes = [32, 32], strides = [1, 1]} : vector<32x256xf32> to vector<32x32xf32>
    %59 = vector.extract_strided_slice %56 {offsets = [0, 128], sizes = [32, 128], strides = [1, 1]} : vector<32x256xf32> to vector<32x128xf32>
    %c0_23 = arith.constant 0 : index
    %c0_24 = arith.constant 0 : index
    %c0_25 = arith.constant 0 : index
    %60 = vector.load %arg5[%c0_23, %c0_24, %c0_25] : memref<2x128x32xf32, #tpu.memory_space<vmem>>, vector<1x128x32xf32>
    %61 = vector.shape_cast %60 : vector<1x128x32xf32> to vector<128x32xf32>
    %c4 = arith.constant 4 : index
    %c0_26 = arith.constant 0 : index
    %62 = vector.load %arg6[%c4, %c0_26] : memref<24x128xf32, #tpu.memory_space<vmem>>, vector<1x32xf32>
    %c5 = arith.constant 5 : index
    %c0_27 = arith.constant 0 : index
    %63 = vector.load %arg6[%c5, %c0_27] : memref<24x128xf32, #tpu.memory_space<vmem>>, vector<1x32xf32>
    %c6 = arith.constant 6 : index
    %c0_28 = arith.constant 0 : index
    %64 = vector.load %arg6[%c6, %c0_28] : memref<24x128xf32, #tpu.memory_space<vmem>>, vector<1x32xf32>
    %c7 = arith.constant 7 : index
    %c0_29 = arith.constant 0 : index
    %65 = vector.load %arg6[%c7, %c0_29] : memref<24x128xf32, #tpu.memory_space<vmem>>, vector<1x32xf32>
    %c8 = arith.constant 8 : index
    %c0_30 = arith.constant 0 : index
    %66 = vector.load %arg6[%c8, %c0_30] : memref<24x128xf32, #tpu.memory_space<vmem>>, vector<1x96xf32>
    %c9 = arith.constant 9 : index
    %c0_31 = arith.constant 0 : index
    %67 = vector.load %arg6[%c9, %c0_31] : memref<24x128xf32, #tpu.memory_space<vmem>>, vector<1x32xf32>
    %c10 = arith.constant 10 : index
    %c0_32 = arith.constant 0 : index
    %68 = vector.load %arg6[%c10, %c0_32] : memref<24x128xf32, #tpu.memory_space<vmem>>, vector<1x128xf32>
    %c11 = arith.constant 11 : index
    %c0_33 = arith.constant 0 : index
    %69 = vector.load %arg6[%c11, %c0_33] : memref<24x128xf32, #tpu.memory_space<vmem>>, vector<1x32xf32>
    %cst_34 = arith.constant dense<0.000000e+00> : vector<18xf32>
    %70 = vector.multi_reduction <add>, %28, %cst_34 [1] : vector<18x32xf32> to vector<18xf32>
    %71 = vector.shape_cast %70 : vector<18xf32> to vector<18x1xf32>
    %72 = arith.mulf %28, %28 : vector<18x32xf32>
    %cst_35 = arith.constant dense<0.000000e+00> : vector<18xf32>
    %73 = vector.multi_reduction <add>, %72, %cst_35 [1] : vector<18x32xf32> to vector<18xf32>
    %74 = vector.shape_cast %73 : vector<18xf32> to vector<18x1xf32>
    %cst_36 = arith.constant 3.125000e-02 : f32
    %75 = vector.broadcast %cst_36 : f32 to vector<18x1xf32>
    %76 = arith.mulf %71, %75 : vector<18x1xf32>
    %cst_37 = arith.constant 3.125000e-02 : f32
    %77 = vector.broadcast %cst_37 : f32 to vector<18x1xf32>
    %78 = arith.mulf %74, %77 : vector<18x1xf32>
    %79 = arith.mulf %76, %76 : vector<18x1xf32>
    %80 = arith.subf %78, %79 : vector<18x1xf32>
    %81 = vector.broadcast %76 : vector<18x1xf32> to vector<18x32xf32>
    %82 = arith.subf %28, %81 : vector<18x32xf32>
    %cst_38 = arith.constant 9.99999974E-6 : f32
    %83 = vector.broadcast %cst_38 : f32 to vector<18x1xf32>
    %84 = arith.addf %80, %83 : vector<18x1xf32>
    %85 = math.rsqrt %84 : vector<18x1xf32>
    %86 = vector.broadcast %85 : vector<18x1xf32> to vector<18x32xf32>
    %87 = arith.mulf %82, %86 : vector<18x32xf32>
    %88 = vector.broadcast %62 : vector<1x32xf32> to vector<18x32xf32>
    %89 = arith.mulf %87, %88 : vector<18x32xf32>
    %90 = vector.broadcast %63 : vector<1x32xf32> to vector<18x32xf32>
    %91 = arith.addf %89, %90 : vector<18x32xf32>
    %cst_39 = arith.constant dense<0.000000e+00> : vector<18x96xf32>
    %92 = tpu.matmul %91, %57, %cst_39 {dimension_numbers = #tpu.dot_dimension_numbers<[1], [0], [0], [1], [0, 0, 1, 1], [], []>} : vector<18x32xf32>, vector<32x96xf32>, vector<18x96xf32> -> vector<18x96xf32>
    %93 = vector.broadcast %66 : vector<1x96xf32> to vector<18x96xf32>
    %94 = arith.addf %92, %93 : vector<18x96xf32>
    %95 = vector.extract_strided_slice %94 {offsets = [0, 0], sizes = [18, 32], strides = [1, 1]} : vector<18x96xf32> to vector<18x32xf32>
    %cst_40 = arith.constant 2.500000e-01 : f32
    %96 = vector.broadcast %cst_40 : f32 to vector<18x32xf32>
    %97 = arith.mulf %95, %96 : vector<18x32xf32>
    %98 = vector.extract_strided_slice %97 {offsets = [0, 0], sizes = [18, 16], strides = [1, 1]} : vector<18x32xf32> to vector<18x16xf32>
    %99 = vector.extract_strided_slice %94 {offsets = [0, 32], sizes = [18, 16], strides = [1, 1]} : vector<18x96xf32> to vector<18x16xf32>
    %cst_41 = arith.constant dense<0.000000e+00> : vector<18x18xf32>
    %100 = tpu.matmul %98, %99, %cst_41 {dimension_numbers = #tpu.dot_dimension_numbers<[1], [1], [0], [0], [0, 0, 1, 0], [], []>} : vector<18x16xf32>, vector<18x16xf32>, vector<18x18xf32> -> vector<18x18xf32>
    %cst_42 = arith.constant -1.000000e+30 : f32
    %101 = vector.broadcast %cst_42 : f32 to vector<18x18xf32>
    %102 = arith.select %53, %100, %101 : vector<18x18xi1>, vector<18x18xf32>
    %103 = vector.extract_strided_slice %54 {offsets = [0, 0], sizes = [4, 16], strides = [1, 1]} : vector<4x32xf32> to vector<4x16xf32>
    %cst_43 = arith.constant dense<0.000000e+00> : vector<18x4xf32>
    %104 = tpu.matmul %98, %103, %cst_43 {dimension_numbers = #tpu.dot_dimension_numbers<[1], [1], [0], [0], [0, 0, 1, 0], [], []>} : vector<18x16xf32>, vector<4x16xf32>, vector<18x4xf32> -> vector<18x4xf32>
    %105 = vector.extract_strided_slice %97 {offsets = [0, 16], sizes = [18, 16], strides = [1, 1]} : vector<18x32xf32> to vector<18x16xf32>
    %106 = vector.extract_strided_slice %94 {offsets = [0, 48], sizes = [18, 16], strides = [1, 1]} : vector<18x96xf32> to vector<18x16xf32>
    %cst_44 = arith.constant dense<0.000000e+00> : vector<18x18xf32>
    %107 = tpu.matmul %105, %106, %cst_44 {dimension_numbers = #tpu.dot_dimension_numbers<[1], [1], [0], [0], [0, 0, 1, 0], [], []>} : vector<18x16xf32>, vector<18x16xf32>, vector<18x18xf32> -> vector<18x18xf32>
    %cst_45 = arith.constant -1.000000e+30 : f32
    %108 = vector.broadcast %cst_45 : f32 to vector<18x18xf32>
    %109 = arith.select %53, %107, %108 : vector<18x18xi1>, vector<18x18xf32>
    %110 = vector.extract_strided_slice %54 {offsets = [0, 16], sizes = [4, 16], strides = [1, 1]} : vector<4x32xf32> to vector<4x16xf32>
    %cst_46 = arith.constant dense<0.000000e+00> : vector<18x4xf32>
    %111 = tpu.matmul %105, %110, %cst_46 {dimension_numbers = #tpu.dot_dimension_numbers<[1], [1], [0], [0], [0, 0, 1, 0], [], []>} : vector<18x16xf32>, vector<4x16xf32>, vector<18x4xf32> -> vector<18x4xf32>
    %112 = vector.shape_cast %102 : vector<18x18xf32> to vector<1x18x18xf32>
    %113 = vector.shape_cast %109 : vector<18x18xf32> to vector<1x18x18xf32>
    %114 = tpu.concatenate %112, %113 in 0 : vector<1x18x18xf32>, vector<1x18x18xf32> -> vector<2x18x18xf32>
    %115 = vector.shape_cast %104 : vector<18x4xf32> to vector<1x18x4xf32>
    %116 = vector.shape_cast %111 : vector<18x4xf32> to vector<1x18x4xf32>
    %117 = tpu.concatenate %115, %116 in 0 : vector<1x18x4xf32>, vector<1x18x4xf32> -> vector<2x18x4xf32>
    %cst_47 = arith.constant dense<0xFF800000> : vector<2x18xf32>
    %118 = vector.multi_reduction <maximumf>, %114, %cst_47 [2] : vector<2x18x18xf32> to vector<2x18xf32>
    %119 = vector.shape_cast %118 : vector<2x18xf32> to vector<2x18x1xf32>
    %cst_48 = arith.constant dense<0xFF800000> : vector<2x18xf32>
    %120 = vector.multi_reduction <maximumf>, %117, %cst_48 [2] : vector<2x18x4xf32> to vector<2x18xf32>
    %121 = vector.shape_cast %120 : vector<2x18xf32> to vector<2x18x1xf32>
    %122 = arith.maximumf %119, %121 : vector<2x18x1xf32>
    %123 = vector.broadcast %122 : vector<2x18x1xf32> to vector<2x18x18xf32>
    %124 = arith.subf %114, %123 : vector<2x18x18xf32>
    %125 = math.exp %124 : vector<2x18x18xf32>
    %126 = vector.broadcast %122 : vector<2x18x1xf32> to vector<2x18x4xf32>
    %127 = arith.subf %117, %126 : vector<2x18x4xf32>
    %128 = math.exp %127 : vector<2x18x4xf32>
    %cst_49 = arith.constant dense<0.000000e+00> : vector<2x18xf32>
    %129 = vector.multi_reduction <add>, %125, %cst_49 [2] : vector<2x18x18xf32> to vector<2x18xf32>
    %130 = vector.shape_cast %129 : vector<2x18xf32> to vector<2x18x1xf32>
    %cst_50 = arith.constant dense<0.000000e+00> : vector<2x18xf32>
    %131 = vector.multi_reduction <add>, %128, %cst_50 [2] : vector<2x18x4xf32> to vector<2x18xf32>
    %132 = vector.shape_cast %131 : vector<2x18xf32> to vector<2x18x1xf32>
    %133 = arith.addf %130, %132 : vector<2x18x1xf32>
    %134 = tpu.reciprocal %133 {approx = true} : vector<2x18x1xf32> -> vector<2x18x1xf32>
    %135 = vector.extract_strided_slice %94 {offsets = [0, 64], sizes = [18, 16], strides = [1, 1]} : vector<18x96xf32> to vector<18x16xf32>
    %136 = vector.extract_strided_slice %125 {offsets = [0, 0, 0], sizes = [1, 18, 18], strides = [1, 1, 1]} : vector<2x18x18xf32> to vector<1x18x18xf32>
    %137 = vector.shape_cast %136 : vector<1x18x18xf32> to vector<18x18xf32>
    %cst_51 = arith.constant dense<0.000000e+00> : vector<18x16xf32>
    %138 = tpu.matmul %137, %135, %cst_51 {dimension_numbers = #tpu.dot_dimension_numbers<[1], [0], [0], [1], [0, 0, 1, 1], [], []>} : vector<18x18xf32>, vector<18x16xf32>, vector<18x16xf32> -> vector<18x16xf32>
    %139 = vector.extract_strided_slice %128 {offsets = [0, 0, 0], sizes = [1, 18, 4], strides = [1, 1, 1]} : vector<2x18x4xf32> to vector<1x18x4xf32>
    %140 = vector.shape_cast %139 : vector<1x18x4xf32> to vector<18x4xf32>
    %141 = vector.extract_strided_slice %54 {offsets = [0, 0], sizes = [4, 16], strides = [1, 1]} : vector<4x32xf32> to vector<4x16xf32>
    %cst_52 = arith.constant dense<0.000000e+00> : vector<18x16xf32>
    %142 = tpu.matmul %140, %141, %cst_52 {dimension_numbers = #tpu.dot_dimension_numbers<[1], [0], [0], [1], [0, 0, 1, 1], [], []>} : vector<18x4xf32>, vector<4x16xf32>, vector<18x16xf32> -> vector<18x16xf32>
    %143 = arith.addf %138, %142 : vector<18x16xf32>
    %144 = vector.extract_strided_slice %134 {offsets = [0, 0, 0], sizes = [1, 18, 1], strides = [1, 1, 1]} : vector<2x18x1xf32> to vector<1x18x1xf32>
    %145 = vector.shape_cast %144 : vector<1x18x1xf32> to vector<18x1xf32>
    %146 = vector.broadcast %145 : vector<18x1xf32> to vector<18x16xf32>
    %147 = arith.mulf %143, %146 : vector<18x16xf32>
    %148 = vector.extract_strided_slice %58 {offsets = [0, 0], sizes = [16, 32], strides = [1, 1]} : vector<32x32xf32> to vector<16x32xf32>
    %cst_53 = arith.constant dense<0.000000e+00> : vector<18x32xf32>
    %149 = tpu.matmul %147, %148, %cst_53 {dimension_numbers = #tpu.dot_dimension_numbers<[1], [0], [0], [1], [0, 0, 1, 1], [], []>} : vector<18x16xf32>, vector<16x32xf32>, vector<18x32xf32> -> vector<18x32xf32>
    %150 = vector.extract_strided_slice %94 {offsets = [0, 80], sizes = [18, 16], strides = [1, 1]} : vector<18x96xf32> to vector<18x16xf32>
    %151 = vector.extract_strided_slice %125 {offsets = [1, 0, 0], sizes = [1, 18, 18], strides = [1, 1, 1]} : vector<2x18x18xf32> to vector<1x18x18xf32>
    %152 = vector.shape_cast %151 : vector<1x18x18xf32> to vector<18x18xf32>
    %cst_54 = arith.constant dense<0.000000e+00> : vector<18x16xf32>
    %153 = tpu.matmul %152, %150, %cst_54 {dimension_numbers = #tpu.dot_dimension_numbers<[1], [0], [0], [1], [0, 0, 1, 1], [], []>} : vector<18x18xf32>, vector<18x16xf32>, vector<18x16xf32> -> vector<18x16xf32>
    %154 = vector.extract_strided_slice %128 {offsets = [1, 0, 0], sizes = [1, 18, 4], strides = [1, 1, 1]} : vector<2x18x4xf32> to vector<1x18x4xf32>
    %155 = vector.shape_cast %154 : vector<1x18x4xf32> to vector<18x4xf32>
    %156 = vector.extract_strided_slice %54 {offsets = [0, 16], sizes = [4, 16], strides = [1, 1]} : vector<4x32xf32> to vector<4x16xf32>
    %cst_55 = arith.constant dense<0.000000e+00> : vector<18x16xf32>
    %157 = tpu.matmul %155, %156, %cst_55 {dimension_numbers = #tpu.dot_dimension_numbers<[1], [0], [0], [1], [0, 0, 1, 1], [], []>} : vector<18x4xf32>, vector<4x16xf32>, vector<18x16xf32> -> vector<18x16xf32>
    %158 = arith.addf %153, %157 : vector<18x16xf32>
    %159 = vector.extract_strided_slice %134 {offsets = [1, 0, 0], sizes = [1, 18, 1], strides = [1, 1, 1]} : vector<2x18x1xf32> to vector<1x18x1xf32>
    %160 = vector.shape_cast %159 : vector<1x18x1xf32> to vector<18x1xf32>
    %161 = vector.broadcast %160 : vector<18x1xf32> to vector<18x16xf32>
    %162 = arith.mulf %158, %161 : vector<18x16xf32>
    %163 = vector.extract_strided_slice %58 {offsets = [16, 0], sizes = [16, 32], strides = [1, 1]} : vector<32x32xf32> to vector<16x32xf32>
    %cst_56 = arith.constant dense<0.000000e+00> : vector<18x32xf32>
    %164 = tpu.matmul %162, %163, %cst_56 {dimension_numbers = #tpu.dot_dimension_numbers<[1], [0], [0], [1], [0, 0, 1, 1], [], []>} : vector<18x16xf32>, vector<16x32xf32>, vector<18x32xf32> -> vector<18x32xf32>
    %165 = arith.addf %149, %164 : vector<18x32xf32>
    %166 = vector.broadcast %67 : vector<1x32xf32> to vector<18x32xf32>
    %167 = arith.addf %165, %166 : vector<18x32xf32>
    %168 = arith.addf %28, %167 : vector<18x32xf32>
    %cst_57 = arith.constant dense<0.000000e+00> : vector<18xf32>
    %169 = vector.multi_reduction <add>, %168, %cst_57 [1] : vector<18x32xf32> to vector<18xf32>
    %170 = vector.shape_cast %169 : vector<18xf32> to vector<18x1xf32>
    %171 = arith.mulf %168, %168 : vector<18x32xf32>
    %cst_58 = arith.constant dense<0.000000e+00> : vector<18xf32>
    %172 = vector.multi_reduction <add>, %171, %cst_58 [1] : vector<18x32xf32> to vector<18xf32>
    %173 = vector.shape_cast %172 : vector<18xf32> to vector<18x1xf32>
    %cst_59 = arith.constant 3.125000e-02 : f32
    %174 = vector.broadcast %cst_59 : f32 to vector<18x1xf32>
    %175 = arith.mulf %170, %174 : vector<18x1xf32>
    %cst_60 = arith.constant 3.125000e-02 : f32
    %176 = vector.broadcast %cst_60 : f32 to vector<18x1xf32>
    %177 = arith.mulf %173, %176 : vector<18x1xf32>
    %178 = arith.mulf %175, %175 : vector<18x1xf32>
    %179 = arith.subf %177, %178 : vector<18x1xf32>
    %180 = vector.broadcast %175 : vector<18x1xf32> to vector<18x32xf32>
    %181 = arith.subf %168, %180 : vector<18x32xf32>
    %cst_61 = arith.constant 9.99999974E-6 : f32
    %182 = vector.broadcast %cst_61 : f32 to vector<18x1xf32>
    %183 = arith.addf %179, %182 : vector<18x1xf32>
    %184 = math.rsqrt %183 : vector<18x1xf32>
    %185 = vector.broadcast %184 : vector<18x1xf32> to vector<18x32xf32>
    %186 = arith.mulf %181, %185 : vector<18x32xf32>
    %187 = vector.broadcast %64 : vector<1x32xf32> to vector<18x32xf32>
    %188 = arith.mulf %186, %187 : vector<18x32xf32>
    %189 = vector.broadcast %65 : vector<1x32xf32> to vector<18x32xf32>
    %190 = arith.addf %188, %189 : vector<18x32xf32>
    %cst_62 = arith.constant dense<0.000000e+00> : vector<18x128xf32>
    %191 = tpu.matmul %190, %59, %cst_62 {dimension_numbers = #tpu.dot_dimension_numbers<[1], [0], [0], [1], [0, 0, 1, 1], [], []>} : vector<18x32xf32>, vector<32x128xf32>, vector<18x128xf32> -> vector<18x128xf32>
    %192 = vector.broadcast %68 : vector<1x128xf32> to vector<18x128xf32>
    %193 = arith.addf %191, %192 : vector<18x128xf32>
    %cst_63 = arith.constant 1.702000e+00 : f32
    %194 = vector.broadcast %cst_63 : f32 to vector<18x128xf32>
    %195 = arith.mulf %194, %193 : vector<18x128xf32>
    %196 = arith.negf %195 : vector<18x128xf32>
    %197 = math.exp %196 : vector<18x128xf32>
    %cst_64 = arith.constant 1.000000e+00 : f32
    %198 = vector.broadcast %cst_64 : f32 to vector<18x128xf32>
    %199 = arith.addf %198, %197 : vector<18x128xf32>
    %200 = arith.divf %198, %199 : vector<18x128xf32>
    %201 = arith.mulf %193, %200 : vector<18x128xf32>
    %cst_65 = arith.constant dense<0.000000e+00> : vector<18x32xf32>
    %202 = tpu.matmul %201, %61, %cst_65 {dimension_numbers = #tpu.dot_dimension_numbers<[1], [0], [0], [1], [0, 0, 1, 1], [], []>} : vector<18x128xf32>, vector<128x32xf32>, vector<18x32xf32> -> vector<18x32xf32>
    %203 = vector.broadcast %69 : vector<1x32xf32> to vector<18x32xf32>
    %204 = arith.addf %202, %203 : vector<18x32xf32>
    %205 = arith.addf %168, %204 : vector<18x32xf32>
    %c1_66 = arith.constant 1 : index
    %c0_67 = arith.constant 0 : index
    %c0_68 = arith.constant 0 : index
    %206 = vector.load %arg4[%c1_66, %c0_67, %c0_68] : memref<2x32x256xf32, #tpu.memory_space<vmem>>, vector<1x32x256xf32>
    %207 = vector.shape_cast %206 : vector<1x32x256xf32> to vector<32x256xf32>
    %208 = vector.extract_strided_slice %207 {offsets = [0, 0], sizes = [32, 96], strides = [1, 1]} : vector<32x256xf32> to vector<32x96xf32>
    %209 = vector.extract_strided_slice %207 {offsets = [0, 96], sizes = [32, 32], strides = [1, 1]} : vector<32x256xf32> to vector<32x32xf32>
    %210 = vector.extract_strided_slice %207 {offsets = [0, 128], sizes = [32, 128], strides = [1, 1]} : vector<32x256xf32> to vector<32x128xf32>
    %c1_69 = arith.constant 1 : index
    %c0_70 = arith.constant 0 : index
    %c0_71 = arith.constant 0 : index
    %211 = vector.load %arg5[%c1_69, %c0_70, %c0_71] : memref<2x128x32xf32, #tpu.memory_space<vmem>>, vector<1x128x32xf32>
    %212 = vector.shape_cast %211 : vector<1x128x32xf32> to vector<128x32xf32>
    %c12 = arith.constant 12 : index
    %c0_72 = arith.constant 0 : index
    %213 = vector.load %arg6[%c12, %c0_72] : memref<24x128xf32, #tpu.memory_space<vmem>>, vector<1x32xf32>
    %c13 = arith.constant 13 : index
    %c0_73 = arith.constant 0 : index
    %214 = vector.load %arg6[%c13, %c0_73] : memref<24x128xf32, #tpu.memory_space<vmem>>, vector<1x32xf32>
    %c14 = arith.constant 14 : index
    %c0_74 = arith.constant 0 : index
    %215 = vector.load %arg6[%c14, %c0_74] : memref<24x128xf32, #tpu.memory_space<vmem>>, vector<1x32xf32>
    %c15 = arith.constant 15 : index
    %c0_75 = arith.constant 0 : index
    %216 = vector.load %arg6[%c15, %c0_75] : memref<24x128xf32, #tpu.memory_space<vmem>>, vector<1x32xf32>
    %c16 = arith.constant 16 : index
    %c0_76 = arith.constant 0 : index
    %217 = vector.load %arg6[%c16, %c0_76] : memref<24x128xf32, #tpu.memory_space<vmem>>, vector<1x96xf32>
    %c17 = arith.constant 17 : index
    %c0_77 = arith.constant 0 : index
    %218 = vector.load %arg6[%c17, %c0_77] : memref<24x128xf32, #tpu.memory_space<vmem>>, vector<1x32xf32>
    %c18 = arith.constant 18 : index
    %c0_78 = arith.constant 0 : index
    %219 = vector.load %arg6[%c18, %c0_78] : memref<24x128xf32, #tpu.memory_space<vmem>>, vector<1x128xf32>
    %c19 = arith.constant 19 : index
    %c0_79 = arith.constant 0 : index
    %220 = vector.load %arg6[%c19, %c0_79] : memref<24x128xf32, #tpu.memory_space<vmem>>, vector<1x32xf32>
    %cst_80 = arith.constant dense<0.000000e+00> : vector<18xf32>
    %221 = vector.multi_reduction <add>, %205, %cst_80 [1] : vector<18x32xf32> to vector<18xf32>
    %222 = vector.shape_cast %221 : vector<18xf32> to vector<18x1xf32>
    %223 = arith.mulf %205, %205 : vector<18x32xf32>
    %cst_81 = arith.constant dense<0.000000e+00> : vector<18xf32>
    %224 = vector.multi_reduction <add>, %223, %cst_81 [1] : vector<18x32xf32> to vector<18xf32>
    %225 = vector.shape_cast %224 : vector<18xf32> to vector<18x1xf32>
    %cst_82 = arith.constant 3.125000e-02 : f32
    %226 = vector.broadcast %cst_82 : f32 to vector<18x1xf32>
    %227 = arith.mulf %222, %226 : vector<18x1xf32>
    %cst_83 = arith.constant 3.125000e-02 : f32
    %228 = vector.broadcast %cst_83 : f32 to vector<18x1xf32>
    %229 = arith.mulf %225, %228 : vector<18x1xf32>
    %230 = arith.mulf %227, %227 : vector<18x1xf32>
    %231 = arith.subf %229, %230 : vector<18x1xf32>
    %232 = vector.broadcast %227 : vector<18x1xf32> to vector<18x32xf32>
    %233 = arith.subf %205, %232 : vector<18x32xf32>
    %cst_84 = arith.constant 9.99999974E-6 : f32
    %234 = vector.broadcast %cst_84 : f32 to vector<18x1xf32>
    %235 = arith.addf %231, %234 : vector<18x1xf32>
    %236 = math.rsqrt %235 : vector<18x1xf32>
    %237 = vector.broadcast %236 : vector<18x1xf32> to vector<18x32xf32>
    %238 = arith.mulf %233, %237 : vector<18x32xf32>
    %239 = vector.broadcast %213 : vector<1x32xf32> to vector<18x32xf32>
    %240 = arith.mulf %238, %239 : vector<18x32xf32>
    %241 = vector.broadcast %214 : vector<1x32xf32> to vector<18x32xf32>
    %242 = arith.addf %240, %241 : vector<18x32xf32>
    %cst_85 = arith.constant dense<0.000000e+00> : vector<18x96xf32>
    %243 = tpu.matmul %242, %208, %cst_85 {dimension_numbers = #tpu.dot_dimension_numbers<[1], [0], [0], [1], [0, 0, 1, 1], [], []>} : vector<18x32xf32>, vector<32x96xf32>, vector<18x96xf32> -> vector<18x96xf32>
    %244 = vector.broadcast %217 : vector<1x96xf32> to vector<18x96xf32>
    %245 = arith.addf %243, %244 : vector<18x96xf32>
    %246 = vector.extract_strided_slice %245 {offsets = [0, 0], sizes = [18, 32], strides = [1, 1]} : vector<18x96xf32> to vector<18x32xf32>
    %cst_86 = arith.constant 2.500000e-01 : f32
    %247 = vector.broadcast %cst_86 : f32 to vector<18x32xf32>
    %248 = arith.mulf %246, %247 : vector<18x32xf32>
    %249 = vector.extract_strided_slice %248 {offsets = [0, 0], sizes = [18, 16], strides = [1, 1]} : vector<18x32xf32> to vector<18x16xf32>
    %250 = vector.extract_strided_slice %245 {offsets = [0, 32], sizes = [18, 16], strides = [1, 1]} : vector<18x96xf32> to vector<18x16xf32>
    %cst_87 = arith.constant dense<0.000000e+00> : vector<18x18xf32>
    %251 = tpu.matmul %249, %250, %cst_87 {dimension_numbers = #tpu.dot_dimension_numbers<[1], [1], [0], [0], [0, 0, 1, 0], [], []>} : vector<18x16xf32>, vector<18x16xf32>, vector<18x18xf32> -> vector<18x18xf32>
    %cst_88 = arith.constant -1.000000e+30 : f32
    %252 = vector.broadcast %cst_88 : f32 to vector<18x18xf32>
    %253 = arith.select %53, %251, %252 : vector<18x18xi1>, vector<18x18xf32>
    %254 = vector.extract_strided_slice %248 {offsets = [0, 16], sizes = [18, 16], strides = [1, 1]} : vector<18x32xf32> to vector<18x16xf32>
    %255 = vector.extract_strided_slice %245 {offsets = [0, 48], sizes = [18, 16], strides = [1, 1]} : vector<18x96xf32> to vector<18x16xf32>
    %cst_89 = arith.constant dense<0.000000e+00> : vector<18x18xf32>
    %256 = tpu.matmul %254, %255, %cst_89 {dimension_numbers = #tpu.dot_dimension_numbers<[1], [1], [0], [0], [0, 0, 1, 0], [], []>} : vector<18x16xf32>, vector<18x16xf32>, vector<18x18xf32> -> vector<18x18xf32>
    %cst_90 = arith.constant -1.000000e+30 : f32
    %257 = vector.broadcast %cst_90 : f32 to vector<18x18xf32>
    %258 = arith.select %53, %256, %257 : vector<18x18xi1>, vector<18x18xf32>
    %259 = vector.shape_cast %253 : vector<18x18xf32> to vector<1x18x18xf32>
    %260 = vector.shape_cast %258 : vector<18x18xf32> to vector<1x18x18xf32>
    %261 = tpu.concatenate %259, %260 in 0 : vector<1x18x18xf32>, vector<1x18x18xf32> -> vector<2x18x18xf32>
    %cst_91 = arith.constant dense<0xFF800000> : vector<2x18xf32>
    %262 = vector.multi_reduction <maximumf>, %261, %cst_91 [2] : vector<2x18x18xf32> to vector<2x18xf32>
    %263 = vector.shape_cast %262 : vector<2x18xf32> to vector<2x18x1xf32>
    %264 = vector.broadcast %263 : vector<2x18x1xf32> to vector<2x18x18xf32>
    %265 = arith.subf %261, %264 : vector<2x18x18xf32>
    %266 = math.exp %265 : vector<2x18x18xf32>
    %cst_92 = arith.constant dense<0.000000e+00> : vector<2x18xf32>
    %267 = vector.multi_reduction <add>, %266, %cst_92 [2] : vector<2x18x18xf32> to vector<2x18xf32>
    %268 = vector.shape_cast %267 : vector<2x18xf32> to vector<2x18x1xf32>
    %269 = tpu.reciprocal %268 {approx = true} : vector<2x18x1xf32> -> vector<2x18x1xf32>
    %270 = vector.extract_strided_slice %245 {offsets = [0, 64], sizes = [18, 16], strides = [1, 1]} : vector<18x96xf32> to vector<18x16xf32>
    %271 = vector.extract_strided_slice %266 {offsets = [0, 0, 0], sizes = [1, 18, 18], strides = [1, 1, 1]} : vector<2x18x18xf32> to vector<1x18x18xf32>
    %272 = vector.shape_cast %271 : vector<1x18x18xf32> to vector<18x18xf32>
    %cst_93 = arith.constant dense<0.000000e+00> : vector<18x16xf32>
    %273 = tpu.matmul %272, %270, %cst_93 {dimension_numbers = #tpu.dot_dimension_numbers<[1], [0], [0], [1], [0, 0, 1, 1], [], []>} : vector<18x18xf32>, vector<18x16xf32>, vector<18x16xf32> -> vector<18x16xf32>
    %274 = vector.extract_strided_slice %269 {offsets = [0, 0, 0], sizes = [1, 18, 1], strides = [1, 1, 1]} : vector<2x18x1xf32> to vector<1x18x1xf32>
    %275 = vector.shape_cast %274 : vector<1x18x1xf32> to vector<18x1xf32>
    %276 = vector.broadcast %275 : vector<18x1xf32> to vector<18x16xf32>
    %277 = arith.mulf %273, %276 : vector<18x16xf32>
    %278 = vector.extract_strided_slice %209 {offsets = [0, 0], sizes = [16, 32], strides = [1, 1]} : vector<32x32xf32> to vector<16x32xf32>
    %cst_94 = arith.constant dense<0.000000e+00> : vector<18x32xf32>
    %279 = tpu.matmul %277, %278, %cst_94 {dimension_numbers = #tpu.dot_dimension_numbers<[1], [0], [0], [1], [0, 0, 1, 1], [], []>} : vector<18x16xf32>, vector<16x32xf32>, vector<18x32xf32> -> vector<18x32xf32>
    %280 = vector.extract_strided_slice %245 {offsets = [0, 80], sizes = [18, 16], strides = [1, 1]} : vector<18x96xf32> to vector<18x16xf32>
    %281 = vector.extract_strided_slice %266 {offsets = [1, 0, 0], sizes = [1, 18, 18], strides = [1, 1, 1]} : vector<2x18x18xf32> to vector<1x18x18xf32>
    %282 = vector.shape_cast %281 : vector<1x18x18xf32> to vector<18x18xf32>
    %cst_95 = arith.constant dense<0.000000e+00> : vector<18x16xf32>
    %283 = tpu.matmul %282, %280, %cst_95 {dimension_numbers = #tpu.dot_dimension_numbers<[1], [0], [0], [1], [0, 0, 1, 1], [], []>} : vector<18x18xf32>, vector<18x16xf32>, vector<18x16xf32> -> vector<18x16xf32>
    %284 = vector.extract_strided_slice %269 {offsets = [1, 0, 0], sizes = [1, 18, 1], strides = [1, 1, 1]} : vector<2x18x1xf32> to vector<1x18x1xf32>
    %285 = vector.shape_cast %284 : vector<1x18x1xf32> to vector<18x1xf32>
    %286 = vector.broadcast %285 : vector<18x1xf32> to vector<18x16xf32>
    %287 = arith.mulf %283, %286 : vector<18x16xf32>
    %288 = vector.extract_strided_slice %209 {offsets = [16, 0], sizes = [16, 32], strides = [1, 1]} : vector<32x32xf32> to vector<16x32xf32>
    %cst_96 = arith.constant dense<0.000000e+00> : vector<18x32xf32>
    %289 = tpu.matmul %287, %288, %cst_96 {dimension_numbers = #tpu.dot_dimension_numbers<[1], [0], [0], [1], [0, 0, 1, 1], [], []>} : vector<18x16xf32>, vector<16x32xf32>, vector<18x32xf32> -> vector<18x32xf32>
    %290 = arith.addf %279, %289 : vector<18x32xf32>
    %291 = vector.broadcast %218 : vector<1x32xf32> to vector<18x32xf32>
    %292 = arith.addf %290, %291 : vector<18x32xf32>
    %293 = arith.addf %205, %292 : vector<18x32xf32>
    %cst_97 = arith.constant dense<0.000000e+00> : vector<18xf32>
    %294 = vector.multi_reduction <add>, %293, %cst_97 [1] : vector<18x32xf32> to vector<18xf32>
    %295 = vector.shape_cast %294 : vector<18xf32> to vector<18x1xf32>
    %296 = arith.mulf %293, %293 : vector<18x32xf32>
    %cst_98 = arith.constant dense<0.000000e+00> : vector<18xf32>
    %297 = vector.multi_reduction <add>, %296, %cst_98 [1] : vector<18x32xf32> to vector<18xf32>
    %298 = vector.shape_cast %297 : vector<18xf32> to vector<18x1xf32>
    %cst_99 = arith.constant 3.125000e-02 : f32
    %299 = vector.broadcast %cst_99 : f32 to vector<18x1xf32>
    %300 = arith.mulf %295, %299 : vector<18x1xf32>
    %cst_100 = arith.constant 3.125000e-02 : f32
    %301 = vector.broadcast %cst_100 : f32 to vector<18x1xf32>
    %302 = arith.mulf %298, %301 : vector<18x1xf32>
    %303 = arith.mulf %300, %300 : vector<18x1xf32>
    %304 = arith.subf %302, %303 : vector<18x1xf32>
    %305 = vector.broadcast %300 : vector<18x1xf32> to vector<18x32xf32>
    %306 = arith.subf %293, %305 : vector<18x32xf32>
    %cst_101 = arith.constant 9.99999974E-6 : f32
    %307 = vector.broadcast %cst_101 : f32 to vector<18x1xf32>
    %308 = arith.addf %304, %307 : vector<18x1xf32>
    %309 = math.rsqrt %308 : vector<18x1xf32>
    %310 = vector.broadcast %309 : vector<18x1xf32> to vector<18x32xf32>
    %311 = arith.mulf %306, %310 : vector<18x32xf32>
    %312 = vector.broadcast %215 : vector<1x32xf32> to vector<18x32xf32>
    %313 = arith.mulf %311, %312 : vector<18x32xf32>
    %314 = vector.broadcast %216 : vector<1x32xf32> to vector<18x32xf32>
    %315 = arith.addf %313, %314 : vector<18x32xf32>
    %cst_102 = arith.constant dense<0.000000e+00> : vector<18x128xf32>
    %316 = tpu.matmul %315, %210, %cst_102 {dimension_numbers = #tpu.dot_dimension_numbers<[1], [0], [0], [1], [0, 0, 1, 1], [], []>} : vector<18x32xf32>, vector<32x128xf32>, vector<18x128xf32> -> vector<18x128xf32>
    %317 = vector.broadcast %219 : vector<1x128xf32> to vector<18x128xf32>
    %318 = arith.addf %316, %317 : vector<18x128xf32>
    %cst_103 = arith.constant 1.702000e+00 : f32
    %319 = vector.broadcast %cst_103 : f32 to vector<18x128xf32>
    %320 = arith.mulf %319, %318 : vector<18x128xf32>
    %321 = arith.negf %320 : vector<18x128xf32>
    %322 = math.exp %321 : vector<18x128xf32>
    %cst_104 = arith.constant 1.000000e+00 : f32
    %323 = vector.broadcast %cst_104 : f32 to vector<18x128xf32>
    %324 = arith.addf %323, %322 : vector<18x128xf32>
    %325 = arith.divf %323, %324 : vector<18x128xf32>
    %326 = arith.mulf %318, %325 : vector<18x128xf32>
    %cst_105 = arith.constant dense<0.000000e+00> : vector<18x32xf32>
    %327 = tpu.matmul %326, %212, %cst_105 {dimension_numbers = #tpu.dot_dimension_numbers<[1], [0], [0], [1], [0, 0, 1, 1], [], []>} : vector<18x128xf32>, vector<128x32xf32>, vector<18x32xf32> -> vector<18x32xf32>
    %328 = vector.broadcast %220 : vector<1x32xf32> to vector<18x32xf32>
    %329 = arith.addf %327, %328 : vector<18x32xf32>
    %330 = arith.addf %293, %329 : vector<18x32xf32>
    %331 = vector.extract_strided_slice %330 {offsets = [0, 0], sizes = [1, 32], strides = [1, 1]} : vector<18x32xf32> to vector<1x32xf32>
    %332 = vector.extract_strided_slice %330 {offsets = [9, 0], sizes = [1, 32], strides = [1, 1]} : vector<18x32xf32> to vector<1x32xf32>
    %333 = tpu.concatenate %331, %332 in 0 : vector<1x32xf32>, vector<1x32xf32> -> vector<2x32xf32>
    %c2 = arith.constant 2 : index
    %c0_106 = arith.constant 0 : index
    %334 = vector.load %arg6[%c2, %c0_106] : memref<24x128xf32, #tpu.memory_space<vmem>>, vector<1x32xf32>
    %c3 = arith.constant 3 : index
    %c0_107 = arith.constant 0 : index
    %335 = vector.load %arg6[%c3, %c0_107] : memref<24x128xf32, #tpu.memory_space<vmem>>, vector<1x32xf32>
    %cst_108 = arith.constant dense<0.000000e+00> : vector<2xf32>
    %336 = vector.multi_reduction <add>, %333, %cst_108 [1] : vector<2x32xf32> to vector<2xf32>
    %337 = vector.shape_cast %336 : vector<2xf32> to vector<2x1xf32>
    %338 = arith.mulf %333, %333 : vector<2x32xf32>
    %cst_109 = arith.constant dense<0.000000e+00> : vector<2xf32>
    %339 = vector.multi_reduction <add>, %338, %cst_109 [1] : vector<2x32xf32> to vector<2xf32>
    %340 = vector.shape_cast %339 : vector<2xf32> to vector<2x1xf32>
    %cst_110 = arith.constant 3.125000e-02 : f32
    %341 = vector.broadcast %cst_110 : f32 to vector<2x1xf32>
    %342 = arith.mulf %337, %341 : vector<2x1xf32>
    %cst_111 = arith.constant 3.125000e-02 : f32
    %343 = vector.broadcast %cst_111 : f32 to vector<2x1xf32>
    %344 = arith.mulf %340, %343 : vector<2x1xf32>
    %345 = arith.mulf %342, %342 : vector<2x1xf32>
    %346 = arith.subf %344, %345 : vector<2x1xf32>
    %347 = vector.broadcast %342 : vector<2x1xf32> to vector<2x32xf32>
    %348 = arith.subf %333, %347 : vector<2x32xf32>
    %cst_112 = arith.constant 9.99999974E-6 : f32
    %349 = vector.broadcast %cst_112 : f32 to vector<2x1xf32>
    %350 = arith.addf %346, %349 : vector<2x1xf32>
    %351 = math.rsqrt %350 : vector<2x1xf32>
    %352 = vector.broadcast %351 : vector<2x1xf32> to vector<2x32xf32>
    %353 = arith.mulf %348, %352 : vector<2x32xf32>
    %354 = vector.broadcast %334 : vector<1x32xf32> to vector<2x32xf32>
    %355 = arith.mulf %353, %354 : vector<2x32xf32>
    %356 = vector.broadcast %335 : vector<1x32xf32> to vector<2x32xf32>
    %357 = arith.addf %355, %356 : vector<2x32xf32>
    %c0_113 = arith.constant 0 : index
    %c0_114 = arith.constant 0 : index
    %358 = vector.load %arg7[%c0_113, %c0_114] : memref<32x32xf32, #tpu.memory_space<vmem>>, vector<32x32xf32>
    %cst_115 = arith.constant dense<0.000000e+00> : vector<2x32xf32>
    %359 = tpu.matmul %357, %358, %cst_115 {dimension_numbers = #tpu.dot_dimension_numbers<[1], [0], [0], [1], [0, 0, 1, 1], [], []>} : vector<2x32xf32>, vector<32x32xf32>, vector<2x32xf32> -> vector<2x32xf32>
    %c0_116 = arith.constant 0 : index
    %c0_117 = arith.constant 0 : index
    %360 = vector.load %arg8[%c0_116, %c0_117] : memref<16x32xf32, #tpu.memory_space<vmem>>, vector<16x32xf32>
    %361 = tpu.iota {dimensions = array<i32: 0>} : vector<16x16xi32>
    %362 = tpu.iota {dimensions = array<i32: 1>} : vector<16x16xi32>
    %c0_i32_118 = arith.constant 0 : i32
    %363 = vector.broadcast %c0_i32_118 : i32 to vector<16x16xi32>
    %364 = arith.cmpi sge, %361, %363 : vector<16x16xi32>
    %c8_i32 = arith.constant 8 : i32
    %365 = vector.broadcast %c8_i32 : i32 to vector<16x16xi32>
    %366 = arith.cmpi slt, %361, %365 : vector<16x16xi32>
    %367 = arith.andi %364, %366 : vector<16x16xi1>
    %c0_i32_119 = arith.constant 0 : i32
    %368 = vector.broadcast %c0_i32_119 : i32 to vector<16x16xi32>
    %369 = arith.cmpi sge, %362, %368 : vector<16x16xi32>
    %370 = arith.andi %367, %369 : vector<16x16xi1>
    %c8_i32_120 = arith.constant 8 : i32
    %371 = vector.broadcast %c8_i32_120 : i32 to vector<16x16xi32>
    %372 = arith.cmpi slt, %362, %371 : vector<16x16xi32>
    %373 = arith.andi %370, %372 : vector<16x16xi1>
    %c8_i32_121 = arith.constant 8 : i32
    %374 = vector.broadcast %c8_i32_121 : i32 to vector<16x16xi32>
    %375 = arith.cmpi sge, %361, %374 : vector<16x16xi32>
    %c16_i32 = arith.constant 16 : i32
    %376 = vector.broadcast %c16_i32 : i32 to vector<16x16xi32>
    %377 = arith.cmpi slt, %361, %376 : vector<16x16xi32>
    %378 = arith.andi %375, %377 : vector<16x16xi1>
    %c8_i32_122 = arith.constant 8 : i32
    %379 = vector.broadcast %c8_i32_122 : i32 to vector<16x16xi32>
    %380 = arith.cmpi sge, %362, %379 : vector<16x16xi32>
    %381 = arith.andi %378, %380 : vector<16x16xi1>
    %c16_i32_123 = arith.constant 16 : i32
    %382 = vector.broadcast %c16_i32_123 : i32 to vector<16x16xi32>
    %383 = arith.cmpi slt, %362, %382 : vector<16x16xi32>
    %384 = arith.andi %381, %383 : vector<16x16xi1>
    %385 = arith.ori %373, %384 : vector<16x16xi1>
    %386 = arith.cmpi sle, %362, %361 : vector<16x16xi32>
    %387 = arith.andi %385, %386 : vector<16x16xi1>
    %c0_124 = arith.constant 0 : index
    %c0_125 = arith.constant 0 : index
    %c0_126 = arith.constant 0 : index
    %388 = vector.load %arg9[%c0_124, %c0_125, %c0_126] : memref<1x32x256xf32, #tpu.memory_space<vmem>>, vector<1x32x256xf32>
    %389 = vector.shape_cast %388 : vector<1x32x256xf32> to vector<32x256xf32>
    %390 = vector.extract_strided_slice %389 {offsets = [0, 0], sizes = [32, 96], strides = [1, 1]} : vector<32x256xf32> to vector<32x96xf32>
    %391 = vector.extract_strided_slice %389 {offsets = [0, 96], sizes = [32, 32], strides = [1, 1]} : vector<32x256xf32> to vector<32x32xf32>
    %392 = vector.extract_strided_slice %389 {offsets = [0, 128], sizes = [32, 128], strides = [1, 1]} : vector<32x256xf32> to vector<32x128xf32>
    %c0_127 = arith.constant 0 : index
    %c0_128 = arith.constant 0 : index
    %c0_129 = arith.constant 0 : index
    %393 = vector.load %arg10[%c0_127, %c0_128, %c0_129] : memref<1x128x32xf32, #tpu.memory_space<vmem>>, vector<1x128x32xf32>
    %394 = vector.shape_cast %393 : vector<1x128x32xf32> to vector<128x32xf32>
    %c3_130 = arith.constant 3 : index
    %c0_131 = arith.constant 0 : index
    %395 = vector.load %arg11[%c3_130, %c0_131] : memref<16x128xf32, #tpu.memory_space<vmem>>, vector<1x32xf32>
    %c4_132 = arith.constant 4 : index
    %c0_133 = arith.constant 0 : index
    %396 = vector.load %arg11[%c4_132, %c0_133] : memref<16x128xf32, #tpu.memory_space<vmem>>, vector<1x32xf32>
    %c5_134 = arith.constant 5 : index
    %c0_135 = arith.constant 0 : index
    %397 = vector.load %arg11[%c5_134, %c0_135] : memref<16x128xf32, #tpu.memory_space<vmem>>, vector<1x32xf32>
    %c6_136 = arith.constant 6 : index
    %c0_137 = arith.constant 0 : index
    %398 = vector.load %arg11[%c6_136, %c0_137] : memref<16x128xf32, #tpu.memory_space<vmem>>, vector<1x32xf32>
    %c7_138 = arith.constant 7 : index
    %c0_139 = arith.constant 0 : index
    %399 = vector.load %arg11[%c7_138, %c0_139] : memref<16x128xf32, #tpu.memory_space<vmem>>, vector<1x96xf32>
    %c8_140 = arith.constant 8 : index
    %c0_141 = arith.constant 0 : index
    %400 = vector.load %arg11[%c8_140, %c0_141] : memref<16x128xf32, #tpu.memory_space<vmem>>, vector<1x32xf32>
    %c9_142 = arith.constant 9 : index
    %c0_143 = arith.constant 0 : index
    %401 = vector.load %arg11[%c9_142, %c0_143] : memref<16x128xf32, #tpu.memory_space<vmem>>, vector<1x128xf32>
    %c10_144 = arith.constant 10 : index
    %c0_145 = arith.constant 0 : index
    %402 = vector.load %arg11[%c10_144, %c0_145] : memref<16x128xf32, #tpu.memory_space<vmem>>, vector<1x32xf32>
    %cst_146 = arith.constant dense<0.000000e+00> : vector<16xf32>
    %403 = vector.multi_reduction <add>, %360, %cst_146 [1] : vector<16x32xf32> to vector<16xf32>
    %404 = vector.shape_cast %403 : vector<16xf32> to vector<16x1xf32>
    %405 = arith.mulf %360, %360 : vector<16x32xf32>
    %cst_147 = arith.constant dense<0.000000e+00> : vector<16xf32>
    %406 = vector.multi_reduction <add>, %405, %cst_147 [1] : vector<16x32xf32> to vector<16xf32>
    %407 = vector.shape_cast %406 : vector<16xf32> to vector<16x1xf32>
    %cst_148 = arith.constant 3.125000e-02 : f32
    %408 = vector.broadcast %cst_148 : f32 to vector<16x1xf32>
    %409 = arith.mulf %404, %408 : vector<16x1xf32>
    %cst_149 = arith.constant 3.125000e-02 : f32
    %410 = vector.broadcast %cst_149 : f32 to vector<16x1xf32>
    %411 = arith.mulf %407, %410 : vector<16x1xf32>
    %412 = arith.mulf %409, %409 : vector<16x1xf32>
    %413 = arith.subf %411, %412 : vector<16x1xf32>
    %414 = vector.broadcast %409 : vector<16x1xf32> to vector<16x32xf32>
    %415 = arith.subf %360, %414 : vector<16x32xf32>
    %cst_150 = arith.constant 9.99999974E-6 : f32
    %416 = vector.broadcast %cst_150 : f32 to vector<16x1xf32>
    %417 = arith.addf %413, %416 : vector<16x1xf32>
    %418 = math.rsqrt %417 : vector<16x1xf32>
    %419 = vector.broadcast %418 : vector<16x1xf32> to vector<16x32xf32>
    %420 = arith.mulf %415, %419 : vector<16x32xf32>
    %421 = vector.broadcast %395 : vector<1x32xf32> to vector<16x32xf32>
    %422 = arith.mulf %420, %421 : vector<16x32xf32>
    %423 = vector.broadcast %396 : vector<1x32xf32> to vector<16x32xf32>
    %424 = arith.addf %422, %423 : vector<16x32xf32>
    %cst_151 = arith.constant dense<0.000000e+00> : vector<16x96xf32>
    %425 = tpu.matmul %424, %390, %cst_151 {dimension_numbers = #tpu.dot_dimension_numbers<[1], [0], [0], [1], [0, 0, 1, 1], [], []>} : vector<16x32xf32>, vector<32x96xf32>, vector<16x96xf32> -> vector<16x96xf32>
    %426 = vector.broadcast %399 : vector<1x96xf32> to vector<16x96xf32>
    %427 = arith.addf %425, %426 : vector<16x96xf32>
    %428 = vector.extract_strided_slice %427 {offsets = [0, 0], sizes = [16, 32], strides = [1, 1]} : vector<16x96xf32> to vector<16x32xf32>
    %cst_152 = arith.constant 2.500000e-01 : f32
    %429 = vector.broadcast %cst_152 : f32 to vector<16x32xf32>
    %430 = arith.mulf %428, %429 : vector<16x32xf32>
    %431 = vector.extract_strided_slice %430 {offsets = [0, 0], sizes = [16, 16], strides = [1, 1]} : vector<16x32xf32> to vector<16x16xf32>
    %432 = vector.extract_strided_slice %427 {offsets = [0, 32], sizes = [16, 16], strides = [1, 1]} : vector<16x96xf32> to vector<16x16xf32>
    %cst_153 = arith.constant dense<0.000000e+00> : vector<16x16xf32>
    %433 = tpu.matmul %431, %432, %cst_153 {dimension_numbers = #tpu.dot_dimension_numbers<[1], [1], [0], [0], [0, 0, 1, 0], [], []>} : vector<16x16xf32>, vector<16x16xf32>, vector<16x16xf32> -> vector<16x16xf32>
    %cst_154 = arith.constant -1.000000e+30 : f32
    %434 = vector.broadcast %cst_154 : f32 to vector<16x16xf32>
    %435 = arith.select %387, %433, %434 : vector<16x16xi1>, vector<16x16xf32>
    %436 = vector.extract_strided_slice %430 {offsets = [0, 16], sizes = [16, 16], strides = [1, 1]} : vector<16x32xf32> to vector<16x16xf32>
    %437 = vector.extract_strided_slice %427 {offsets = [0, 48], sizes = [16, 16], strides = [1, 1]} : vector<16x96xf32> to vector<16x16xf32>
    %cst_155 = arith.constant dense<0.000000e+00> : vector<16x16xf32>
    %438 = tpu.matmul %436, %437, %cst_155 {dimension_numbers = #tpu.dot_dimension_numbers<[1], [1], [0], [0], [0, 0, 1, 0], [], []>} : vector<16x16xf32>, vector<16x16xf32>, vector<16x16xf32> -> vector<16x16xf32>
    %cst_156 = arith.constant -1.000000e+30 : f32
    %439 = vector.broadcast %cst_156 : f32 to vector<16x16xf32>
    %440 = arith.select %387, %438, %439 : vector<16x16xi1>, vector<16x16xf32>
    %441 = vector.shape_cast %435 : vector<16x16xf32> to vector<1x16x16xf32>
    %442 = vector.shape_cast %440 : vector<16x16xf32> to vector<1x16x16xf32>
    %443 = tpu.concatenate %441, %442 in 0 : vector<1x16x16xf32>, vector<1x16x16xf32> -> vector<2x16x16xf32>
    %cst_157 = arith.constant dense<0xFF800000> : vector<2x16xf32>
    %444 = vector.multi_reduction <maximumf>, %443, %cst_157 [2] : vector<2x16x16xf32> to vector<2x16xf32>
    %445 = vector.shape_cast %444 : vector<2x16xf32> to vector<2x16x1xf32>
    %446 = vector.broadcast %445 : vector<2x16x1xf32> to vector<2x16x16xf32>
    %447 = arith.subf %443, %446 : vector<2x16x16xf32>
    %448 = math.exp %447 : vector<2x16x16xf32>
    %cst_158 = arith.constant dense<0.000000e+00> : vector<2x16xf32>
    %449 = vector.multi_reduction <add>, %448, %cst_158 [2] : vector<2x16x16xf32> to vector<2x16xf32>
    %450 = vector.shape_cast %449 : vector<2x16xf32> to vector<2x16x1xf32>
    %451 = tpu.reciprocal %450 {approx = true} : vector<2x16x1xf32> -> vector<2x16x1xf32>
    %452 = vector.extract_strided_slice %427 {offsets = [0, 64], sizes = [16, 16], strides = [1, 1]} : vector<16x96xf32> to vector<16x16xf32>
    %453 = vector.extract_strided_slice %448 {offsets = [0, 0, 0], sizes = [1, 16, 16], strides = [1, 1, 1]} : vector<2x16x16xf32> to vector<1x16x16xf32>
    %454 = vector.shape_cast %453 : vector<1x16x16xf32> to vector<16x16xf32>
    %cst_159 = arith.constant dense<0.000000e+00> : vector<16x16xf32>
    %455 = tpu.matmul %454, %452, %cst_159 {dimension_numbers = #tpu.dot_dimension_numbers<[1], [0], [0], [1], [0, 0, 1, 1], [], []>} : vector<16x16xf32>, vector<16x16xf32>, vector<16x16xf32> -> vector<16x16xf32>
    %456 = vector.extract_strided_slice %451 {offsets = [0, 0, 0], sizes = [1, 16, 1], strides = [1, 1, 1]} : vector<2x16x1xf32> to vector<1x16x1xf32>
    %457 = vector.shape_cast %456 : vector<1x16x1xf32> to vector<16x1xf32>
    %458 = vector.broadcast %457 : vector<16x1xf32> to vector<16x16xf32>
    %459 = arith.mulf %455, %458 : vector<16x16xf32>
    %460 = vector.extract_strided_slice %391 {offsets = [0, 0], sizes = [16, 32], strides = [1, 1]} : vector<32x32xf32> to vector<16x32xf32>
    %cst_160 = arith.constant dense<0.000000e+00> : vector<16x32xf32>
    %461 = tpu.matmul %459, %460, %cst_160 {dimension_numbers = #tpu.dot_dimension_numbers<[1], [0], [0], [1], [0, 0, 1, 1], [], []>} : vector<16x16xf32>, vector<16x32xf32>, vector<16x32xf32> -> vector<16x32xf32>
    %462 = vector.extract_strided_slice %427 {offsets = [0, 80], sizes = [16, 16], strides = [1, 1]} : vector<16x96xf32> to vector<16x16xf32>
    %463 = vector.extract_strided_slice %448 {offsets = [1, 0, 0], sizes = [1, 16, 16], strides = [1, 1, 1]} : vector<2x16x16xf32> to vector<1x16x16xf32>
    %464 = vector.shape_cast %463 : vector<1x16x16xf32> to vector<16x16xf32>
    %cst_161 = arith.constant dense<0.000000e+00> : vector<16x16xf32>
    %465 = tpu.matmul %464, %462, %cst_161 {dimension_numbers = #tpu.dot_dimension_numbers<[1], [0], [0], [1], [0, 0, 1, 1], [], []>} : vector<16x16xf32>, vector<16x16xf32>, vector<16x16xf32> -> vector<16x16xf32>
    %466 = vector.extract_strided_slice %451 {offsets = [1, 0, 0], sizes = [1, 16, 1], strides = [1, 1, 1]} : vector<2x16x1xf32> to vector<1x16x1xf32>
    %467 = vector.shape_cast %466 : vector<1x16x1xf32> to vector<16x1xf32>
    %468 = vector.broadcast %467 : vector<16x1xf32> to vector<16x16xf32>
    %469 = arith.mulf %465, %468 : vector<16x16xf32>
    %470 = vector.extract_strided_slice %391 {offsets = [16, 0], sizes = [16, 32], strides = [1, 1]} : vector<32x32xf32> to vector<16x32xf32>
    %cst_162 = arith.constant dense<0.000000e+00> : vector<16x32xf32>
    %471 = tpu.matmul %469, %470, %cst_162 {dimension_numbers = #tpu.dot_dimension_numbers<[1], [0], [0], [1], [0, 0, 1, 1], [], []>} : vector<16x16xf32>, vector<16x32xf32>, vector<16x32xf32> -> vector<16x32xf32>
    %472 = arith.addf %461, %471 : vector<16x32xf32>
    %473 = vector.broadcast %400 : vector<1x32xf32> to vector<16x32xf32>
    %474 = arith.addf %472, %473 : vector<16x32xf32>
    %475 = arith.addf %360, %474 : vector<16x32xf32>
    %cst_163 = arith.constant dense<0.000000e+00> : vector<16xf32>
    %476 = vector.multi_reduction <add>, %475, %cst_163 [1] : vector<16x32xf32> to vector<16xf32>
    %477 = vector.shape_cast %476 : vector<16xf32> to vector<16x1xf32>
    %478 = arith.mulf %475, %475 : vector<16x32xf32>
    %cst_164 = arith.constant dense<0.000000e+00> : vector<16xf32>
    %479 = vector.multi_reduction <add>, %478, %cst_164 [1] : vector<16x32xf32> to vector<16xf32>
    %480 = vector.shape_cast %479 : vector<16xf32> to vector<16x1xf32>
    %cst_165 = arith.constant 3.125000e-02 : f32
    %481 = vector.broadcast %cst_165 : f32 to vector<16x1xf32>
    %482 = arith.mulf %477, %481 : vector<16x1xf32>
    %cst_166 = arith.constant 3.125000e-02 : f32
    %483 = vector.broadcast %cst_166 : f32 to vector<16x1xf32>
    %484 = arith.mulf %480, %483 : vector<16x1xf32>
    %485 = arith.mulf %482, %482 : vector<16x1xf32>
    %486 = arith.subf %484, %485 : vector<16x1xf32>
    %487 = vector.broadcast %482 : vector<16x1xf32> to vector<16x32xf32>
    %488 = arith.subf %475, %487 : vector<16x32xf32>
    %cst_167 = arith.constant 9.99999974E-6 : f32
    %489 = vector.broadcast %cst_167 : f32 to vector<16x1xf32>
    %490 = arith.addf %486, %489 : vector<16x1xf32>
    %491 = math.rsqrt %490 : vector<16x1xf32>
    %492 = vector.broadcast %491 : vector<16x1xf32> to vector<16x32xf32>
    %493 = arith.mulf %488, %492 : vector<16x32xf32>
    %494 = vector.broadcast %397 : vector<1x32xf32> to vector<16x32xf32>
    %495 = arith.mulf %493, %494 : vector<16x32xf32>
    %496 = vector.broadcast %398 : vector<1x32xf32> to vector<16x32xf32>
    %497 = arith.addf %495, %496 : vector<16x32xf32>
    %cst_168 = arith.constant dense<0.000000e+00> : vector<16x128xf32>
    %498 = tpu.matmul %497, %392, %cst_168 {dimension_numbers = #tpu.dot_dimension_numbers<[1], [0], [0], [1], [0, 0, 1, 1], [], []>} : vector<16x32xf32>, vector<32x128xf32>, vector<16x128xf32> -> vector<16x128xf32>
    %499 = vector.broadcast %401 : vector<1x128xf32> to vector<16x128xf32>
    %500 = arith.addf %498, %499 : vector<16x128xf32>
    %cst_169 = arith.constant 1.702000e+00 : f32
    %501 = vector.broadcast %cst_169 : f32 to vector<16x128xf32>
    %502 = arith.mulf %501, %500 : vector<16x128xf32>
    %503 = arith.negf %502 : vector<16x128xf32>
    %504 = math.exp %503 : vector<16x128xf32>
    %cst_170 = arith.constant 1.000000e+00 : f32
    %505 = vector.broadcast %cst_170 : f32 to vector<16x128xf32>
    %506 = arith.addf %505, %504 : vector<16x128xf32>
    %507 = arith.divf %505, %506 : vector<16x128xf32>
    %508 = arith.mulf %500, %507 : vector<16x128xf32>
    %cst_171 = arith.constant dense<0.000000e+00> : vector<16x32xf32>
    %509 = tpu.matmul %508, %394, %cst_171 {dimension_numbers = #tpu.dot_dimension_numbers<[1], [0], [0], [1], [0, 0, 1, 1], [], []>} : vector<16x128xf32>, vector<128x32xf32>, vector<16x32xf32> -> vector<16x32xf32>
    %510 = vector.broadcast %402 : vector<1x32xf32> to vector<16x32xf32>
    %511 = arith.addf %509, %510 : vector<16x32xf32>
    %512 = arith.addf %475, %511 : vector<16x32xf32>
    %c0_172 = arith.constant 0 : index
    %c0_173 = arith.constant 0 : index
    %513 = vector.load %arg11[%c0_172, %c0_173] : memref<16x128xf32, #tpu.memory_space<vmem>>, vector<1x32xf32>
    %c1_174 = arith.constant 1 : index
    %c0_175 = arith.constant 0 : index
    %514 = vector.load %arg11[%c1_174, %c0_175] : memref<16x128xf32, #tpu.memory_space<vmem>>, vector<1x32xf32>
    %cst_176 = arith.constant dense<0.000000e+00> : vector<16xf32>
    %515 = vector.multi_reduction <add>, %512, %cst_176 [1] : vector<16x32xf32> to vector<16xf32>
    %516 = vector.shape_cast %515 : vector<16xf32> to vector<16x1xf32>
    %517 = arith.mulf %512, %512 : vector<16x32xf32>
    %cst_177 = arith.constant dense<0.000000e+00> : vector<16xf32>
    %518 = vector.multi_reduction <add>, %517, %cst_177 [1] : vector<16x32xf32> to vector<16xf32>
    %519 = vector.shape_cast %518 : vector<16xf32> to vector<16x1xf32>
    %cst_178 = arith.constant 3.125000e-02 : f32
    %520 = vector.broadcast %cst_178 : f32 to vector<16x1xf32>
    %521 = arith.mulf %516, %520 : vector<16x1xf32>
    %cst_179 = arith.constant 3.125000e-02 : f32
    %522 = vector.broadcast %cst_179 : f32 to vector<16x1xf32>
    %523 = arith.mulf %519, %522 : vector<16x1xf32>
    %524 = arith.mulf %521, %521 : vector<16x1xf32>
    %525 = arith.subf %523, %524 : vector<16x1xf32>
    %526 = vector.broadcast %521 : vector<16x1xf32> to vector<16x32xf32>
    %527 = arith.subf %512, %526 : vector<16x32xf32>
    %cst_180 = arith.constant 9.99999974E-6 : f32
    %528 = vector.broadcast %cst_180 : f32 to vector<16x1xf32>
    %529 = arith.addf %525, %528 : vector<16x1xf32>
    %530 = math.rsqrt %529 : vector<16x1xf32>
    %531 = vector.broadcast %530 : vector<16x1xf32> to vector<16x32xf32>
    %532 = arith.mulf %527, %531 : vector<16x32xf32>
    %533 = vector.broadcast %513 : vector<1x32xf32> to vector<16x32xf32>
    %534 = arith.mulf %532, %533 : vector<16x32xf32>
    %535 = vector.broadcast %514 : vector<1x32xf32> to vector<16x32xf32>
    %536 = arith.addf %534, %535 : vector<16x32xf32>
    %537 = vector.extract_strided_slice %536 {offsets = [5, 0], sizes = [1, 32], strides = [1, 1]} : vector<16x32xf32> to vector<1x32xf32>
    %538 = vector.extract_strided_slice %536 {offsets = [15, 0], sizes = [1, 32], strides = [1, 1]} : vector<16x32xf32> to vector<1x32xf32>
    %539 = tpu.concatenate %537, %538 in 0 : vector<1x32xf32>, vector<1x32xf32> -> vector<2x32xf32>
    %c0_181 = arith.constant 0 : index
    %c0_182 = arith.constant 0 : index
    %540 = vector.load %arg12[%c0_181, %c0_182] : memref<32x32xf32, #tpu.memory_space<vmem>>, vector<32x32xf32>
    %cst_183 = arith.constant dense<0.000000e+00> : vector<2x32xf32>
    %541 = tpu.matmul %539, %540, %cst_183 {dimension_numbers = #tpu.dot_dimension_numbers<[1], [0], [0], [1], [0, 0, 1, 1], [], []>} : vector<2x32xf32>, vector<32x32xf32>, vector<2x32xf32> -> vector<2x32xf32>
    %542 = arith.mulf %359, %359 : vector<2x32xf32>
    %cst_184 = arith.constant dense<0.000000e+00> : vector<2xf32>
    %543 = vector.multi_reduction <add>, %542, %cst_184 [1] : vector<2x32xf32> to vector<2xf32>
    %544 = vector.shape_cast %543 : vector<2xf32> to vector<2x1xf32>
    %545 = math.rsqrt %544 : vector<2x1xf32>
    %546 = vector.broadcast %545 : vector<2x1xf32> to vector<2x32xf32>
    %547 = arith.mulf %359, %546 : vector<2x32xf32>
    %548 = arith.mulf %541, %541 : vector<2x32xf32>
    %cst_185 = arith.constant dense<0.000000e+00> : vector<2xf32>
    %549 = vector.multi_reduction <add>, %548, %cst_185 [1] : vector<2x32xf32> to vector<2xf32>
    %550 = vector.shape_cast %549 : vector<2xf32> to vector<2x1xf32>
    %551 = math.rsqrt %550 : vector<2x1xf32>
    %552 = vector.broadcast %551 : vector<2x1xf32> to vector<2x32xf32>
    %553 = arith.mulf %541, %552 : vector<2x32xf32>
    %c2_186 = arith.constant 2 : index
    %c0_187 = arith.constant 0 : index
    %554 = vector.load %arg11[%c2_186, %c0_187] : memref<16x128xf32, #tpu.memory_space<vmem>>, vector<1x1xf32>
    %555 = math.exp %554 : vector<1x1xf32>
    %cst_188 = arith.constant dense<0.000000e+00> : vector<2x2xf32>
    %556 = tpu.matmul %547, %553, %cst_188 {dimension_numbers = #tpu.dot_dimension_numbers<[1], [1], [0], [0], [0, 0, 1, 0], [], []>} : vector<2x32xf32>, vector<2x32xf32>, vector<2x2xf32> -> vector<2x2xf32>
    %557 = vector.broadcast %555 : vector<1x1xf32> to vector<2x2xf32>
    %558 = arith.mulf %557, %556 : vector<2x2xf32>
    %c0_189 = arith.constant 0 : index
    %c0_190 = arith.constant 0 : index
    %559 = vector.load %arg13[%c0_189, %c0_190] : memref<2x2xf32, #tpu.memory_space<vmem>>, vector<2x2xf32>
    tpu.vector_store %arg13[%c0_189, %c0_190], %558 {strides = array<i32>} : memref<2x2xf32, #tpu.memory_space<vmem>>, vector<2x2xf32>,
    %c0_191 = arith.constant 0 : index
    %c0_192 = arith.constant 0 : index
    %560 = vector.load %arg14[%c0_191, %c0_192] : memref<2x32xf32, #tpu.memory_space<vmem>>, vector<2x32xf32>
    tpu.vector_store %arg14[%c0_191, %c0_192], %547 {strides = array<i32>} : memref<2x32xf32, #tpu.memory_space<vmem>>, vector<2x32xf32>,
    return
  }
}

</mosaic_0001>

<bundles_post_ra>
// kernel: forward.1
= control target key start
LH: loop header
LB: loop body
LE: loop exit
PB: predicated region body
PF: predicated region fallthrough
CT: control target
= control target key end

     0   :  { %20 = vsyncpa [#allocation3], 0  ;;  %v5762_v3 = vmov 0.0|0.0   ;;  %vm81_vm0 = vcmask 523264   ;;  %s7105_s0 = inlined_call_operand.vmem [shape: f32[18,192], index: 0, kind: input, shape index: {}]   ;;  %s7106_s1 = inlined_call_operand.vmem [shape: f32[192,32], index: 1, kind: input, shape index: {}]   ;;  %s7107_s2 = inlined_call_operand.vmem [shape: f32[18,32], index: 2, kind: input, shape index: {}]   ;;  %s7108_s3 = inlined_call_operand.vmem [shape: f32[4,32], index: 3, kind: input, shape index: {}]   ;;  %s7109_s4 = inlined_call_operand.vmem [shape: f32[2,32,256], index: 4, kind: input, shape index: {}]   ;;  %s7110_s5 = inlined_call_operand.vmem [shape: f32[2,128,32], index: 5, kind: input, shape index: {}]   ;;  %s7111_s6 = inlined_call_operand.vmem [shape: f32[24,128], index: 6, kind: input, shape index: {}]   ;;  %s7112_s7 = inlined_call_operand.vmem [shape: f32[32,32], index: 7, kind: input, shape index: {}]   ;;  %s7113_s8 = inlined_call_operand.vmem [shape: f32[16,32], index: 8, kind: input, shape index: {}]   ;;  %s7114_s9 = inlined_call_operand.vmem [shape: f32[1,32,256], index: 9, kind: input, shape index: {}]   ;;  %s7115_s10 = inlined_call_operand.vmem [shape: f32[1,128,32], index: 10, kind: input, shape index: {}]   ;;  %s7116_s11 = inlined_call_operand.vmem [shape: f32[16,128], index: 11, kind: input, shape index: {}]   ;;  %s7117_s12 = inlined_call_operand.vmem [shape: f32[32,32], index: 12, kind: input, shape index: {}]   ;;  %s7118_s13 = inlined_call_operand.hbm [shape: f32[2,2], index: 13, kind: output, shape index: {0}]   ;;  %s7119_s14 = inlined_call_operand.hbm [shape: f32[2,32], index: 14, kind: output, shape index: {1}]  }
   0x1   :  { %v54_v0 = vld [vmem:[%s7106_s1] sm:$0xff]  ;;  %v55_v1 = vld [vmem:[%s7106_s1 + $0x8] sm:$0xff]  ;;  %v56_v2 = vld [vmem:[%s7106_s1 + $0x10] sm:$0xff]  ;;  %5206 = vmatprep.subr.bf16.mxu0 %v5762_v3  ;;  %5242 = vmatprep.subr.bf16.mxu1 %v5762_v3 }
   0x2   :  { %v5207_v4 = vpack.c.bf16 %v55_v1, %v54_v0  ;;  %v57_v5 = vld [vmem:[%s7106_s1 + $0x18] sm:$0xff]  ;;  %v58_v7 = vld [vmem:[%s7106_s1 + $0x20] sm:$0xff]  ;;  %v59_v8 = vld [vmem:[%s7106_s1 + $0x28] sm:$0xff] }
   0x3   :  { %v5210_v6 = vpack.c.bf16 %v57_v5, %v56_v2  ;;  %v5213_v9 = vpack.c.bf16 %v59_v8, %v58_v7  ;;  %v60_v10 = vld [vmem:[%s7106_s1 + $0x30] sm:$0xff]  ;;  %v61_v11 = vld [vmem:[%s7106_s1 + $0x38] sm:$0xff]  ;;  %v49_v12 = vld [vmem:[%s7105_s0 + $0x8] sm:$0xff] }
   0x4   :  { %5208 = vmatpush1.bf16.msra.mxu0 %v5207_v4  ;;  %4329 = vmatprep.mubr.msk.f32.mxu0 %vm81_vm0, %v49_v12 }
   0x5   :  { %5209 = vmatprep.subr.bf16.mxu0 %v5762_v3 }
   0x8   :  { %5211 = vmatpush1.bf16.msra.mxu0 %v5210_v6 }
   0x9   :  { %5212 = vmatprep.subr.bf16.mxu0 %v5762_v3 }
   0xa   :  { %21 = vsyncpa [#allocation5], 0  ;;  %v5216_v13 = vpack.c.bf16 %v61_v11, %v60_v10  ;;  %v62_v14 = vld [vmem:[%s7106_s1 + $0x40] sm:$0xff]  ;;  %v63_v15 = vld [vmem:[%s7106_s1 + $0x48] sm:$0xff]  ;;  %vm173_vm1 = vcmask 261120   ;;  %vm180_vm2 = vcmask 254976  }
   0xb   :  { %v5219_v16 = vpack.c.bf16 %v63_v15, %v62_v14  ;;  %v64_v17 = vld [vmem:[%s7106_s1 + $0x50] sm:$0xff]  ;;  %v65_v18 = vld [vmem:[%s7106_s1 + $0x58] sm:$0xff]  ;;  %v66_v20 = vld [vmem:[%s7106_s1 + $0x60] sm:$0xff]  ;;  %vm5763_vm3 = vmmov 0   ;;  %s5765_s28 = smov 96   ;;  %s5767_s29 = smov 80  }
   0xc   :  { %5214 = vmatpush1.bf16.msra.mxu0 %v5213_v9  ;;  %v5222_v19 = vpack.c.bf16 %v65_v18, %v64_v17  ;;  %v67_v21 = vld [vmem:[%s7106_s1 + $0x68] sm:$0xff]  ;;  %v68_v23 = vld [vmem:[%s7106_s1 + $0x70] sm:$0xff]  ;;  %v69_v24 = vld [vmem:[%s7106_s1 + $0x78] sm:$0xff]  ;;  %vm474_vm4 = vcmask 130048   ;;  %vm847_vm13 = vcmask 146432   ;;  %s5769_s16 = smov 64  }
   0xd   :  { %5215 = vmatprep.subr.bf16.mxu0 %v5762_v3  ;;  %v5225_v22 = vpack.c.bf16 %v67_v21, %v66_v20  ;;  %v5228_v25 = vpack.c.bf16 %v69_v24, %v68_v23  ;;  %v70_v26 = vld [vmem:[%s7106_s1 + $0x80] sm:$0xff]  ;;  %v71_v27 = vld [vmem:[%s7106_s1 + $0x88] sm:$0xff]  ;;  %v72_v29 = vld [vmem:[%s7106_s1 + $0x90] sm:$0xff]  ;;  %s5770_s17 = smov 32  }
   0xe   :  { %v5231_v28 = vpack.c.bf16 %v71_v27, %v70_v26  ;;  %v73_v30 = vld [vmem:[%s7106_s1 + $0x98] sm:$0xff]  ;;  %v74_v32 = vld [vmem:[%s7106_s1 + $0xa0] sm:$0xff]  ;;  %v75_v33 = vld [vmem:[%s7106_s1 + $0xa8] sm:$0xff] }
   0xf   :  { %v5234_v31 = vpack.c.bf16 %v73_v30, %v72_v29  ;;  %v5237_v34 = vpack.c.bf16 %v75_v33, %v74_v32  ;;  %v76_v35 = vld [vmem:[%s7106_s1 + $0xb0] sm:$0xff]  ;;  %v77_v36 = vld [vmem:[%s7106_s1 + $0xb8] sm:$0xff]  ;;  %v48_v38 = vld [vmem:[%s7105_s0] sm:$0xff] }
  0x10   :  { %5217 = vmatpush1.bf16.msra.mxu0 %v5216_v13  ;;  %v5240_v37 = vpack.c.bf16 %v77_v36, %v76_v35  ;;  %v51_v39 = vld [vmem:[%s7105_s0 + $0x18] sm:$0xff]  ;;  %v50_v40 = vld [vmem:[%s7105_s0 + $0x10] sm:$0xff]  ;;  %v53_v41 = vld [vmem:[%s7105_s0 + $0x28] sm:$0x3] }
  0x11   :  { %5218 = vmatprep.subr.bf16.mxu0 %v5762_v3  ;;  %v52_v42 = vld [vmem:[%s7105_s0 + $0x20] sm:$0x3]  ;;  %v79_v47 = vld [vmem:[%s7107_s2 + $0x8] sm:$0xff]  ;;  %v80_v53 = vld [vmem:[%s7107_s2 + $0x10] sm:$0x3] }
  0x12   :  { %v78_v43 = vld [vmem:[%s7107_s2] sm:$0xff]  ;;  %s5766_s2 = smov 112   ;;  %vm6075_vm5 = vmpackc.low %vm474_vm4, %vm474_vm4 }
  0x13   :  { %v4332_v24 = vld [vmem:[%s7111_s6] ss:$0 sm:$0xff]  ;;  %v4333_v26 = vld [vmem:[%s7111_s6 + $0x1] ss:$0 sm:$0xff] }
  0x14   :  { %5220 = vmatpush1.bf16.msra.mxu0 %v5219_v16 }
  0x15   :  { %5221 = vmatprep.subr.bf16.mxu0 %v5762_v3 }
  0x18   :  { %5223 = vmatpush1.bf16.msra.mxu0 %v5222_v19 }
  0x19   :  { %5224 = vmatprep.subr.bf16.mxu0 %v5762_v3 }
  0x1c   :  { %5226 = vmatpush1.bf16.msra.mxu0 %v5225_v22 }
  0x1d   :  { %5227 = vmatprep.subr.bf16.mxu0 %v5762_v3 }
  0x20   :  { %5229 = vmatpush1.bf16.msra.mxu0 %v5228_v25 }
  0x21   :  { %5230 = vmatprep.subr.bf16.mxu0 %v5762_v3 }
  0x24   :  { %5232 = vmatpush1.bf16.msra.mxu0 %v5231_v28 }
  0x25   :  { %5233 = vmatprep.subr.bf16.mxu0 %v5762_v3 }
  0x28   :  { %5235 = vmatpush1.bf16.msra.mxu0 %v5234_v31 }
  0x29   :  { %5236 = vmatprep.subr.bf16.mxu0 %v5762_v3 }
  0x2c   :  { %5238 = vmatpush1.bf16.msra.mxu0 %v5237_v34 }
  0x2d   :  { %5239 = vmatprep.subr.bf16.mxu0 %v5762_v3 }
  0x30   :  { %5241 = vmatpush1.bf16.msra.mxu0 %v5240_v37 }
  0x31   :  { %5256 = vmatprep.subr.bf16.mxu0 %v5762_v3 }
  0x33   :  { %156 = vmatmul.mubr.f32.vlgmr.msra.gmra.mrb[0].mxu0 %v48_v38 }
  0x34   :  { %4330 = vmatprep.mubr.msk.f32.mxu0 %vm81_vm0, %v51_v39 }
  0x37   :  { %161 = vmatmul.mubr.f32.gmra.mrb[2].mxu0 %v50_v40 }
  0x38   :  { %4331 = vmatprep.mubr.msk.f32.mxu0 %vm81_vm0, %v53_v41 }
  0x3b   :  { %166 = vmatmul.mubr.f32.gmra.mrb[4].mxu0 %v52_v42 }
 0x106   :  { %v157_v44 = vpop.f32.mrb[0].mxu0 }
 0x107   :  { %v158_v45 = vadd.f32 %v157_v44, %v78_v43  ;;  %v159_v46 = vpop.f32.mrb[1].mxu0 }
 0x109   :  { %v174_v48 = vsel %vm173_vm1, %v158_v45, 0.0  ;;  %v184_v49 = vmul.f32 %v158_v45, %v158_v45 }
 0x10a   :  { %v162_v50 = vpop.f32.mrb[2].mxu0  ;;  %175 = vadd.xlane.f32.xlu0 %v174_v48  ;;  %v6000_v48 = vld [vmem:[%s7109_s4] sm:$0xff] }
 0x10b   :  { %v163_v51 = vadd.f32 %v162_v50, %v79_v47  ;;  %v164_v52 = vpop.f32.mrb[3].mxu0  ;;  %v187_v55 = vsel %vm173_vm1, %v184_v49, 0.0  ;;  %v6005_v49 = vld [vmem:[%s7109_s4 + $0x10] sm:$0xff] }
 0x10c   :  { %v5491_v50 = vpack.i.bf16 %v6005_v49, %v6000_v48  ;;  %v6014_v52 = vld [vmem:[%s7109_s4 + $0x20] sm:$0xff] }
 0x10d   :  { %v177_v54 = vsel %vm173_vm1, %v163_v51, 0.0  ;;  %v185_v56 = vmul.f32 %v163_v51, %v163_v51 }
 0x10e   :  { %v167_v57 = vpop.f32.mrb[4].mxu0  ;;  %178 = vadd.xlane.f32.xlu1 %v177_v54  ;;  %188 = vadd.xlane.f32.xlu0 %v187_v55  ;;  %v5764_v54 = vmov 0.0  }
 0x10f   :  { %v168_v58 = vadd.f32 %v167_v57, %v80_v53  ;;  %v169_v59 = vpop.f32.mrb[5].mxu0  ;;  %v190_v60 = vsel %vm173_vm1, %v185_v56, 0.0  ;;  %v6019_v53 = vld [vmem:[%s7109_s4 + $0x30] sm:$0xff]  ;;  %4722 = vmatprep.mubr.msk.f32.mxu1 %vm5763_vm3, %v5764_v54  ;;  %4800 = vmatprep.mubr.msk.f32.mxu0 %vm5763_vm3, %v5764_v54 }
 0x110   :  { %v5246_v55 = vpack.c.bf16 %v6019_v53, %v6014_v52 }
 0x111   :  { %v181_v61 = vsel %vm180_vm2, %v168_v58, 0.0  ;;  %v186_v62 = vmul.f32 %v168_v58, %v168_v58 }
 0x112   :  { %191 = vadd.xlane.f32.xlu1 %v190_v60  ;;  %182 = vadd.xlane.f32.xlu0 %v181_v61 }
 0x113   :  { %v193_v63 = vsel %vm180_vm2, %v186_v62, 0.0 }
 0x116   :  { %194 = vadd.xlane.f32.xlu1 %v193_v63 }
 0x197   :  { %v176_v0 = vpop.xlane.xlu0 %175 }
 0x198   :  { %v196_v1 = vmul.f32 0.03125, %v176_v0 }
 0x19a   :  { %v202_v5 = vmul.f32 %v196_v1, %v196_v1  ;;  %v208_v22 = vsub.f32 %v158_v45, %v196_v1 }
 0x19b   :  { %v179_v2 = vpop.xlane.xlu1 %178  ;;  %v189_v4 = vpop.xlane.xlu0 %188 }
 0x19c   :  { %v197_v6 = vmul.f32 0.03125, %v179_v2  ;;  %v199_v7 = vmul.f32 0.03125, %v189_v4 }
 0x19e   :  { %v205_v8 = vsub.f32 %v199_v7, %v202_v5  ;;  %v203_v11 = vmul.f32 %v197_v6, %v197_v6  ;;  %v209_v27 = vsub.f32 %v163_v51, %v197_v6  ;;  %v5243_v51 = vpack.c.bf16 %v6005_v49, %v6000_v48 }
 0x19f   :  { %v192_v9 = vpop.xlane.xlu1 %191  ;;  %v183_v10 = vpop.xlane.xlu0 %182 }
 0x1a0   :  { %v211_v12 = vadd.f32 1e-05, %v205_v8  ;;  %v200_v13 = vmul.f32 0.03125, %v192_v9  ;;  %v198_v14 = vmul.f32 0.03125, %v183_v10  ;;  %5244 = vmatpush3.bf16.msra.mxu1 %v5243_v51  ;;  %v6069_v51 = vld [vmem:[%s7108_s3] sm:$0xf] }
 0x1a1   :  { %5245 = vmatprep.subr.bf16.mxu1 %v5762_v3  ;;  %s5768_s3 = smov 48  }
 0x1a2   :  { %5556 = vrsqrt.f32 %v211_v12  ;;  %v206_v15 = vsub.f32 %v200_v13, %v203_v11  ;;  %v204_v16 = vmul.f32 %v198_v14, %v198_v14  ;;  %v210_v32 = vsub.f32 %v168_v58, %v198_v14 }
 0x1a3   :  { %v195_v17 = vpop.xlane.xlu1 %194 }
 0x1a4   :  { %v212_v18 = vadd.f32 1e-05, %v206_v15  ;;  %v201_v19 = vmul.f32 0.03125, %v195_v17  ;;  %5247 = vmatpush3.bf16.msra.mxu1 %v5246_v55 }
 0x1a5   :  { %5248 = vmatprep.subr.bf16.mxu1 %v5762_v3 }
 0x1a6   :  { %5558 = vrsqrt.f32 %v212_v18  ;;  %v207_v20 = vsub.f32 %v201_v19, %v204_v16  ;;  %v4334_v16 = vld [vmem:[%s7111_s6 + $0x4] ss:$0 sm:$0xff]  ;;  %v4335_v18 = vld [vmem:[%s7111_s6 + $0x5] ss:$0 sm:$0xff] }
 0x1a8   :  { %v213_v21 = vadd.f32 1e-05, %v207_v20 }
 0x1aa   :  { %5560 = vrsqrt.f32 %v213_v21 }
 0x1ac   :  { %v5557_v23 = vpop.eup %5556 }
 0x1ad   :  { %v217_v25 = vmul.f32 %v5557_v23, %v208_v22 }
 0x1af   :  { %v224_v28 = vmul.f32 %v4332_v24, %v217_v25 }
 0x1b0   :  { %v5559_v29 = vpop.eup %5558 }
 0x1b1   :  { %v5976_v30 = vadd.f32 %v4333_v26, %v224_v28  ;;  %v218_v31 = vmul.f32 %v5559_v29, %v209_v27 }
 0x1b3   :  { %v310_v33 = vsel %vm173_vm1, %v5976_v30, 0.0  ;;  %v319_v34 = vmul.f32 %v5976_v30, %v5976_v30  ;;  %v225_v35 = vmul.f32 %v4332_v24, %v218_v31 }
 0x1b4   :  { %v5561_v36 = vpop.eup %5560  ;;  %311 = vadd.xlane.f32.xlu0 %v310_v33 }
 0x1b5   :  { %v322_v37 = vsel %vm173_vm1, %v319_v34, 0.0  ;;  %v5983_v38 = vadd.f32 %v4333_v26, %v225_v35  ;;  %v219_v39 = vmul.f32 %v5561_v36, %v210_v32  ;;  %v4336_v34 = vld [vmem:[%s7111_s6 + $0x8] ss:$0 sm:$0xff] }
 0x1b6   :  { %323 = vadd.xlane.f32.xlu1 %v322_v37 }
 0x1b7   :  { %v313_v40 = vsel %vm173_vm1, %v5983_v38, 0.0  ;;  %v320_v41 = vmul.f32 %v5983_v38, %v5983_v38  ;;  %v226_v42 = vmul.f32 %v4332_v24, %v219_v39 }
 0x1b8   :  { %314 = vadd.xlane.f32.xlu0 %v313_v40 }
 0x1b9   :  { %v325_v43 = vsel %vm173_vm1, %v320_v41, 0.0  ;;  %v5990_v44 = vadd.f32 %v4333_v26, %v226_v42 }
 0x1ba   :  { %326 = vadd.xlane.f32.xlu1 %v325_v43 }
 0x1bb   :  { %v316_v45 = vsel %vm180_vm2, %v5990_v44, 0.0  ;;  %v321_v46 = vmul.f32 %v5990_v44, %v5990_v44 }
 0x1bc   :  { %317 = vadd.xlane.f32.xlu0 %v316_v45 }
 0x1bd   :  { %v328_v47 = vsel %vm180_vm2, %v321_v46, 0.0 }
 0x1be   :  { %329 = vadd.xlane.f32.xlu1 %v328_v47 }
 0x241   :  { %v312_v56 = vpop.xlane.xlu0 %311 }
 0x242   :  { %v331_v57 = vmul.f32 0.03125, %v312_v56 }
 0x243   :  { %v324_v58 = vpop.xlane.xlu1 %323 }
 0x244   :  { %v337_v59 = vmul.f32 %v331_v57, %v331_v57  ;;  %v334_v60 = vmul.f32 0.03125, %v324_v58  ;;  %v343_v14 = vsub.f32 %v5976_v30, %v331_v57 }
 0x245   :  { %v315_v61 = vpop.xlane.xlu0 %314 }
 0x246   :  { %v340_v62 = vsub.f32 %v334_v60, %v337_v59  ;;  %v332_v63 = vmul.f32 0.03125, %v315_v61 }
 0x247   :  { %v327_v0 = vpop.xlane.xlu1 %326 }
 0x248   :  { %v346_v1 = vadd.f32 1e-05, %v340_v62  ;;  %v338_v2 = vmul.f32 %v332_v63, %v332_v63  ;;  %v335_v4 = vmul.f32 0.03125, %v327_v0  ;;  %v344_v19 = vsub.f32 %v5983_v38, %v332_v63 }
 0x249   :  { %v318_v5 = vpop.xlane.xlu0 %317 }
 0x24a   :  { %5562 = vrsqrt.f32 %v346_v1  ;;  %v341_v6 = vsub.f32 %v335_v4, %v338_v2  ;;  %v333_v7 = vmul.f32 0.03125, %v318_v5 }
 0x24b   :  { %v330_v8 = vpop.xlane.xlu1 %329 }
 0x24c   :  { %v347_v9 = vadd.f32 1e-05, %v341_v6  ;;  %v339_v10 = vmul.f32 %v333_v7, %v333_v7  ;;  %v336_v11 = vmul.f32 0.03125, %v330_v8  ;;  %v345_v24 = vsub.f32 %v5990_v44, %v333_v7 }
 0x24d   :  { %v234_v7 = vlaneseq }
 0x24e   :  { %5564 = vrsqrt.f32 %v347_v9  ;;  %v342_v12 = vsub.f32 %v336_v11, %v339_v10 }
 0x24f   :  { %v6133_v8 = vshrl.u32 %v234_v7, 7  ;;  %v6135_v9 = vand.u32 127, %v234_v7 }
 0x250   :  { %v348_v13 = vadd.f32 1e-05, %v342_v12 }
 0x251   :  { %v6138_v10 = vadd.s32 8, %v6133_v8  ;;  %vm266_vm7 = vcmp.ge.s32.totalorder %v6135_v9, 9  ;;  %vm270_vm10 = vcmp.lt.s32.totalorder %v6135_v9, 18  ;;  %v237_v11 = vadd.s32 16, %v6133_v8 }
 0x252   :  { %5566 = vrsqrt.f32 %v348_v13  ;;  %vm253_vm11 = vcmp.lt.s32.totalorder %v6135_v9, 9 }
 0x253   :  { %vm258_vm6 = vcmp.ge.s32.totalorder %v6138_v10, 9  ;;  %vm244_vm8 = vcmp.lt.s32.totalorder %v6138_v10, 9  ;;  %vm262_vm15 = vcmp.lt.s32.totalorder %v237_v11, 18 }
 0x254   :  { %v5563_v15 = vpop.eup %5562  ;;  %vm268_vm9 = vmand %vm258_vm6, %vm266_vm7 }
 0x255   :  { %v352_v17 = vmul.f32 %v5563_v15, %v343_v14  ;;  %vm255_vm12 = vmand %vm244_vm8, %vm253_vm11 }
 0x256   :  { %vm272_vm14 = vmand %vm268_vm9, %vm270_vm10  ;;  %vm854_vm9 = vcmask 140288  }
 0x257   :  { %v359_v20 = vmul.f32 %v4334_v16, %v352_v17  ;;  %vm6158_vm0 = vmor %vm255_vm12, %vm272_vm14  ;;  %vm986_vm12 = vcmask 1043456   ;;  %vm1086_vm14 = vcmask 1041408  }
 0x258   :  { %v5565_v21 = vpop.eup %5564  ;;  %vm269_vm6 = vmand %vm262_vm15, %vm266_vm7  ;;  %vm867_vm7 = vcmask 31744   ;;  %vm3090_vm15 = vcmp.lt.s32.totalorder %v6135_v9, 16 }
 0x259   :  { %v366_v22 = vadd.f32 %v4335_v18, %v359_v20  ;;  %v353_v23 = vmul.f32 %v5565_v21, %v344_v19  ;;  %vm6172_vm8 = vmand %vm269_vm6, %vm270_vm10  ;;  %vm874_vm10 = vcmask 25600   ;;  %vm3096_vm6 = vcmp.le.s32.totalorder %v6135_v9, %v6138_v10 }
 0x25b   :  { %4723 = vmatmul.mubr.msk.f32.vlgmr.msra.gmra.mrb[0].mxu1 %vm173_vm1, %v366_v22  ;;  %v360_v25 = vmul.f32 %v4334_v16, %v353_v23 }
 0x25c   :  { %v5567_v26 = vpop.eup %5566  ;;  %4725 = vmatprep.mubr.msk.f32.mxu1 %vm5763_vm3, %v5764_v54 }
 0x25d   :  { %v367_v27 = vadd.f32 %v4335_v18, %v360_v25  ;;  %v354_v28 = vmul.f32 %v5567_v26, %v345_v24 }
 0x25f   :  { %4726 = vmatmul.mubr.msk.f32.gmra.mrb[2].mxu1 %vm173_vm1, %v367_v27  ;;  %v361_v29 = vmul.f32 %v4334_v16, %v354_v28 }
 0x260   :  { %4728 = vmatprep.mubr.msk.f32.mxu1 %vm5763_vm3, %v5764_v54 }
 0x261   :  { %v368_v31 = vadd.f32 %v4335_v18, %v361_v29 }
 0x263   :  { %4729 = vmatmul.mubr.msk.f32.gmra.mrb[4].mxu1 %vm173_vm1, %v368_v31 }
 0x264   :  { %4737 = vmatprep.mubr.msk.f32.mxu1 %vm5763_vm3, %v5764_v54 }
 0x32e   :  { %v448_v32 = vpop.f32.mrb[0].mxu1 }
 0x32f   :  { %v4724_v33 = vpop.f32.mrb[1].mxu1  ;;  %v449_v36 = vadd.f32 %v4336_v34, %v448_v32 }
 0x331   :  { %v462_v45 = vmul.f32 0.25, %v449_v36 }
 0x332   :  { %v453_v35 = vpop.f32.mrb[2].mxu1 }
 0x333   :  { %v454_v37 = vadd.f32 %v4336_v34, %v453_v35  ;;  %v4727_v39 = vpop.f32.mrb[3].mxu1 }
 0x335   :  { %v6050_v40 = vpack.i.bf16 %v454_v37, %v449_v36  ;;  %v463_v47 = vmul.f32 0.25, %v454_v37 }
 0x336   :  { %v458_v41 = vpop.f32.mrb[4].mxu1 }
 0x337   :  { %v6052_v42 = vadd.f32 %v4336_v34, %v458_v41  ;;  %5467 = vrot.lane.b32.xlu0 %v6050_v40, %s5765_s28  ;;  %v4730_v43 = vpop.f32.mrb[5].mxu1 }
 0x339   :  { %472 = vrot.lane.b32.xlu1 %v6052_v42, %s5765_s28  ;;  %v464_v46 = vmul.f32 0.25, %v6052_v42 }
 0x33b   :  { %656 = vrot.lane.b32.xlu0 %v462_v45, %s5766_s2 }
 0x33d   :  { %5472 = vrot.lane.b32.xlu1 %v6050_v40, %s5767_s29 }
 0x33f   :  { %660 = vrot.lane.b32.xlu0 %v464_v46, %s5766_s2 }
 0x341   :  { %666 = vrot.lane.b32.xlu1 %v6052_v42, %s5767_s29 }
 0x345   :  { %658 = vrot.lane.b32.xlu1 %v463_v47, %s5766_s2 }
 0x349   :  { %763 = vrot.lane.b32.xlu1 %v6069_v51, %s5766_s2 }
 0x3a9   :  { %v5468_v55 = vpop.permute.xlu0 %5467 }
 0x3aa   :  { %v5470_v56 = vunpack.i.h.bf16 %v5468_v55  ;;  %v5469_v57 = vunpack.i.l.bf16 %v5468_v55 }
 0x3ab   :  { %v473_v60 = vpop.permute.xlu1 %472 }
 0x3ac   :  { %v5249_v59 = vpack.c.bf16 %v5470_v56, %v5469_v57 }
 0x3ad   :  { %v657_v5 = vpop.permute.xlu0 %656 }
 0x3ae   :  { %5251 = vmatpush3.bf16.xpose.msk.msra.mxu1 %vm6075_vm5, %v5249_v59 }
 0x3af   :  { %4735 = vmatprep.subr.mxu1 %v5764_v54  ;;  %v5473_v61 = vpop.permute.xlu1 %5472 }
 0x3b0   :  { %v5475_v62 = vunpack.i.h.bf16 %v5473_v61  ;;  %v5474_v63 = vunpack.i.l.bf16 %v5473_v61 }
 0x3b1   :  { %v661_v6 = vpop.permute.xlu0 %660 }
 0x3b2   :  { %v5253_v0 = vpack.c.bf16 %v5475_v62, %v5474_v63 }
 0x3b3   :  { %v667_v1 = vpop.permute.xlu1 %666 }
 0x3b6   :  { %4736 = vmatpush3.xpose.msk.msra.mxu1 %vm474_vm4, %v473_v60 }
 0x3b7   :  { %4746 = vmatprep.subr.mxu1 %v5764_v54  ;;  %v659_v2 = vpop.permute.xlu1 %658 }
 0x3b9   :  { %4738 = vmatmul.mubr.msk.f32.vlgmr.msra.gmra.mrb[6].mxu1 %vm474_vm4, %v462_v45 }
 0x3ba   :  { %4740 = vmatprep.mubr.msk.f32.mxu1 %vm5763_vm3, %v5764_v54  ;;  %4747 = vmatpush3.xpose.msk.msra.mxu1 %vm474_vm4, %v6069_v51 }
 0x3bb   :  { %5252 = vmatprep.subr.bf16.mxu1 %v5762_v3  ;;  %v6109_v4 = vpop.permute.xlu1 %763 }
 0x3bd   :  { %4741 = vmatmul.mubr.msk.f32.gmra.mrb[8].mxu1 %vm474_vm4, %v463_v47 }
 0x3be   :  { %4743 = vmatprep.mubr.msk.f32.mxu1 %vm5763_vm3, %v5764_v54 }
 0x3c1   :  { %4744 = vmatmul.mubr.msk.f32.gmra.mrb[10].mxu1 %vm474_vm4, %v464_v46 }
 0x3c2   :  { %4748 = vmatprep.mubr.msk.f32.mxu1 %vm5763_vm3, %v5764_v54 }
 0x3c5   :  { %4749 = vmatmul.mubr.msk.f32.vlgmr.msra.gmra.mrb[12].mxu1 %vm474_vm4, %v462_v45 }
 0x3c6   :  { %5255 = vmatpush3.bf16.xpose.msk.msra.mxu1 %vm6075_vm5, %v5253_v0  ;;  %4751 = vmatprep.mubr.msk.f32.mxu1 %vm5763_vm3, %v5764_v54 }
 0x3c7   :  { %4761 = vmatprep.subr.mxu1 %v5764_v54 }
 0x3c9   :  { %4752 = vmatmul.mubr.msk.f32.gmra.mrb[14].mxu1 %vm474_vm4, %v463_v47 }
 0x3ca   :  { %4754 = vmatprep.mubr.msk.f32.mxu1 %vm5763_vm3, %v5764_v54 }
 0x3cd   :  { %4755 = vmatmul.mubr.msk.f32.gmra.mrb[16].mxu1 %vm474_vm4, %v464_v46 }
 0x3ce   :  { %4762 = vmatpush3.xpose.msk.msra.mxu1 %vm474_vm4, %v667_v1  ;;  %4763 = vmatprep.mubr.msk.f32.mxu1 %vm5763_vm3, %v5764_v54 }
 0x3cf   :  { %4772 = vmatprep.subr.mxu1 %v5764_v54 }
 0x3d1   :  { %4764 = vmatmul.mubr.msk.f32.vlgmr.msra.gmra.mrb[18].mxu1 %vm474_vm4, %v657_v5 }
 0x3d2   :  { %4766 = vmatprep.mubr.msk.f32.mxu1 %vm5763_vm3, %v5764_v54  ;;  %4773 = vmatpush3.xpose.msk.msra.mxu1 %vm474_vm4, %v6109_v4 }
 0x3d3   :  { %4783 = vmatprep.subr.mxu1 %v5764_v54 }
 0x3d5   :  { %4767 = vmatmul.mubr.msk.f32.gmra.mrb[20].mxu1 %vm474_vm4, %v659_v2 }
 0x3d6   :  { %4769 = vmatprep.mubr.msk.f32.mxu1 %vm5763_vm3, %v5764_v54 }
 0x3d9   :  { %4770 = vmatmul.mubr.msk.f32.gmra.mrb[22].mxu1 %vm474_vm4, %v661_v6 }
 0x3da   :  { %4774 = vmatprep.mubr.msk.f32.mxu1 %vm5763_vm3, %v5764_v54 }
 0x3dd   :  { %4775 = vmatmul.mubr.msk.f32.vlgmr.msra.gmra.mrb[24].mxu1 %vm474_vm4, %v657_v5 }
 0x3de   :  { %4777 = vmatprep.mubr.msk.f32.mxu1 %vm5763_vm3, %v5764_v54  ;;  %4784 = vmatpush3.msk.msra.mxu1 %vm986_vm12, %v6069_v51 }
 0x3df   :  { %4809 = vmatprep.subr.mxu1 %v5764_v54 }
 0x3e1   :  { %4778 = vmatmul.mubr.msk.f32.gmra.mrb[26].mxu1 %vm474_vm4, %v659_v2 }
 0x3e2   :  { %4780 = vmatprep.mubr.msk.f32.mxu1 %vm5763_vm3, %v5764_v54 }
 0x3e5   :  { %4781 = vmatmul.mubr.msk.f32.gmra.mrb[28].mxu1 %vm474_vm4, %v661_v6 }
 0x3e6   :  { %4785 = vmatprep.mubr.msk.f32.mxu1 %vm5763_vm3, %v5764_v54 }
 0x48c   :  { %v556_v12 = vpop.f32.mrb[6].mxu1 }
 0x48d   :  { %v6154_v13 = vsel %vm253_vm11, %v556_v12, -1e+30  ;;  %v4739_v14 = vpop.f32.mrb[7].mxu1 }
 0x48e   :  { %v848_v15 = vsel %vm847_vm13, %v6154_v13, -inf }
 0x48f   :  { %849 = vmax.xlane.f32.xlu0 %v848_v15 }
 0x490   :  { %v561_v17 = vpop.f32.mrb[8].mxu1 }
 0x491   :  { %v6166_v18 = vsel %vm6158_vm0, %v561_v17, -1e+30  ;;  %v4742_v19 = vpop.f32.mrb[9].mxu1 }
 0x492   :  { %v851_v20 = vsel %vm847_vm13, %v6166_v18, -inf }
 0x493   :  { %852 = vmax.xlane.f32.xlu0 %v851_v20 }
 0x494   :  { %v566_v22 = vpop.f32.mrb[10].mxu1 }
 0x495   :  { %v6178_v23 = vsel %vm6172_vm8, %v566_v22, -1e+30  ;;  %v4745_v24 = vpop.f32.mrb[11].mxu1 }
 0x496   :  { %v855_v25 = vsel %vm854_vm9, %v6178_v23, -inf }
 0x497   :  { %856 = vmax.xlane.f32.xlu0 %v855_v25 }
 0x498   :  { %v642_v26 = vpop.f32.mrb[12].mxu1 }
 0x499   :  { %v4750_v27 = vpop.f32.mrb[13].mxu1  ;;  %v868_v28 = vsel %vm867_vm7, %v642_v26, -inf }
 0x49a   :  { %869 = vmax.xlane.f32.xlu1 %v868_v28 }
 0x49c   :  { %v647_v29 = vpop.f32.mrb[14].mxu1 }
 0x49d   :  { %v4753_v31 = vpop.f32.mrb[15].mxu1  ;;  %v871_v32 = vsel %vm867_vm7, %v647_v29, -inf }
 0x49e   :  { %872 = vmax.xlane.f32.xlu0 %v871_v32 }
 0x4a0   :  { %v6184_v33 = vpop.f32.mrb[16].mxu1 }
 0x4a1   :  { %v4756_v34 = vpop.f32.mrb[17].mxu1  ;;  %v875_v35 = vsel %vm874_vm10, %v6184_v33, -inf }
 0x4a2   :  { %876 = vmax.xlane.f32.xlu1 %v875_v35 }
 0x4a4   :  { %v746_v36 = vpop.f32.mrb[18].mxu1 }
 0x4a5   :  { %v6190_v37 = vsel %vm253_vm11, %v746_v36, -1e+30  ;;  %v4765_v39 = vpop.f32.mrb[19].mxu1 }
 0x4a6   :  { %v858_v41 = vsel %vm847_vm13, %v6190_v37, -inf }
 0x4a7   :  { %859 = vmax.xlane.f32.xlu0 %v858_v41 }
 0x4a8   :  { %v751_v43 = vpop.f32.mrb[20].mxu1 }
 0x4a9   :  { %v6196_v45 = vsel %vm6158_vm0, %v751_v43, -1e+30  ;;  %v4768_v46 = vpop.f32.mrb[21].mxu1 }
 0x4aa   :  { %v861_v47 = vsel %vm847_vm13, %v6196_v45, -inf }
 0x4ab   :  { %862 = vmax.xlane.f32.xlu0 %v861_v47 }
 0x4ac   :  { %v756_v55 = vpop.f32.mrb[22].mxu1 }
 0x4ad   :  { %v6202_v56 = vsel %vm6172_vm8, %v756_v55, -1e+30  ;;  %v4771_v57 = vpop.f32.mrb[23].mxu1 }
 0x4ae   :  { %v864_v59 = vsel %vm854_vm9, %v6202_v56, -inf }
 0x4af   :  { %865 = vmax.xlane.f32.xlu0 %v864_v59 }
 0x4b0   :  { %v6206_v60 = vpop.f32.mrb[24].mxu1 }
 0x4b1   :  { %v4776_v61 = vpop.f32.mrb[25].mxu1  ;;  %v878_v2 = vsel %vm867_vm7, %v6206_v60, -inf }
 0x4b3   :  { %5482 = vrot.lane.b32.xlu1 %v6050_v40, %s5768_s3 }
 0x4b4   :  { %v6210_v62 = vpop.f32.mrb[26].mxu1 }
 0x4b5   :  { %v4779_v63 = vpop.f32.mrb[27].mxu1  ;;  %v881_v5 = vsel %vm867_vm7, %v6210_v62, -inf }
 0x4b7   :  { %1073 = vrot.lane.b32.xlu1 %v6052_v42, %s5769_s16 }
 0x4b8   :  { %v6214_v0 = vpop.f32.mrb[28].mxu1 }
 0x4b9   :  { %v4782_v1 = vpop.f32.mrb[29].mxu1  ;;  %v884_v6 = vsel %vm874_vm10, %v6214_v0, -inf }
 0x4c5   :  { %5477 = vrot.lane.b32.xlu0 %v6050_v40, %s5769_s16 }
 0x4db   :  { %879 = vmax.xlane.f32.xlu1 %v878_v2 }
 0x4df   :  { %882 = vmax.xlane.f32.xlu1 %v881_v5 }
 0x4e3   :  { %885 = vmax.xlane.f32.xlu1 %v884_v6 }
 0x4f4   :  { %1267 = vrot.lane.b32.xlu1 %v6052_v42, %s5768_s3 }
 0x51c   :  { %v850_v51 = vpop.xlane.xlu0 %849 }
 0x520   :  { %v853_v7 = vpop.xlane.xlu0 %852 }
 0x524   :  { %v857_v11 = vpop.xlane.xlu0 %856 }
 0x527   :  { %v870_v12 = vpop.xlane.xlu1 %869 }
 0x528   :  { %v887_v40 = vmax.f32 %v850_v51, %v870_v12 }
 0x52a   :  { %v893_v14 = vsub.f32 %v6154_v13, %v887_v40  ;;  %v911_v15 = vsub.f32 %v642_v26, %v887_v40 }
 0x52b   :  { %v873_v17 = vpop.xlane.xlu0 %872 }
 0x52c   :  { %v899_v19 = vmul.f32 1.442695, %v893_v14  ;;  %v917_v20 = vmul.f32 1.442695, %v911_v15  ;;  %v888_v22 = vmax.f32 %v853_v7, %v873_v17 }
 0x52e   :  { %5568 = vpow2.f32 %v899_v19  ;;  %v894_v24 = vsub.f32 %v6166_v18, %v888_v22  ;;  %v912_v25 = vsub.f32 %v647_v29, %v888_v22 }
 0x52f   :  { %5570 = vpow2.f32 %v917_v20  ;;  %v877_v27 = vpop.xlane.xlu1 %876 }
 0x530   :  { %v901_v28 = vmul.f32 1.442695, %v894_v24  ;;  %v919_v42 = vmul.f32 1.442695, %v912_v25  ;;  %v889_v31 = vmax.f32 %v857_v11, %v877_v27 }
 0x532   :  { %v913_v32 = vsub.f32 %v6184_v33, %v889_v31  ;;  %5572 = vpow2.f32 %v919_v42  ;;  %v895_v13 = vsub.f32 %v6178_v23, %v889_v31 }
 0x533   :  { %5574 = vpow2.f32 %v901_v28  ;;  %v5483_v59 = vpop.permute.xlu1 %5482 }
 0x534   :  { %v921_v26 = vmul.f32 1.442695, %v913_v32  ;;  %v860_v34 = vpop.xlane.xlu0 %859  ;;  %v903_v36 = vmul.f32 1.442695, %v895_v13  ;;  %v5485_v31 = vunpack.i.h.bf16 %v5483_v59  ;;  %v5484_v32 = vunpack.i.l.bf16 %v5483_v59 }
 0x536   :  { %5576 = vpow2.f32 %v921_v26 }
 0x537   :  { %5578 = vpow2.f32 %v903_v36  ;;  %v1074_v2 = vpop.permute.xlu1 %1073 }
 0x538   :  { %v5569_v35 = vpop.eup %5568  ;;  %v863_v39 = vpop.xlane.xlu0 %862 }
 0x539   :  { %v5571_v41 = vpop.eup %5570  ;;  %v929_v18 = vsel %vm847_vm13, %v5569_v35, 0.0 }
 0x53a   :  { %4786 = vmatmul.mubr.msk.f32.vlgmr.msra.gmra.mrb[30].mxu1 %vm867_vm7, %v5571_v41  ;;  %930 = vadd.xlane.f32.xlu0 %v929_v18  ;;  %v947_v33 = vsel %vm867_vm7, %v5571_v41, 0.0 }
 0x53b   :  { %4810 = vmatpush3.msk.msra.mxu1 %vm986_vm12, %v6109_v4  ;;  %4788 = vmatprep.mubr.msk.f32.mxu1 %vm5763_vm3, %v5764_v54 }
 0x53c   :  { %v866_v23 = vpop.xlane.xlu0 %865  ;;  %5259 = vmatprep.subr.bf16.mxu1 %v5762_v3  ;;  %v5573_v29 = vpop.eup %5572 }
 0x53d   :  { %v5575_v43 = vpop.eup %5574  ;;  %v950_v63 = vsel %vm867_vm7, %v5573_v29, 0.0 }
 0x53e   :  { %4789 = vmatmul.mubr.msk.f32.gmra.mrb[32].mxu1 %vm867_vm7, %v5573_v29  ;;  %948 = vadd.xlane.f32.xlu0 %v947_v33  ;;  %v932_v57 = vsel %vm847_vm13, %v5575_v43, 0.0  ;;  %v5486_v33 = vpack.i.bf16 %v6019_v53, %v6014_v52 }
 0x53f   :  { %4791 = vmatprep.mubr.msk.f32.mxu1 %vm5763_vm3, %v5764_v54 }
 0x540   :  { %v5478_v46 = vpop.permute.xlu0 %5477  ;;  %v5577_v47 = vpop.eup %5576 }
 0x541   :  { %v5480_v4 = vunpack.i.h.bf16 %v5478_v46  ;;  %v5479_v55 = vunpack.i.l.bf16 %v5478_v46  ;;  %v5579_v1 = vpop.eup %5578  ;;  %v953_v6 = vsel %vm874_vm10, %v5577_v47, 0.0 }
 0x542   :  { %4792 = vmatmul.mubr.msk.f32.gmra.mrb[34].mxu1 %vm867_vm7, %v5577_v47  ;;  %933 = vadd.xlane.f32.xlu0 %v932_v57  ;;  %v935_v5 = vsel %vm854_vm9, %v5579_v1, 0.0 }
 0x543   :  { %v5257_v61 = vpack.c.bf16 %v5480_v4, %v5479_v55  ;;  %4811 = vmatprep.mubr.msk.f32.mxu1 %vm5763_vm3, %v5764_v54 }
 0x545   :  { %5258 = vmatpush3.bf16.msra.mxu0 %v5257_v61 }
 0x546   :  { %951 = vadd.xlane.f32.xlu0 %v950_v63  ;;  %4798 = vmatprep.subr.mxu0 %v5764_v54 }
 0x549   :  { %4799 = vmatpush3.msk.msra.mxu0 %vm1086_vm14, %v1074_v2 }
 0x54a   :  { %936 = vadd.xlane.f32.xlu0 %v935_v5  ;;  %4801 = vmatmul.mubr.msk.f32.vlgmr.msra.gmra.mrb[6].mxu0 %vm847_vm13, %v5569_v35 }
 0x54b   :  { %4803 = vmatprep.mubr.msk.f32.mxu0 %vm5763_vm3, %v5764_v54  ;;  %5262 = vmatprep.subr.bf16.mxu0 %v5762_v3 }
 0x54e   :  { %954 = vadd.xlane.f32.xlu0 %v953_v6  ;;  %4804 = vmatmul.mubr.msk.f32.gmra.mrb[8].mxu0 %vm847_vm13, %v5575_v43 }
 0x54f   :  { %4806 = vmatprep.mubr.msk.f32.mxu0 %vm5763_vm3, %v5764_v54 }
 0x552   :  { %4807 = vmatmul.mubr.msk.f32.gmra.mrb[10].mxu0 %vm847_vm13, %v5579_v1 }
 0x553   :  { %4839 = vmatprep.mubr.msk.f32.mxu0 %vm5763_vm3, %v5764_v54 }
 0x568   :  { %v880_v51 = vpop.xlane.xlu1 %879 }
 0x569   :  { %v890_v7 = vmax.f32 %v860_v34, %v880_v51 }
 0x56b   :  { %v896_v11 = vsub.f32 %v6190_v37, %v890_v7  ;;  %v914_v12 = vsub.f32 %v6206_v60, %v890_v7 }
 0x56c   :  { %v883_v40 = vpop.xlane.xlu1 %882 }
 0x56d   :  { %v905_v14 = vmul.f32 1.442695, %v896_v11  ;;  %v923_v15 = vmul.f32 1.442695, %v914_v12  ;;  %v891_v17 = vmax.f32 %v863_v39, %v883_v40 }
 0x56f   :  { %5580 = vpow2.f32 %v905_v14  ;;  %v897_v19 = vsub.f32 %v6196_v45, %v891_v17  ;;  %v915_v20 = vsub.f32 %v6210_v62, %v891_v17  ;;  %v5260_v62 = vpack.c.bf16 %v5485_v31, %v5484_v32 }
 0x570   :  { %5582 = vpow2.f32 %v923_v15  ;;  %v886_v22 = vpop.xlane.xlu1 %885 }
 0x571   :  { %v907_v24 = vmul.f32 1.442695, %v897_v19  ;;  %v925_v25 = vmul.f32 1.442695, %v915_v20  ;;  %v892_v27 = vmax.f32 %v866_v23, %v886_v22 }
 0x573   :  { %5584 = vpow2.f32 %v907_v24  ;;  %v898_v28 = vsub.f32 %v6202_v56, %v892_v27  ;;  %v916_v37 = vsub.f32 %v6214_v0, %v892_v27 }
 0x574   :  { %5586 = vpow2.f32 %v925_v25  ;;  %v1268_v36 = vpop.permute.xlu1 %1267 }
 0x575   :  { %v909_v60 = vmul.f32 1.442695, %v898_v28  ;;  %v927_v42 = vmul.f32 1.442695, %v916_v37 }
 0x577   :  { %5588 = vpow2.f32 %v927_v42 }
 0x578   :  { %5590 = vpow2.f32 %v909_v60 }
 0x579   :  { %v5581_v13 = vpop.eup %5580 }
 0x57a   :  { %v5583_v45 = vpop.eup %5582  ;;  %v938_v26 = vsel %vm847_vm13, %v5581_v13, 0.0 }
 0x57b   :  { %4812 = vmatmul.mubr.msk.f32.vlgmr.msra.gmra.mrb[36].mxu1 %vm867_vm7, %v5583_v45  ;;  %v956_v34 = vsel %vm867_vm7, %v5583_v45, 0.0  ;;  %939 = vadd.xlane.f32.xlu1 %v938_v26 }
 0x57c   :  { %5261 = vmatpush3.bf16.msra.mxu1 %v5260_v62  ;;  %957 = vadd.xlane.f32.xlu0 %v956_v34 }
 0x57d   :  { %v5585_v56 = vpop.eup %5584  ;;  %4814 = vmatprep.mubr.msk.f32.mxu1 %vm5763_vm3, %v5764_v54  ;;  %4824 = vmatprep.subr.mxu1 %v5764_v54 }
 0x57e   :  { %v5587_v0 = vpop.eup %5586  ;;  %v941_v35 = vsel %vm847_vm13, %v5585_v56, 0.0 }
 0x57f   :  { %4815 = vmatmul.mubr.msk.f32.gmra.mrb[38].mxu1 %vm867_vm7, %v5587_v0  ;;  %942 = vadd.xlane.f32.xlu1 %v941_v35  ;;  %v959_v41 = vsel %vm867_vm7, %v5587_v0, 0.0 }
 0x580   :  { %4825 = vmatpush3.msk.msra.mxu1 %vm1086_vm14, %v1268_v36  ;;  %4817 = vmatprep.mubr.msk.f32.mxu1 %vm5763_vm3, %v5764_v54 }
 0x581   :  { %5265 = vmatprep.subr.bf16.mxu1 %v5762_v3  ;;  %v5589_v39 = vpop.eup %5588 }
 0x582   :  { %v5591_v18 = vpop.eup %5590  ;;  %v962_v29 = vsel %vm874_vm10, %v5589_v39, 0.0 }
 0x583   :  { %4818 = vmatmul.mubr.msk.f32.gmra.mrb[40].mxu1 %vm867_vm7, %v5589_v39  ;;  %960 = vadd.xlane.f32.xlu1 %v959_v41  ;;  %v944_v23 = vsel %vm854_vm9, %v5591_v18, 0.0 }
 0x584   :  { %4826 = vmatprep.mubr.msk.f32.mxu1 %vm5763_vm3, %v5764_v54 }
 0x587   :  { %4827 = vmatmul.mubr.msk.f32.vlgmr.msra.gmra.mrb[36].mxu1 %vm847_vm13, %v5581_v13  ;;  %945 = vadd.xlane.f32.xlu1 %v944_v23 }
 0x588   :  { %4829 = vmatprep.mubr.msk.f32.mxu1 %vm5763_vm3, %v5764_v54 }
 0x58b   :  { %4830 = vmatmul.mubr.msk.f32.gmra.mrb[38].mxu1 %vm847_vm13, %v5585_v56  ;;  %963 = vadd.xlane.f32.xlu1 %v962_v29 }
 0x58c   :  { %4832 = vmatprep.mubr.msk.f32.mxu1 %vm5763_vm3, %v5764_v54 }
 0x58f   :  { %4833 = vmatmul.mubr.msk.f32.gmra.mrb[40].mxu1 %vm847_vm13, %v5591_v18 }
 0x590   :  { %4852 = vmatprep.mubr.msk.f32.mxu1 %vm5763_vm3, %v5764_v54 }
 0x592   :  { %5487 = vrot.lane.b32.xlu0 %v5486_v33, %s5770_s17 }
 0x59c   :  { %5492 = vrot.lane.b32.xlu1 %v5491_v50, %s5770_s17 }
 0x5c7   :  { %v931_v43 = vpop.xlane.xlu0 %930 }
 0x5cb   :  { %v949_v46 = vpop.xlane.xlu0 %948 }
 0x5cc   :  { %v965_v50 = vadd.f32 %v949_v46, %v931_v43 }
 0x5ce   :  { %5592 = vrcp.f32 %v965_v50 }
 0x5cf   :  { %v934_v47 = vpop.xlane.xlu0 %933 }
 0x5d3   :  { %v952_v4 = vpop.xlane.xlu0 %951 }
 0x5d4   :  { %v966_v15 = vadd.f32 %v952_v4, %v934_v47 }
 0x5d6   :  { %5594 = vrcp.f32 %v966_v15 }
 0x5d7   :  { %v937_v55 = vpop.xlane.xlu0 %936 }
 0x5d8   :  { %v5593_v60 = vpop.eup %5592 }
 0x5db   :  { %v955_v57 = vpop.xlane.xlu0 %954 }
 0x5dc   :  { %v967_v19 = vadd.f32 %v955_v57, %v937_v55 }
 0x5de   :  { %5596 = vrcp.f32 %v967_v19 }
 0x5e0   :  { %v5595_v45 = vpop.eup %5594 }
 0x5e8   :  { %v5597_v0 = vpop.eup %5596 }
 0x608   :  { %v940_v52 = vpop.xlane.xlu1 %939 }
 0x609   :  { %v958_v53 = vpop.xlane.xlu0 %957 }
 0x60a   :  { %v968_v59 = vadd.f32 %v958_v53, %v940_v52 }
 0x60c   :  { %v943_v61 = vpop.xlane.xlu1 %942  ;;  %5598 = vrcp.f32 %v968_v59 }
 0x60d   :  { %v1055_v63 = vpop.f32.mrb[30].mxu1  ;;  %v5488_v1 = vpop.permute.xlu0 %5487 }
 0x60e   :  { %v4787_v2 = vpop.f32.mrb[31].mxu1  ;;  %v5490_v5 = vunpack.i.h.bf16 %v5488_v1  ;;  %v5489_v6 = vunpack.i.l.bf16 %v5488_v1 }
 0x60f   :  { %v4382_v2 = vld [vmem:[%s7111_s6 + $0x9] ss:$0 sm:$0xff] }
 0x610   :  { %v961_v51 = vpop.xlane.xlu1 %960  ;;  %v5263_v7 = vpack.c.bf16 %v5490_v5, %v5489_v6 }
 0x611   :  { %v969_v11 = vadd.f32 %v961_v51, %v943_v61  ;;  %v1060_v48 = vpop.f32.mrb[32].mxu1 }
 0x612   :  { %v4790_v49 = vpop.f32.mrb[33].mxu1  ;;  %5264 = vmatpush3.bf16.msra.mxu0 %v5263_v7 }
 0x613   :  { %5268 = vmatprep.subr.bf16.mxu0 %v5762_v3  ;;  %5600 = vrcp.f32 %v969_v11 }
 0x614   :  { %v946_v12 = vpop.xlane.xlu1 %945 }
 0x615   :  { %v1065_v40 = vpop.f32.mrb[34].mxu1 }
 0x616   :  { %v4793_v14 = vpop.f32.mrb[35].mxu1  ;;  %v5599_v39 = vpop.eup %5598 }
 0x618   :  { %v964_v17 = vpop.xlane.xlu1 %963 }
 0x619   :  { %v970_v36 = vadd.f32 %v964_v17, %v946_v12 }
 0x61b   :  { %5602 = vrcp.f32 %v970_v36 }
 0x61c   :  { %v5493_v20 = vpop.permute.xlu1 %5492 }
 0x61d   :  { %v5495_v22 = vunpack.i.h.bf16 %v5493_v20  ;;  %v5494_v24 = vunpack.i.l.bf16 %v5493_v20  ;;  %v1155_v25 = vpop.f32.mrb[6].mxu0  ;;  %v5601_v29 = vpop.eup %5600 }
 0x61e   :  { %v1156_v27 = vadd.f32 %v1155_v25, %v1055_v63  ;;  %v4802_v28 = vpop.f32.mrb[7].mxu0 }
 0x61f   :  { %v5266_v37 = vpack.c.bf16 %v5495_v22, %v5494_v24 }
 0x620   :  { %v1169_v31 = vmul.f32 %v5593_v60, %v1156_v27 }
 0x621   :  { %v1160_v42 = vpop.f32.mrb[8].mxu0  ;;  %5267 = vmatpush3.bf16.msra.mxu1 %v5266_v37 }
 0x622   :  { %v1161_v32 = vadd.f32 %v1160_v42, %v1060_v48  ;;  %v4805_v13 = vpop.f32.mrb[9].mxu0  ;;  %5274 = vmatprep.subr.bf16.mxu1 %v5762_v3  ;;  %v281_v42 = vld [vmem:[%s7109_s4 + $0x18] sm:$0xff] }
 0x623   :  { %v285_v13 = vld [vmem:[%s7109_s4 + $0x38] sm:$0xff] }
 0x624   :  { %4853 = vmatmul.mubr.msk.f32.vlgmr.msra.gmra.mrb[42].mxu1 %vm474_vm4, %v1169_v31  ;;  %v1170_v26 = vmul.f32 %v5595_v45, %v1161_v32  ;;  %v283_v32 = vld [vmem:[%s7109_s4 + $0x28] sm:$0xff] }
 0x625   :  { %v1165_v62 = vpop.f32.mrb[10].mxu0  ;;  %4855 = vmatprep.mubr.msk.f32.mxu1 %vm5763_vm3, %v5764_v54  ;;  %v5603_v47 = vpop.eup %5602  ;;  %v5272_v45 = vpack.c.bf16 %v285_v13, %v283_v32  ;;  %v294_v32 = vld [vmem:[%s7110_s5 + $0x40] sm:$0xff]  ;;  %v295_v13 = vld [vmem:[%s7110_s5 + $0x48] sm:$0xff] }
 0x626   :  { %v1166_v34 = vadd.f32 %v1165_v62, %v1065_v40  ;;  %v4808_v56 = vpop.f32.mrb[11].mxu0 }
 0x628   :  { %4856 = vmatmul.mubr.msk.f32.gmra.mrb[44].mxu1 %vm474_vm4, %v1170_v26  ;;  %v1171_v35 = vmul.f32 %v5597_v0, %v1166_v34 }
 0x629   :  { %4858 = vmatprep.mubr.msk.f32.mxu1 %vm5763_vm3, %v5764_v54 }
 0x62c   :  { %4859 = vmatmul.mubr.msk.f32.gmra.mrb[46].mxu1 %vm474_vm4, %v1171_v35 }
 0x62d   :  { %4910 = vmatprep.mubr.msk.f32.mxu1 %vm5763_vm3, %v5764_v54 }
 0x65a   :  { %v1348_v41 = vpop.f32.mrb[36].mxu1 }
 0x65b   :  { %v1362_v18 = vmul.f32 %v5599_v39, %v1348_v41  ;;  %v4828_v23 = vpop.f32.mrb[37].mxu1 }
 0x65d   :  { %4840 = vmatmul.mubr.msk.f32.vlgmr.msra.gmra.mrb[12].mxu0 %vm474_vm4, %v1362_v18 }
 0x65e   :  { %v1353_v33 = vpop.f32.mrb[38].mxu1  ;;  %4842 = vmatprep.mubr.msk.f32.mxu0 %vm5763_vm3, %v5764_v54 }
 0x65f   :  { %v1363_v43 = vmul.f32 %v5601_v29, %v1353_v33  ;;  %v4831_v46 = vpop.f32.mrb[39].mxu1 }
 0x661   :  { %4843 = vmatmul.mubr.msk.f32.gmra.mrb[14].mxu0 %vm474_vm4, %v1363_v43 }
 0x662   :  { %v1358_v4 = vpop.f32.mrb[40].mxu1  ;;  %4845 = vmatprep.mubr.msk.f32.mxu0 %vm5763_vm3, %v5764_v54 }
 0x663   :  { %v1364_v55 = vmul.f32 %v5603_v47, %v1358_v4  ;;  %v4834_v57 = vpop.f32.mrb[41].mxu1 }
 0x665   :  { %4846 = vmatmul.mubr.msk.f32.gmra.mrb[16].mxu0 %vm474_vm4, %v1364_v55 }
 0x666   :  { %4869 = vmatprep.mubr.msk.f32.mxu0 %vm5763_vm3, %v5764_v54 }
 0x6f7   :  { %v1545_v52 = vpop.f32.mrb[42].mxu1 }
 0x6f8   :  { %v4854_v53 = vpop.f32.mrb[43].mxu1 }
 0x6fb   :  { %v1550_v59 = vpop.f32.mrb[44].mxu1 }
 0x6fc   :  { %v4857_v61 = vpop.f32.mrb[45].mxu1 }
 0x6ff   :  { %v1555_v63 = vpop.f32.mrb[46].mxu1 }
 0x700   :  { %v4860_v1 = vpop.f32.mrb[47].mxu1 }
 0x730   :  { %v1448_v5 = vpop.f32.mrb[12].mxu0 }
 0x731   :  { %v1546_v6 = vadd.f32 %v1545_v52, %v1448_v5  ;;  %v4841_v51 = vpop.f32.mrb[13].mxu0 }
 0x733   :  { %v1563_v7 = vadd.f32 %v4382_v2, %v1546_v6 }
 0x734   :  { %v1453_v11 = vpop.f32.mrb[14].mxu0 }
 0x735   :  { %v6327_v48 = vadd.f32 %v1563_v7, %v5976_v30  ;;  %v1551_v49 = vadd.f32 %v1550_v59, %v1453_v11  ;;  %v4844_v50 = vpop.f32.mrb[15].mxu0 }
 0x737   :  { %v1564_v12 = vadd.f32 %v4382_v2, %v1551_v49  ;;  %v1569_v40 = vsel %vm173_vm1, %v6327_v48, 0.0  ;;  %v1578_v14 = vmul.f32 %v6327_v48, %v6327_v48 }
 0x738   :  { %v1458_v15 = vpop.f32.mrb[16].mxu0  ;;  %1570 = vadd.xlane.f32.xlu1 %v1569_v40 }
 0x739   :  { %v6334_v17 = vadd.f32 %v1564_v12, %v5983_v38  ;;  %v1556_v19 = vadd.f32 %v1555_v63, %v1458_v15  ;;  %v4847_v20 = vpop.f32.mrb[17].mxu0  ;;  %v1581_v22 = vsel %vm173_vm1, %v1578_v14, 0.0  ;;  %v4383_v63 = vld [vmem:[%s7111_s6 + $0x6] ss:$0 sm:$0xff] }
 0x73a   :  { %1582 = vadd.xlane.f32.xlu0 %v1581_v22  ;;  %v286_v20 = vld [vmem:[%s7110_s5] sm:$0xff]  ;;  %v287_v22 = vld [vmem:[%s7110_s5 + $0x8] sm:$0xff] }
 0x73b   :  { %v1565_v30 = vadd.f32 %v4382_v2, %v1556_v19  ;;  %v1579_v24 = vmul.f32 %v6334_v17, %v6334_v17  ;;  %v1572_v28 = vsel %vm173_vm1, %v6334_v17, 0.0  ;;  %v4384_v2 = vld [vmem:[%s7111_s6 + $0x7] ss:$0 sm:$0xff] }
 0x73d   :  { %v6340_v25 = vadd.f32 %v1565_v30, %v5990_v44  ;;  %v1584_v27 = vsel %vm173_vm1, %v1579_v24, 0.0  ;;  %v279_v44 = vld [vmem:[%s7109_s4 + $0x8] sm:$0xff]  ;;  %v5275_v30 = vpack.c.bf16 %v287_v22, %v286_v20  ;;  %v288_v24 = vld [vmem:[%s7110_s5 + $0x10] sm:$0xff] }
 0x73e   :  { %1585 = vadd.xlane.f32.xlu1 %v1584_v27  ;;  %1573 = vadd.xlane.f32.xlu0 %v1572_v28  ;;  %v5269_v31 = vpack.c.bf16 %v281_v42, %v279_v44  ;;  %v289_v27 = vld [vmem:[%s7110_s5 + $0x18] sm:$0xff]  ;;  %v292_v44 = vld [vmem:[%s7110_s5 + $0x30] sm:$0xff] }
 0x73f   :  { %v1580_v38 = vmul.f32 %v6340_v25, %v6340_v25  ;;  %v1575_v60 = vsel %vm180_vm2, %v6340_v25, 0.0  ;;  %5276 = vmatpush3.bf16.msra.mxu1 %v5275_v30  ;;  %v5278_v28 = vpack.c.bf16 %v289_v27, %v288_v24  ;;  %v293_v42 = vld [vmem:[%s7110_s5 + $0x38] sm:$0xff] }
 0x740   :  { %5270 = vmatpush3.bf16.msra.mxu0 %v5269_v31  ;;  %5277 = vmatprep.subr.bf16.mxu1 %v5762_v3  ;;  %v5284_v31 = vpack.c.bf16 %v293_v42, %v292_v44 }
 0x741   :  { %v1587_v37 = vsel %vm180_vm2, %v1580_v38, 0.0  ;;  %5271 = vmatprep.subr.bf16.mxu0 %v5762_v3  ;;  %v290_v38 = vld [vmem:[%s7110_s5 + $0x20] sm:$0xff] }
 0x742   :  { %1588 = vadd.xlane.f32.xlu1 %v1587_v37  ;;  %1576 = vadd.xlane.f32.xlu0 %v1575_v60  ;;  %v291_v37 = vld [vmem:[%s7110_s5 + $0x28] sm:$0xff] }
 0x743   :  { %5279 = vmatpush3.bf16.msra.mxu1 %v5278_v28  ;;  %v5281_v60 = vpack.c.bf16 %v291_v37, %v290_v38 }
 0x744   :  { %5273 = vmatpush3.bf16.msra.mxu0 %v5272_v45  ;;  %5280 = vmatprep.subr.bf16.mxu1 %v5762_v3  ;;  %v5287_v45 = vpack.c.bf16 %v295_v13, %v294_v32 }
 0x745   :  { %5298 = vmatprep.subr.bf16.mxu0 %v5762_v3 }
 0x747   :  { %5282 = vmatpush3.bf16.msra.mxu1 %v5281_v60 }
 0x748   :  { %5283 = vmatprep.subr.bf16.mxu1 %v5762_v3 }
 0x74b   :  { %5285 = vmatpush3.bf16.msra.mxu1 %v5284_v31 }
 0x74c   :  { %5286 = vmatprep.subr.bf16.mxu1 %v5762_v3 }
 0x74f   :  { %5288 = vmatpush3.bf16.msra.mxu1 %v5287_v45 }
 0x750   :  { %5289 = vmatprep.subr.bf16.mxu1 %v5762_v3 }
 0x7c5   :  { %v1571_v62 = vpop.xlane.xlu1 %1570 }
 0x7c6   :  { %v1590_v26 = vmul.f32 0.03125, %v1571_v62  ;;  %v296_v62 = vld [vmem:[%s7110_s5 + $0x50] sm:$0xff] }
 0x7c7   :  { %v1583_v34 = vpop.xlane.xlu0 %1582 }
 0x7c8   :  { %v1596_v56 = vmul.f32 %v1590_v26, %v1590_v26  ;;  %v1593_v0 = vmul.f32 0.03125, %v1583_v34  ;;  %v1602_v59 = vsub.f32 %v6327_v48, %v1590_v26  ;;  %v297_v26 = vld [vmem:[%s7110_s5 + $0x58] sm:$0xff] }
 0x7c9   :  { %v5290_v34 = vpack.c.bf16 %v297_v26, %v296_v62 }
 0x7ca   :  { %v1599_v35 = vsub.f32 %v1593_v0, %v1596_v56  ;;  %v298_v56 = vld [vmem:[%s7110_s5 + $0x60] sm:$0xff]  ;;  %v299_v0 = vld [vmem:[%s7110_s5 + $0x68] sm:$0xff] }
 0x7cb   :  { %v1586_v36 = vpop.xlane.xlu1 %1585  ;;  %v1574_v39 = vpop.xlane.xlu0 %1573  ;;  %5291 = vmatpush3.bf16.msra.mxu1 %v5290_v34 }
 0x7cc   :  { %v1605_v41 = vadd.f32 1e-05, %v1599_v35  ;;  %v1591_v18 = vmul.f32 0.03125, %v1574_v39  ;;  %v1594_v23 = vmul.f32 0.03125, %v1586_v36  ;;  %5292 = vmatprep.subr.bf16.mxu1 %v5762_v3  ;;  %v5293_v35 = vpack.c.bf16 %v299_v0, %v298_v56  ;;  %v300_v36 = vld [vmem:[%s7110_s5 + $0x70] sm:$0xff]  ;;  %v301_v39 = vld [vmem:[%s7110_s5 + $0x78] sm:$0xff] }
 0x7cd   :  { %v6477_v0 = vld [vmem:[%s7109_s4 + $0x40] sm:$0xff] }
 0x7ce   :  { %5604 = vrsqrt.f32 %v1605_v41  ;;  %v1597_v29 = vmul.f32 %v1591_v18, %v1591_v18  ;;  %v1603_v51 = vsub.f32 %v6334_v17, %v1591_v18  ;;  %v5296_v41 = vpack.c.bf16 %v301_v39, %v300_v36  ;;  %v4385_v18 = vld [vmem:[%s7111_s6 + $0xa] ss:$0 sm:$0xff]  ;;  %v6490_v36 = vld [vmem:[%s7109_s4 + $0x60] sm:$0xff]  ;;  %v6495_v39 = vld [vmem:[%s7109_s4 + $0x70] sm:$0xff] }
 0x7cf   :  { %v1589_v33 = vpop.xlane.xlu1 %1588  ;;  %v1577_v43 = vpop.xlane.xlu0 %1576  ;;  %5294 = vmatpush3.bf16.msra.mxu1 %v5293_v35 }
 0x7d0   :  { %v1600_v46 = vsub.f32 %v1594_v23, %v1597_v29  ;;  %v1592_v47 = vmul.f32 0.03125, %v1577_v43  ;;  %v1595_v55 = vmul.f32 0.03125, %v1589_v33  ;;  %5295 = vmatprep.subr.bf16.mxu1 %v5762_v3 }
 0x7d2   :  { %v1606_v4 = vadd.f32 1e-05, %v1600_v46  ;;  %v1598_v57 = vmul.f32 %v1592_v47, %v1592_v47  ;;  %v1604_v50 = vsub.f32 %v6340_v25, %v1592_v47 }
 0x7d3   :  { %5297 = vmatpush3.bf16.msra.mxu1 %v5296_v41  ;;  %v5302_v41 = vpack.c.bf16 %v6495_v39, %v6490_v36 }
 0x7d4   :  { %5606 = vrsqrt.f32 %v1606_v4  ;;  %v1601_v52 = vsub.f32 %v1595_v55, %v1598_v57  ;;  %5312 = vmatprep.subr.bf16.mxu1 %v5762_v3 }
 0x7d6   :  { %v1607_v53 = vadd.f32 1e-05, %v1601_v52 }
 0x7d8   :  { %v5605_v61 = vpop.eup %5604  ;;  %5608 = vrsqrt.f32 %v1607_v53 }
 0x7d9   :  { %v1611_v1 = vmul.f32 %v5605_v61, %v1602_v59 }
 0x7db   :  { %v1618_v5 = vmul.f32 %v4383_v63, %v1611_v1 }
 0x7dd   :  { %v1625_v6 = vadd.f32 %v4384_v2, %v1618_v5 }
 0x7de   :  { %v5607_v7 = vpop.eup %5606 }
 0x7df   :  { %v1612_v11 = vmul.f32 %v5607_v7, %v1603_v51  ;;  %4870 = vmatmul.mubr.msk.f32.vlgmr.msra.gmra.mrb[18].mxu0 %vm173_vm1, %v1625_v6 }
 0x7e0   :  { %4872 = vmatprep.mubr.msk.f32.mxu0 %vm5763_vm3, %v5764_v54 }
 0x7e1   :  { %v1619_v49 = vmul.f32 %v4383_v63, %v1612_v11 }
 0x7e2   :  { %v5609_v12 = vpop.eup %5608 }
 0x7e3   :  { %v1613_v40 = vmul.f32 %v5609_v12, %v1604_v50  ;;  %v1626_v14 = vadd.f32 %v4384_v2, %v1619_v49 }
 0x7e5   :  { %v1620_v15 = vmul.f32 %v4383_v63, %v1613_v40  ;;  %4873 = vmatmul.mubr.msk.f32.gmra.mrb[20].mxu0 %vm173_vm1, %v1626_v14 }
 0x7e6   :  { %4875 = vmatprep.mubr.msk.f32.mxu0 %vm5763_vm3, %v5764_v54 }
 0x7e7   :  { %v1627_v19 = vadd.f32 %v4384_v2, %v1620_v15 }
 0x7e9   :  { %4876 = vmatmul.mubr.msk.f32.gmra.mrb[22].mxu0 %vm173_vm1, %v1627_v19  ;;  %v4392_v19 = vld [vmem:[%s7111_s6 + $0xb] ss:$0 sm:$0xff] }
 0x7ea   :  { %4927 = vmatprep.mubr.msk.f32.mxu0 %vm5763_vm3, %v5764_v54 }
 0x8b2   :  { %v1707_v23 = vpop.f32.mrb[18].mxu0 }
 0x8b3   :  { %v1708_v29 = vadd.f32 %v4385_v18, %v1707_v23  ;;  %v4871_v33 = vpop.f32.mrb[19].mxu0 }
 0x8b5   :  { %v4389_v43 = vmul.f32 -1.702, %v1708_v29 }
 0x8b7   :  { %v1727_v46 = vmul.f32 1.442695, %v4389_v43 }
 0x8b8   :  { %v1712_v47 = vpop.f32.mrb[20].mxu0 }
 0x8b9   :  { %5610 = vpow2.f32 %v1727_v46  ;;  %v1713_v4 = vadd.f32 %v4385_v18, %v1712_v47  ;;  %v4874_v55 = vpop.f32.mrb[21].mxu0 }
 0x8bb   :  { %v4390_v57 = vmul.f32 -1.702, %v1713_v4 }
 0x8bc   :  { %v1717_v52 = vpop.f32.mrb[22].mxu0 }
 0x8bd   :  { %v1729_v53 = vmul.f32 1.442695, %v4390_v57  ;;  %v1718_v59 = vadd.f32 %v4385_v18, %v1717_v52  ;;  %v4877_v61 = vpop.f32.mrb[23].mxu0 }
 0x8bf   :  { %5612 = vpow2.f32 %v1729_v53  ;;  %v4391_v63 = vmul.f32 -1.702, %v1718_v59 }
 0x8c1   :  { %v1731_v1 = vmul.f32 1.442695, %v4391_v63 }
 0x8c3   :  { %v5611_v2 = vpop.eup %5610  ;;  %5614 = vpow2.f32 %v1731_v1 }
 0x8c4   :  { %v1733_v5 = vadd.f32 1.0, %v5611_v2 }
 0x8c6   :  { %5616 = vrcp.f32 %v1733_v5 }
 0x8c9   :  { %v5613_v6 = vpop.eup %5612 }
 0x8ca   :  { %v1734_v51 = vadd.f32 1.0, %v5613_v6 }
 0x8cc   :  { %5618 = vrcp.f32 %v1734_v51 }
 0x8cd   :  { %v5615_v7 = vpop.eup %5614 }
 0x8ce   :  { %v1735_v11 = vadd.f32 1.0, %v5615_v7 }
 0x8d0   :  { %v5617_v49 = vpop.eup %5616  ;;  %5620 = vrcp.f32 %v1735_v11 }
 0x8d1   :  { %v1742_v50 = vmul.f32 %v5617_v49, %v1708_v29 }
 0x8d3   :  { %4911 = vmatmul.mubr.f32.vlgmr.msra.gmra.mrb[48].mxu1 %v1742_v50  ;;  %v4417_v50 = vld [vmem:[%s7111_s6 + $0xc] ss:$0 sm:$0xff] }
 0x8d4   :  { %4913 = vmatprep.mubr.msk.f32.mxu1 %vm5763_vm3, %v5764_v54 }
 0x8d6   :  { %v5619_v12 = vpop.eup %5618 }
 0x8d7   :  { %v1743_v40 = vmul.f32 %v5619_v12, %v1713_v4 }
 0x8d9   :  { %4914 = vmatmul.mubr.f32.gmra.mrb[50].mxu1 %v1743_v40  ;;  %v4418_v40 = vld [vmem:[%s7111_s6 + $0xd] ss:$0 sm:$0xff] }
 0x8da   :  { %v5621_v14 = vpop.eup %5620  ;;  %4916 = vmatprep.mubr.msk.f32.mxu1 %vm5763_vm3, %v5764_v54 }
 0x8db   :  { %v1744_v15 = vmul.f32 %v5621_v14, %v1718_v59 }
 0x8dd   :  { %4917 = vmatmul.mubr.f32.gmra.mrb[52].mxu1 %v1744_v15 }
 0x8de   :  { %4972 = vmatprep.mubr.msk.f32.mxu1 %vm5763_vm3, %v5764_v54 }
 0x9a6   :  { %v1815_v20 = vpop.f32.mrb[48].mxu1 }
 0x9a7   :  { %v1816_v22 = vadd.f32 %v4392_v19, %v1815_v20  ;;  %v4912_v30 = vpop.f32.mrb[49].mxu1 }
 0x9a9   :  { %v6451_v24 = vadd.f32 %v1816_v22, %v6327_v48 }
 0x9ab   :  { %v1866_v27 = vsel %vm173_vm1, %v6451_v24, 0.0  ;;  %v1875_v28 = vmul.f32 %v6451_v24, %v6451_v24 }
 0x9ac   :  { %1867 = vadd.xlane.f32.xlu0 %v1866_v27  ;;  %v1820_v38 = vpop.f32.mrb[50].mxu1 }
 0x9ad   :  { %v1821_v37 = vadd.f32 %v4392_v19, %v1820_v38  ;;  %v4915_v60 = vpop.f32.mrb[51].mxu1  ;;  %v1878_v44 = vsel %vm173_vm1, %v1875_v28, 0.0 }
 0x9ae   :  { %1879 = vadd.xlane.f32.xlu1 %v1878_v44 }
 0x9af   :  { %v6459_v42 = vadd.f32 %v1821_v37, %v6334_v17 }
 0x9b0   :  { %v1825_v31 = vpop.f32.mrb[52].mxu1 }
 0x9b1   :  { %v1826_v32 = vadd.f32 %v4392_v19, %v1825_v31  ;;  %v4918_v48 = vpop.f32.mrb[53].mxu1  ;;  %v1869_v13 = vsel %vm173_vm1, %v6459_v42, 0.0  ;;  %v1876_v45 = vmul.f32 %v6459_v42, %v6459_v42 }
 0x9b2   :  { %1870 = vadd.xlane.f32.xlu0 %v1869_v13  ;;  %v4419_v48 = vld [vmem:[%s7111_s6 + $0x10] ss:$0 sm:$0xff] }
 0x9b3   :  { %v6466_v62 = vadd.f32 %v1826_v32, %v6340_v25  ;;  %v1881_v26 = vsel %vm173_vm1, %v1876_v45, 0.0  ;;  %v6482_v25 = vld [vmem:[%s7109_s4 + $0x50] sm:$0xff] }
 0x9b4   :  { %1882 = vadd.xlane.f32.xlu1 %v1881_v26  ;;  %v5299_v35 = vpack.c.bf16 %v6482_v25, %v6477_v0 }
 0x9b5   :  { %v1872_v17 = vsel %vm180_vm2, %v6466_v62, 0.0  ;;  %v1877_v34 = vmul.f32 %v6466_v62, %v6466_v62 }
 0x9b6   :  { %1873 = vadd.xlane.f32.xlu0 %v1872_v17  ;;  %5300 = vmatpush3.bf16.msra.mxu0 %v5299_v35 }
 0x9b7   :  { %v1884_v56 = vsel %vm180_vm2, %v1877_v34, 0.0  ;;  %5301 = vmatprep.subr.bf16.mxu0 %v5762_v3 }
 0x9b8   :  { %1885 = vadd.xlane.f32.xlu1 %v1884_v56 }
 0x9ba   :  { %5303 = vmatpush3.bf16.msra.mxu0 %v5302_v41 }
 0x9bb   :  { %5304 = vmatprep.subr.bf16.mxu0 %v5762_v3 }
 0xa39   :  { %v1868_v18 = vpop.xlane.xlu0 %1867 }
 0xa3a   :  { %v1887_v23 = vmul.f32 0.03125, %v1868_v18 }
 0xa3b   :  { %v1880_v29 = vpop.xlane.xlu1 %1879 }
 0xa3c   :  { %v1893_v33 = vmul.f32 %v1887_v23, %v1887_v23  ;;  %v1890_v43 = vmul.f32 0.03125, %v1880_v29  ;;  %v1899_v11 = vsub.f32 %v6451_v24, %v1887_v23 }
 0xa3e   :  { %v1896_v46 = vsub.f32 %v1890_v43, %v1893_v33 }
 0xa3f   :  { %v1871_v47 = vpop.xlane.xlu0 %1870 }
 0xa40   :  { %v1902_v4 = vadd.f32 1e-05, %v1896_v46  ;;  %v1888_v55 = vmul.f32 0.03125, %v1871_v47 }
 0xa41   :  { %v1883_v57 = vpop.xlane.xlu1 %1882 }
 0xa42   :  { %5622 = vrsqrt.f32 %v1902_v4  ;;  %v1894_v52 = vmul.f32 %v1888_v55, %v1888_v55  ;;  %v1891_v53 = vmul.f32 0.03125, %v1883_v57  ;;  %v1900_v15 = vsub.f32 %v6459_v42, %v1888_v55 }
 0xa43   :  { %v1874_v59 = vpop.xlane.xlu0 %1873 }
 0xa44   :  { %v1897_v61 = vsub.f32 %v1891_v53, %v1894_v52  ;;  %v1889_v63 = vmul.f32 0.03125, %v1874_v59 }
 0xa45   :  { %v1886_v1 = vpop.xlane.xlu1 %1885 }
 0xa46   :  { %v1903_v2 = vadd.f32 1e-05, %v1897_v61  ;;  %v1895_v5 = vmul.f32 %v1889_v63, %v1889_v63  ;;  %v1892_v6 = vmul.f32 0.03125, %v1886_v1  ;;  %v1901_v30 = vsub.f32 %v6466_v62, %v1889_v63 }
 0xa48   :  { %5624 = vrsqrt.f32 %v1903_v2  ;;  %v1898_v51 = vsub.f32 %v1892_v6, %v1895_v5 }
 0xa4a   :  { %v1904_v7 = vadd.f32 1e-05, %v1898_v51 }
 0xa4c   :  { %v5623_v49 = vpop.eup %5622  ;;  %5626 = vrsqrt.f32 %v1904_v7 }
 0xa4d   :  { %v1908_v12 = vmul.f32 %v5623_v49, %v1899_v11 }
 0xa4f   :  { %v1915_v14 = vmul.f32 %v4417_v50, %v1908_v12 }
 0xa51   :  { %v1922_v19 = vadd.f32 %v4418_v40, %v1915_v14 }
 0xa52   :  { %v5625_v20 = vpop.eup %5624 }
 0xa53   :  { %4928 = vmatmul.mubr.msk.f32.vlgmr.msra.gmra.mrb[24].mxu0 %vm173_vm1, %v1922_v19  ;;  %v1909_v22 = vmul.f32 %v5625_v20, %v1900_v15 }
 0xa54   :  { %4930 = vmatprep.mubr.msk.f32.mxu0 %vm5763_vm3, %v5764_v54 }
 0xa55   :  { %v1916_v27 = vmul.f32 %v4417_v50, %v1909_v22 }
 0xa56   :  { %v5627_v28 = vpop.eup %5626 }
 0xa57   :  { %v1923_v38 = vadd.f32 %v4418_v40, %v1916_v27  ;;  %v1910_v37 = vmul.f32 %v5627_v28, %v1901_v30 }
 0xa59   :  { %4931 = vmatmul.mubr.msk.f32.gmra.mrb[26].mxu0 %vm173_vm1, %v1923_v38  ;;  %v1917_v60 = vmul.f32 %v4417_v50, %v1910_v37 }
 0xa5a   :  { %4933 = vmatprep.mubr.msk.f32.mxu0 %vm5763_vm3, %v5764_v54 }
 0xa5b   :  { %v1924_v44 = vadd.f32 %v4418_v40, %v1917_v60 }
 0xa5d   :  { %4934 = vmatmul.mubr.msk.f32.gmra.mrb[28].mxu0 %vm173_vm1, %v1924_v44 }
 0xa5e   :  { %4942 = vmatprep.mubr.msk.f32.mxu0 %vm5763_vm3, %v5764_v54 }
 0xb26   :  { %v2004_v31 = vpop.f32.mrb[24].mxu0 }
 0xb27   :  { %v4929_v32 = vpop.f32.mrb[25].mxu0  ;;  %v2005_v45 = vadd.f32 %v4419_v48, %v2004_v31 }
 0xb29   :  { %v2018_v18 = vmul.f32 0.25, %v2005_v45 }
 0xb2c   :  { %v2009_v13 = vpop.f32.mrb[26].mxu0 }
 0xb2d   :  { %v2010_v26 = vadd.f32 %v4419_v48, %v2009_v13  ;;  %v4932_v17 = vpop.f32.mrb[27].mxu0 }
 0xb2f   :  { %v6521_v34 = vpack.i.bf16 %v2010_v26, %v2005_v45  ;;  %v2019_v29 = vmul.f32 0.25, %v2010_v26 }
 0xb30   :  { %v2014_v56 = vpop.f32.mrb[28].mxu0 }
 0xb31   :  { %v6523_v35 = vadd.f32 %v4419_v48, %v2014_v56  ;;  %5497 = vrot.lane.b32.xlu0 %v6521_v34, %s5765_s28  ;;  %v4935_v41 = vpop.f32.mrb[29].mxu0 }
 0xb33   :  { %2028 = vrot.lane.b32.xlu1 %v6523_v35, %s5765_s28  ;;  %v2020_v23 = vmul.f32 0.25, %v6523_v35 }
 0xb35   :  { %2128 = vrot.lane.b32.xlu0 %v2018_v18, %s5766_s2 }
 0xb37   :  { %5502 = vrot.lane.b32.xlu1 %v6521_v34, %s5767_s29 }
 0xb39   :  { %2132 = vrot.lane.b32.xlu0 %v2020_v23, %s5766_s2 }
 0xb3b   :  { %2138 = vrot.lane.b32.xlu1 %v6523_v35, %s5767_s29 }
 0xb3f   :  { %2130 = vrot.lane.b32.xlu1 %v2019_v29, %s5766_s2 }
 0xb43   :  { %5507 = vrot.lane.b32.xlu1 %v6521_v34, %s5769_s16 }
 0xba3   :  { %v5498_v33 = vpop.permute.xlu0 %5497 }
 0xba4   :  { %v5500_v43 = vunpack.i.h.bf16 %v5498_v33  ;;  %v5499_v46 = vunpack.i.l.bf16 %v5498_v33 }
 0xba5   :  { %v2029_v47 = vpop.permute.xlu1 %2028 }
 0xba6   :  { %v5305_v4 = vpack.c.bf16 %v5500_v43, %v5499_v46 }
 0xba7   :  { %v2129_v6 = vpop.permute.xlu0 %2128 }
 0xba8   :  { %5307 = vmatpush3.bf16.xpose.msk.msra.mxu0 %vm6075_vm5, %v5305_v4 }
 0xba9   :  { %v5503_v55 = vpop.permute.xlu1 %5502  ;;  %4940 = vmatprep.subr.mxu0 %v5764_v54 }
 0xbaa   :  { %v5505_v52 = vunpack.i.h.bf16 %v5503_v55  ;;  %v5504_v53 = vunpack.i.l.bf16 %v5503_v55 }
 0xbab   :  { %v2133_v51 = vpop.permute.xlu0 %2132 }
 0xbac   :  { %v5309_v61 = vpack.c.bf16 %v5505_v52, %v5504_v53 }
 0xbad   :  { %v2139_v57 = vpop.permute.xlu1 %2138 }
 0xbb0   :  { %4941 = vmatpush3.xpose.msk.msra.mxu0 %vm474_vm4, %v2029_v47 }
 0xbb1   :  { %v2131_v59 = vpop.permute.xlu1 %2130  ;;  %5308 = vmatprep.subr.bf16.mxu0 %v5762_v3 }
 0xbb3   :  { %4943 = vmatmul.mubr.msk.f32.vlgmr.msra.gmra.mrb[30].mxu0 %vm474_vm4, %v2018_v18 }
 0xbb4   :  { %5311 = vmatpush3.bf16.xpose.msk.msra.mxu0 %vm6075_vm5, %v5309_v61  ;;  %4945 = vmatprep.mubr.msk.f32.mxu0 %vm5763_vm3, %v5764_v54 }
 0xbb5   :  { %v5508_v63 = vpop.permute.xlu1 %5507  ;;  %4955 = vmatprep.subr.mxu0 %v5764_v54 }
 0xbb6   :  { %v5510_v1 = vunpack.i.h.bf16 %v5508_v63  ;;  %v5509_v2 = vunpack.i.l.bf16 %v5508_v63 }
 0xbb7   :  { %4946 = vmatmul.mubr.msk.f32.gmra.mrb[32].mxu0 %vm474_vm4, %v2019_v29 }
 0xbb8   :  { %v5313_v5 = vpack.c.bf16 %v5510_v1, %v5509_v2  ;;  %4948 = vmatprep.mubr.msk.f32.mxu0 %vm5763_vm3, %v5764_v54 }
 0xbba   :  { %5314 = vmatpush3.bf16.msra.mxu1 %v5313_v5 }
 0xbbb   :  { %4949 = vmatmul.mubr.msk.f32.gmra.mrb[34].mxu0 %vm474_vm4, %v2020_v23  ;;  %4970 = vmatprep.subr.mxu1 %v5764_v54 }
 0xbbc   :  { %4956 = vmatpush3.xpose.msk.msra.mxu0 %vm474_vm4, %v2139_v57  ;;  %4957 = vmatprep.mubr.msk.f32.mxu0 %vm5763_vm3, %v5764_v54 }
 0xbbd   :  { %5315 = vmatprep.subr.bf16.mxu0 %v5762_v3 }
 0xbbf   :  { %4958 = vmatmul.mubr.msk.f32.vlgmr.msra.gmra.mrb[36].mxu0 %vm474_vm4, %v2129_v6 }
 0xbc0   :  { %4960 = vmatprep.mubr.msk.f32.mxu0 %vm5763_vm3, %v5764_v54 }
 0xbc3   :  { %4961 = vmatmul.mubr.msk.f32.gmra.mrb[38].mxu0 %vm474_vm4, %v2131_v59 }
 0xbc4   :  { %4963 = vmatprep.mubr.msk.f32.mxu0 %vm5763_vm3, %v5764_v54 }
 0xbc7   :  { %4964 = vmatmul.mubr.msk.f32.gmra.mrb[40].mxu0 %vm474_vm4, %v2133_v51  ;;  %v5516_v51 = vpack.i.bf16 %v6495_v39, %v6490_v36 }
 0xbc8   :  { %4987 = vmatprep.mubr.msk.f32.mxu0 %vm5763_vm3, %v5764_v54 }
 0xc86   :  { %v2111_v7 = vpop.f32.mrb[30].mxu0 }
 0xc87   :  { %v2125_v11 = vsel %vm253_vm11, %v2111_v7, -1e+30  ;;  %v4944_v49 = vpop.f32.mrb[31].mxu0  ;;  %v5521_v7 = vpack.i.bf16 %v6482_v25, %v6477_v0 }
 0xc88   :  { %v2235_v50 = vsel %vm847_vm13, %v2125_v11, -inf }
 0xc89   :  { %2236 = vmax.xlane.f32.xlu1 %v2235_v50 }
 0xc8a   :  { %v2116_v12 = vpop.f32.mrb[32].mxu0 }
 0xc8b   :  { %v2126_v40 = vsel %vm6158_vm0, %v2116_v12, -1e+30  ;;  %v4947_v14 = vpop.f32.mrb[33].mxu0 }
 0xc8c   :  { %v2238_v15 = vsel %vm847_vm13, %v2126_v40, -inf }
 0xc8d   :  { %2239 = vmax.xlane.f32.xlu0 %v2238_v15 }
 0xc8e   :  { %v2121_v19 = vpop.f32.mrb[34].mxu0 }
 0xc8f   :  { %v4950_v20 = vpop.f32.mrb[35].mxu0  ;;  %v2127_v48 = vsel %vm6172_vm8, %v2121_v19, -1e+30 }
 0xc90   :  { %v2241_v16 = vsel %vm854_vm9, %v2127_v48, -inf }
 0xc92   :  { %v2218_v22 = vpop.f32.mrb[36].mxu0 }
 0xc93   :  { %v2232_v30 = vsel %vm253_vm11, %v2218_v22, -1e+30  ;;  %v4959_v27 = vpop.f32.mrb[37].mxu0  ;;  %vm2964_vm11 = vcmask 1040384  }
 0xc94   :  { %v2244_v28 = vsel %vm847_vm13, %v2232_v30, -inf }
 0xc95   :  { %2245 = vmax.xlane.f32.xlu0 %v2244_v28 }
 0xc96   :  { %v2223_v38 = vpop.f32.mrb[38].mxu0 }
 0xc97   :  { %v2233_v37 = vsel %vm6158_vm0, %v2223_v38, -1e+30  ;;  %v4962_v60 = vpop.f32.mrb[39].mxu0 }
 0xc98   :  { %v2247_v44 = vsel %vm847_vm13, %v2233_v37, -inf }
 0xc99   :  { %2248 = vmax.xlane.f32.xlu0 %v2247_v44 }
 0xc9a   :  { %2299 = vrot.lane.b32.xlu1 %v6523_v35, %s5769_s16  ;;  %v2228_v31 = vpop.f32.mrb[40].mxu0 }
 0xc9b   :  { %v4965_v32 = vpop.f32.mrb[41].mxu0  ;;  %v2234_v13 = vsel %vm6172_vm8, %v2228_v31, -1e+30  ;;  %vm3078_vm8 = vcmp.lt.s32.totalorder %v6135_v9, 8 }
 0xc9c   :  { %v2250_v45 = vsel %vm854_vm9, %v2234_v13, -inf }
 0xc9e   :  { %2401 = vrot.lane.b32.xlu1 %v6523_v35, %s5768_s3 }
 0xcaf   :  { %5512 = vrot.lane.b32.xlu0 %v6521_v34, %s5768_s3 }
 0xcc2   :  { %2242 = vmax.xlane.f32.xlu1 %v2241_v16 }
 0xcce   :  { %2251 = vmax.xlane.f32.xlu0 %v2250_v45 }
 0xd16   :  { %v2237_v26 = vpop.xlane.xlu1 %2236 }
 0xd17   :  { %v2253_v17 = vsub.f32 %v2125_v11, %v2237_v26 }
 0xd19   :  { %v2259_v56 = vmul.f32 1.442695, %v2253_v17 }
 0xd1a   :  { %v2300_v41 = vpop.permute.xlu1 %2299  ;;  %v2240_v35 = vpop.xlane.xlu0 %2239 }
 0xd1b   :  { %5628 = vpow2.f32 %v2259_v56  ;;  %v2254_v18 = vsub.f32 %v2126_v40, %v2240_v35  ;;  %4971 = vmatpush3.msk.msra.mxu1 %vm1086_vm14, %v2300_v41 }
 0xd1c   :  { %5318 = vmatprep.subr.bf16.mxu1 %v5762_v3 }
 0xd1d   :  { %v2261_v34 = vmul.f32 1.442695, %v2254_v18 }
 0xd1e   :  { %v2402_v1 = vpop.permute.xlu1 %2401 }
 0xd1f   :  { %5630 = vpow2.f32 %v2261_v34 }
 0xd22   :  { %v2246_v23 = vpop.xlane.xlu0 %2245 }
 0xd23   :  { %v2256_v29 = vsub.f32 %v2232_v30, %v2246_v23 }
 0xd25   :  { %v5629_v21 = vpop.eup %5628  ;;  %v2265_v33 = vmul.f32 1.442695, %v2256_v29 }
 0xd26   :  { %4973 = vmatmul.mubr.msk.f32.vlgmr.msra.gmra.mrb[54].mxu1 %vm847_vm13, %v5629_v21  ;;  %v2249_v43 = vpop.xlane.xlu0 %2248  ;;  %v2271_v46 = vsel %vm847_vm13, %v5629_v21, 0.0 }
 0xd27   :  { %5632 = vpow2.f32 %v2265_v33  ;;  %v2257_v47 = vsub.f32 %v2233_v37, %v2249_v43  ;;  %2272 = vadd.xlane.f32.xlu0 %v2271_v46  ;;  %4975 = vmatprep.mubr.msk.f32.mxu1 %vm5763_vm3, %v5764_v54 }
 0xd29   :  { %v5631_v4 = vpop.eup %5630  ;;  %v2267_v55 = vmul.f32 1.442695, %v2257_v47 }
 0xd2a   :  { %4976 = vmatmul.mubr.msk.f32.gmra.mrb[56].mxu1 %vm847_vm13, %v5631_v4  ;;  %v5513_v57 = vpop.permute.xlu0 %5512  ;;  %v2274_v52 = vsel %vm847_vm13, %v5631_v4, 0.0 }
 0xd2b   :  { %5634 = vpow2.f32 %v2267_v55  ;;  %v5515_v53 = vunpack.i.h.bf16 %v5513_v57  ;;  %v5514_v59 = vunpack.i.l.bf16 %v5513_v57  ;;  %2275 = vadd.xlane.f32.xlu1 %v2274_v52  ;;  %4978 = vmatprep.mubr.msk.f32.mxu1 %vm5763_vm3, %v5764_v54  ;;  %v6652_v52 = vld [vmem:[%s7111_s6 + $0x11] ss:$0 sm:$0xff] }
 0xd2d   :  { %v5316_v61 = vpack.c.bf16 %v5515_v53, %v5514_v59 }
 0xd2f   :  { %5317 = vmatpush3.bf16.msra.mxu0 %v5316_v61 }
 0xd30   :  { %4985 = vmatprep.subr.mxu0 %v5764_v54 }
 0xd31   :  { %v5633_v63 = vpop.eup %5632 }
 0xd32   :  { %v2280_v2 = vsel %vm847_vm13, %v5633_v63, 0.0 }
 0xd33   :  { %4986 = vmatpush3.msk.msra.mxu0 %vm1086_vm14, %v2402_v1  ;;  %2281 = vadd.xlane.f32.xlu0 %v2280_v2 }
 0xd34   :  { %4988 = vmatmul.mubr.msk.f32.vlgmr.msra.gmra.mrb[42].mxu0 %vm847_vm13, %v5633_v63  ;;  %5321 = vmatprep.subr.bf16.mxu0 %v5762_v3 }
 0xd35   :  { %v5635_v5 = vpop.eup %5634  ;;  %4990 = vmatprep.mubr.msk.f32.mxu0 %vm5763_vm3, %v5764_v54 }
 0xd36   :  { %v2283_v6 = vsel %vm847_vm13, %v5635_v5, 0.0 }
 0xd37   :  { %2284 = vadd.xlane.f32.xlu0 %v2283_v6 }
 0xd38   :  { %4991 = vmatmul.mubr.msk.f32.gmra.mrb[44].mxu0 %vm847_vm13, %v5635_v5 }
 0xd39   :  { %4993 = vmatprep.mubr.msk.f32.mxu0 %vm5763_vm3, %v5764_v54 }
 0xd3c   :  { %5517 = vrot.lane.b32.xlu1 %v5516_v51, %s5770_s17 }
 0xd4d   :  { %5522 = vrot.lane.b32.xlu0 %v5521_v7, %s5770_s17 }
 0xd4f   :  { %v2243_v11 = vpop.xlane.xlu1 %2242 }
 0xd50   :  { %v2255_v49 = vsub.f32 %v2127_v48, %v2243_v11 }
 0xd52   :  { %v2263_v50 = vmul.f32 1.442695, %v2255_v49 }
 0xd54   :  { %5636 = vpow2.f32 %v2263_v50 }
 0xd5b   :  { %v2252_v12 = vpop.xlane.xlu0 %2251 }
 0xd5c   :  { %v2258_v40 = vsub.f32 %v2234_v13, %v2252_v12 }
 0xd5e   :  { %v6619_v14 = vpop.eup %5636  ;;  %v2269_v15 = vmul.f32 1.442695, %v2258_v40 }
 0xd5f   :  { %4979 = vmatmul.mubr.msk.f32.gmra.mrb[58].mxu1 %vm847_vm13, %v6619_v14 }
 0xd60   :  { %5638 = vpow2.f32 %v2269_v15  ;;  %5000 = vmatprep.mubr.msk.f32.mxu1 %vm5763_vm3, %v5764_v54 }
 0xd6a   :  { %v6625_v36 = vpop.eup %5638 }
 0xd6b   :  { %4994 = vmatmul.mubr.msk.f32.gmra.mrb[46].mxu0 %vm847_vm13, %v6625_v36  ;;  %v2286_v15 = vsel %vm854_vm9, %v6625_v36, 0.0  ;;  %v4398_v36 = vld [vmem:[%s7109_s4 + $0x68] sm:$0xff]  ;;  %vm3087_vm13 = vcmp.ge.s32.totalorder %v6135_v9, 8 }
 0xd6c   :  { %5013 = vmatprep.mubr.msk.f32.mxu0 %vm5763_vm3, %v5764_v54  ;;  %vm3092_vm0 = vmand %vm3087_vm13, %vm3090_vm15 }
 0xd6d   :  { %vm3098_vm7 = vmand %vm3092_vm0, %vm3096_vm6 }
 0xdb4   :  { %v2273_v25 = vpop.xlane.xlu0 %2272 }
 0xdb5   :  { %5640 = vrcp.f32 %v2273_v25  ;;  %v4396_v25 = vld [vmem:[%s7109_s4 + $0x58] sm:$0xff] }
 0xdb8   :  { %v2276_v0 = vpop.xlane.xlu1 %2275 }
 0xdb9   :  { %5642 = vrcp.f32 %v2276_v0  ;;  %v4394_v0 = vld [vmem:[%s7109_s4 + $0x48] sm:$0xff] }
 0xdbc   :  { %v5518_v39 = vpop.permute.xlu1 %5517 }
 0xdbd   :  { %v5520_v19 = vunpack.i.h.bf16 %v5518_v39  ;;  %v5519_v20 = vunpack.i.l.bf16 %v5518_v39  ;;  %v5325_v39 = vpack.c.bf16 %v4396_v25, %v4394_v0  ;;  %v4412_v0 = vld [vmem:[%s7110_s5 + $0xd8] sm:$0xff] }
 0xdbf   :  { %v5319_v22 = vpack.c.bf16 %v5520_v19, %v5519_v20  ;;  %v5641_v44 = vpop.eup %5640 }
 0xdc0   :  { %v2282_v30 = vpop.xlane.xlu0 %2281 }
 0xdc1   :  { %5320 = vmatpush3.bf16.msra.mxu1 %v5319_v22  ;;  %5644 = vrcp.f32 %v2282_v30 }
 0xdc2   :  { %5324 = vmatprep.subr.bf16.mxu1 %v5762_v3 }
 0xdc3   :  { %v5643_v16 = vpop.eup %5642 }
 0xdc4   :  { %v2285_v27 = vpop.xlane.xlu0 %2284 }
 0xdc5   :  { %5646 = vrcp.f32 %v2285_v27 }
 0xdc8   :  { %v5523_v28 = vpop.permute.xlu0 %5522 }
 0xdc9   :  { %v5525_v38 = vunpack.i.h.bf16 %v5523_v28  ;;  %v5524_v37 = vunpack.i.l.bf16 %v5523_v28 }
 0xdcb   :  { %v5322_v60 = vpack.c.bf16 %v5525_v38, %v5524_v37  ;;  %v5645_v17 = vpop.eup %5644 }
 0xdcd   :  { %5323 = vmatpush3.bf16.msra.mxu0 %v5322_v60 }
 0xdce   :  { %5330 = vmatprep.subr.bf16.mxu0 %v5762_v3 }
 0xdcf   :  { %v5647_v18 = vpop.eup %5646 }
 0xdf9   :  { %v2380_v31 = vpop.f32.mrb[54].mxu1 }
 0xdfa   :  { %v2394_v32 = vmul.f32 %v5641_v44, %v2380_v31  ;;  %v4974_v48 = vpop.f32.mrb[55].mxu1 }
 0xdfc   :  { %5014 = vmatmul.mubr.msk.f32.vlgmr.msra.gmra.mrb[48].mxu0 %vm474_vm4, %v2394_v32 }
 0xdfd   :  { %v2385_v13 = vpop.f32.mrb[56].mxu1  ;;  %5016 = vmatprep.mubr.msk.f32.mxu0 %vm5763_vm3, %v5764_v54 }
 0xdfe   :  { %v2395_v45 = vmul.f32 %v5643_v16, %v2385_v13  ;;  %v4977_v26 = vpop.f32.mrb[57].mxu1 }
 0xe00   :  { %5017 = vmatmul.mubr.msk.f32.gmra.mrb[50].mxu0 %vm474_vm4, %v2395_v45 }
 0xe01   :  { %5019 = vmatprep.mubr.msk.f32.mxu0 %vm5763_vm3, %v5764_v54 }
 0xe07   :  { %v2482_v56 = vpop.f32.mrb[42].mxu0 }
 0xe08   :  { %v2496_v41 = vmul.f32 %v5645_v17, %v2482_v56  ;;  %v4989_v35 = vpop.f32.mrb[43].mxu0 }
 0xe0a   :  { %5001 = vmatmul.mubr.msk.f32.vlgmr.msra.gmra.mrb[60].mxu1 %vm474_vm4, %v2496_v41  ;;  %v6694_v41 = vld [vmem:[%s7111_s6 + $0xe] ss:$0 sm:$0xff] }
 0xe0b   :  { %v2487_v34 = vpop.f32.mrb[44].mxu0  ;;  %5003 = vmatprep.mubr.msk.f32.mxu1 %vm5763_vm3, %v5764_v54  ;;  %5326 = vmatpush3.bf16.msra.mxu1 %v5325_v39  ;;  %v4413_v39 = vld [vmem:[%s7110_s5 + $0xe0] sm:$0xff] }
 0xe0c   :  { %v2497_v23 = vmul.f32 %v5647_v18, %v2487_v34  ;;  %v4992_v29 = vpop.f32.mrb[45].mxu0  ;;  %5327 = vmatprep.subr.bf16.mxu1 %v5762_v3 }
 0xe0d   :  { %v6700_v29 = vld [vmem:[%s7111_s6 + $0xf] ss:$0 sm:$0xff] }
 0xe0e   :  { %5004 = vmatmul.mubr.msk.f32.gmra.mrb[62].mxu1 %vm474_vm4, %v2497_v23 }
 0xe0f   :  { %5006 = vmatprep.mubr.msk.f32.mxu1 %vm5763_vm3, %v5764_v54 }
 0xe32   :  { %v6645_v21 = vpop.f32.mrb[58].mxu1 }
 0xe33   :  { %v4980_v33 = vpop.f32.mrb[59].mxu1 }
 0xe3e   :  { %v6647_v43 = vpop.f32.mrb[46].mxu0 }
 0xe3f   :  { %v4995_v46 = vpop.f32.mrb[47].mxu0 }
 0xecf   :  { %v2679_v47 = vpop.f32.mrb[48].mxu0 }
 0xed0   :  { %v5015_v4 = vpop.f32.mrb[49].mxu0 }
 0xed3   :  { %v2684_v55 = vpop.f32.mrb[50].mxu0 }
 0xed4   :  { %v5018_v57 = vpop.f32.mrb[51].mxu0 }
 0xedd   :  { %v2582_v53 = vpop.f32.mrb[60].mxu1 }
 0xede   :  { %v2680_v59 = vadd.f32 %v2679_v47, %v2582_v53  ;;  %v5002_v61 = vpop.f32.mrb[61].mxu1  ;;  %v4401_v53 = vld [vmem:[%s7110_s5 + $0x80] sm:$0xff] }
 0xee0   :  { %v2697_v63 = vadd.f32 %v6652_v52, %v2680_v59  ;;  %v4402_v59 = vld [vmem:[%s7110_s5 + $0x88] sm:$0xff] }
 0xee1   :  { %v2587_v1 = vpop.f32.mrb[62].mxu1  ;;  %v5331_v61 = vpack.c.bf16 %v4402_v59, %v4401_v53 }
 0xee2   :  { %v6656_v2 = vadd.f32 %v2697_v63, %v6451_v24  ;;  %v2685_v5 = vadd.f32 %v2684_v55, %v2587_v1  ;;  %v5005_v6 = vpop.f32.mrb[63].mxu1  ;;  %v4403_v63 = vld [vmem:[%s7110_s5 + $0x90] sm:$0xff]  ;;  %v4404_v1 = vld [vmem:[%s7110_s5 + $0x98] sm:$0xff] }
 0xee3   :  { %5332 = vmatpush3.bf16.msra.mxu0 %v5331_v61  ;;  %v4405_v6 = vld [vmem:[%s7110_s5 + $0xa0] sm:$0xff] }
 0xee4   :  { %v2698_v51 = vadd.f32 %v6652_v52, %v2685_v5  ;;  %v2703_v7 = vsel %vm173_vm1, %v6656_v2, 0.0  ;;  %v2712_v11 = vmul.f32 %v6656_v2, %v6656_v2  ;;  %5333 = vmatprep.subr.bf16.mxu0 %v5762_v3  ;;  %v5334_v5 = vpack.c.bf16 %v4404_v1, %v4403_v63 }
 0xee5   :  { %2704 = vadd.xlane.f32.xlu1 %v2703_v7 }
 0xee6   :  { %v6664_v49 = vadd.f32 %v2698_v51, %v6459_v42  ;;  %v2715_v50 = vsel %vm173_vm1, %v2712_v11, 0.0  ;;  %v2277_v42 = vsel %vm854_vm9, %v6619_v14, 0.0  ;;  %v4400_v14 = vld [vmem:[%s7109_s4 + $0x78] sm:$0xff]  ;;  %v4406_v51 = vld [vmem:[%s7110_s5 + $0xa8] sm:$0xff]  ;;  %v4407_v11 = vld [vmem:[%s7110_s5 + $0xb0] sm:$0xff]  ;;  %vm3095_vm9 = vcmp.le.s32.totalorder %v6135_v9, %v6133_v8 }
 0xee7   :  { %2716 = vadd.xlane.f32.xlu0 %v2715_v50  ;;  %v5328_v19 = vpack.c.bf16 %v4400_v14, %v4398_v36  ;;  %5335 = vmatpush3.bf16.msra.mxu0 %v5334_v5  ;;  %v5337_v7 = vpack.c.bf16 %v4406_v51, %v4405_v6  ;;  %v4408_v50 = vld [vmem:[%s7110_s5 + $0xb8] sm:$0xff]  ;;  %v4414_v36 = vld [vmem:[%s7110_s5 + $0xe8] sm:$0xff] }
 0xee8   :  { %v2706_v24 = vsel %vm173_vm1, %v6664_v49, 0.0  ;;  %v2713_v12 = vmul.f32 %v6664_v49, %v6664_v49  ;;  %5336 = vmatprep.subr.bf16.mxu0 %v5762_v3  ;;  %v5349_v14 = vpack.c.bf16 %v4414_v36, %v4413_v39  ;;  %v6806_v36 = vld [vmem:[%s7113_s8] sm:$0xff] }
 0xee9   :  { %2707 = vadd.xlane.f32.xlu1 %v2706_v24  ;;  %5329 = vmatpush3.bf16.msra.mxu1 %v5328_v19  ;;  %v5340_v24 = vpack.c.bf16 %v4408_v50, %v4407_v11  ;;  %v4415_v19 = vld [vmem:[%s7110_s5 + $0xf0] sm:$0xff] }
 0xeea   :  { %v2718_v40 = vsel %vm173_vm1, %v2713_v12, 0.0  ;;  %5354 = vmatprep.subr.bf16.mxu1 %v5762_v3  ;;  %v4409_v12 = vld [vmem:[%s7110_s5 + $0xc0] sm:$0xff] }
 0xeeb   :  { %2719 = vadd.xlane.f32.xlu0 %v2718_v40  ;;  %5338 = vmatpush3.bf16.msra.mxu0 %v5337_v7  ;;  %v4410_v40 = vld [vmem:[%s7110_s5 + $0xc8] sm:$0xff] }
 0xeec   :  { %5339 = vmatprep.subr.bf16.mxu0 %v5762_v3 }
 0xeed   :  { %2287 = vadd.xlane.f32.xlu1 %v2286_v15  ;;  %v5343_v15 = vpack.c.bf16 %v4410_v40, %v4409_v12 }
 0xeef   :  { %2278 = vadd.xlane.f32.xlu0 %v2277_v42  ;;  %5341 = vmatpush3.bf16.msra.mxu0 %v5340_v24  ;;  %v4411_v42 = vld [vmem:[%s7110_s5 + $0xd0] sm:$0xff] }
 0xef0   :  { %5342 = vmatprep.subr.bf16.mxu0 %v5762_v3  ;;  %v5346_v25 = vpack.c.bf16 %v4412_v0, %v4411_v42  ;;  %v4459_v24 = vld [vmem:[%s7111_s6 + $0x13] ss:$0 sm:$0xff] }
 0xef3   :  { %5344 = vmatpush3.bf16.msra.mxu0 %v5343_v15 }
 0xef4   :  { %5345 = vmatprep.subr.bf16.mxu0 %v5762_v3 }
 0xef7   :  { %5347 = vmatpush3.bf16.msra.mxu0 %v5346_v25 }
 0xef8   :  { %5348 = vmatprep.subr.bf16.mxu0 %v5762_v3 }
 0xefb   :  { %5350 = vmatpush3.bf16.msra.mxu0 %v5349_v14 }
 0xefc   :  { %5351 = vmatprep.subr.bf16.mxu0 %v5762_v3 }
 0xf72   :  { %v2705_v20 = vpop.xlane.xlu1 %2704 }
 0xf73   :  { %v2724_v22 = vmul.f32 0.03125, %v2705_v20  ;;  %v4416_v20 = vld [vmem:[%s7110_s5 + $0xf8] sm:$0xff] }
 0xf74   :  { %v2717_v30 = vpop.xlane.xlu0 %2716 }
 0xf75   :  { %v2730_v27 = vmul.f32 %v2724_v22, %v2724_v22  ;;  %v2727_v28 = vmul.f32 0.03125, %v2717_v30  ;;  %v2736_v17 = vsub.f32 %v6656_v2, %v2724_v22  ;;  %v5352_v22 = vpack.c.bf16 %v4416_v20, %v4415_v19 }
 0xf76   :  { %v2708_v38 = vpop.xlane.xlu1 %2707  ;;  %v3131_v20 = vsel %vm173_vm1, %v6806_v36, 0.0 }
 0xf77   :  { %v2733_v37 = vsub.f32 %v2727_v28, %v2730_v27  ;;  %v2725_v60 = vmul.f32 0.03125, %v2708_v38  ;;  %5353 = vmatpush3.bf16.msra.mxu0 %v5352_v22  ;;  %v3137_v22 = vmul.f32 %v6806_v36, %v6806_v36 }
 0xf78   :  { %v2720_v44 = vpop.xlane.xlu0 %2719 }
 0xf79   :  { %v2739_v31 = vadd.f32 1e-05, %v2733_v37  ;;  %v2731_v32 = vmul.f32 %v2725_v60, %v2725_v60  ;;  %v2728_v48 = vmul.f32 0.03125, %v2720_v44  ;;  %v2737_v46 = vsub.f32 %v6664_v49, %v2725_v60  ;;  %v6778_v60 = vld [vmem:[%s7111_s6 + $0x12] ss:$0 sm:$0xff] }
 0xf7a   :  { %v2288_v16 = vpop.xlane.xlu1 %2287 }
 0xf7b   :  { %5648 = vrsqrt.f32 %v2739_v31  ;;  %v2734_v13 = vsub.f32 %v2728_v48, %v2731_v32 }
 0xf7c   :  { %5650 = vrcp.f32 %v2288_v16  ;;  %v2279_v45 = vpop.xlane.xlu0 %2278 }
 0xf7d   :  { %v2740_v26 = vadd.f32 1e-05, %v2734_v13  ;;  %5652 = vrcp.f32 %v2279_v45 }
 0xf7f   :  { %5654 = vrsqrt.f32 %v2740_v26 }
 0xf85   :  { %v5649_v56 = vpop.eup %5648 }
 0xf86   :  { %v5651_v35 = vpop.eup %5650  ;;  %v2745_v18 = vmul.f32 %v5649_v56, %v2736_v17 }
 0xf87   :  { %v5653_v34 = vpop.eup %5652  ;;  %v2498_v23 = vmul.f32 %v5651_v35, %v6647_v43 }
 0xf88   :  { %v2752_v33 = vmul.f32 %v6694_v41, %v2745_v18  ;;  %v2396_v47 = vmul.f32 %v5653_v34, %v6645_v21 }
 0xf89   :  { %v5655_v4 = vpop.eup %5654  ;;  %5007 = vmatmul.mubr.msk.f32.gmra.mrb[64].mxu1 %vm474_vm4, %v2498_v23 }
 0xf8a   :  { %5020 = vmatmul.mubr.msk.f32.gmra.mrb[52].mxu0 %vm474_vm4, %v2396_v47  ;;  %5030 = vmatprep.mubr.msk.f32.mxu1 %vm5763_vm3, %v5764_v54  ;;  %v2759_v43 = vadd.f32 %v6700_v29, %v2752_v33  ;;  %v2746_v55 = vmul.f32 %v5655_v4, %v2737_v46 }
 0xf8b   :  { %5071 = vmatprep.mubr.msk.f32.mxu0 %vm5763_vm3, %v5764_v54 }
 0xf8c   :  { %v2753_v57 = vmul.f32 %v6694_v41, %v2746_v55 }
 0xf8d   :  { %5031 = vmatmul.mubr.msk.f32.vlgmr.msra.gmra.mrb[66].mxu1 %vm173_vm1, %v2759_v43 }
 0xf8e   :  { %5033 = vmatprep.mubr.msk.f32.mxu1 %vm5763_vm3, %v5764_v54  ;;  %v2760_v21 = vadd.f32 %v6700_v29, %v2753_v57 }
 0xf91   :  { %5034 = vmatmul.mubr.msk.f32.gmra.mrb[68].mxu1 %vm173_vm1, %v2760_v21 }
 0xf92   :  { %5036 = vmatprep.mubr.msk.f32.mxu1 %vm5763_vm3, %v5764_v54 }
0x105c   :  { %v2592_v30 = vpop.f32.mrb[64].mxu1 }
0x105d   :  { %v5008_v27 = vpop.f32.mrb[65].mxu1  ;;  %v2689_v28 = vpop.f32.mrb[52].mxu0 }
0x105e   :  { %v2690_v38 = vadd.f32 %v2689_v28, %v2592_v30  ;;  %v5021_v37 = vpop.f32.mrb[53].mxu0  ;;  %v3139_v28 = vsel %vm173_vm1, %v3137_v22, 0.0 }
0x105f   :  { %v2993_v37 = vld [vmem:[%s7112_s7] sm:$0xff] }
0x1060   :  { %v2699_v44 = vadd.f32 %v6652_v52, %v2690_v38  ;;  %v2841_v31 = vpop.f32.mrb[66].mxu1 }
0x1061   :  { %v2842_v32 = vadd.f32 %v6778_v60, %v2841_v31  ;;  %v5032_v48 = vpop.f32.mrb[67].mxu1 }
0x1062   :  { %v2702_v16 = vadd.f32 %v2699_v44, %v6466_v62  ;;  %v2994_v44 = vld [vmem:[%s7112_s7 + $0x8] sm:$0xff]  ;;  %v2996_v48 = vld [vmem:[%s7112_s7 + $0x18] sm:$0xff] }
0x1063   :  { %v4456_v13 = vmul.f32 -1.702, %v2842_v32  ;;  %v5355_v31 = vpack.c.bf16 %v2994_v44, %v2993_v37  ;;  %v4464_v44 = vld [vmem:[%s7116_s11 + $0x4] ss:$0 sm:$0xff] }
0x1064   :  { %v2846_v45 = vpop.f32.mrb[68].mxu1  ;;  %v2709_v26 = vsel %vm180_vm2, %v2702_v16, 0.0  ;;  %v2714_v17 = vmul.f32 %v2702_v16, %v2702_v16 }
0x1065   :  { %v2861_v56 = vmul.f32 1.442695, %v4456_v13  ;;  %v2847_v35 = vadd.f32 %v6778_v60, %v2846_v45  ;;  %v5035_v18 = vpop.f32.mrb[69].mxu1  ;;  %2710 = vadd.xlane.f32.xlu1 %v2709_v26  ;;  %5356 = vmatpush3.bf16.msra.mxu1 %v5355_v31  ;;  %v6844_v13 = vld [vmem:[%s7114_s9] sm:$0xff]  ;;  %v6849_v45 = vld [vmem:[%s7114_s9 + $0x10] sm:$0xff] }
0x1066   :  { %v2721_v34 = vsel %vm180_vm2, %v2714_v17, 0.0  ;;  %5357 = vmatprep.subr.bf16.mxu1 %v5762_v3  ;;  %v5360_v26 = vpack.c.bf16 %v6849_v45, %v6844_v13  ;;  %v5551_v17 = vpack.i.bf16 %v6849_v45, %v6844_v13 }
0x1067   :  { %5656 = vpow2.f32 %v2861_v56  ;;  %v4457_v52 = vmul.f32 -1.702, %v2847_v35  ;;  %2722 = vadd.xlane.f32.xlu0 %v2721_v34  ;;  %v6858_v56 = vld [vmem:[%s7114_s9 + $0x20] sm:$0xff] }
0x1069   :  { %v2863_v23 = vmul.f32 1.442695, %v4457_v52 }
0x106b   :  { %5658 = vpow2.f32 %v2863_v23 }
0x1071   :  { %v5657_v33 = vpop.eup %5656 }
0x1072   :  { %v2867_v46 = vadd.f32 1.0, %v5657_v33 }
0x1074   :  { %5660 = vrcp.f32 %v2867_v46 }
0x1075   :  { %v5659_v62 = vpop.eup %5658 }
0x1076   :  { %v2868_v47 = vadd.f32 1.0, %v5659_v62 }
0x1078   :  { %5662 = vrcp.f32 %v2868_v47 }
0x107e   :  { %v5661_v4 = vpop.eup %5660 }
0x107f   :  { %v2876_v43 = vmul.f32 %v5661_v4, %v2842_v32  ;;  %v2995_v32 = vld [vmem:[%s7112_s7 + $0x10] sm:$0xff] }
0x1081   :  { %5072 = vmatmul.mubr.f32.vlgmr.msra.gmra.mrb[54].mxu0 %v2876_v43 }
0x1082   :  { %v5663_v55 = vpop.eup %5662  ;;  %5074 = vmatprep.mubr.msk.f32.mxu0 %vm5763_vm3, %v5764_v54 }
0x1083   :  { %v2877_v57 = vmul.f32 %v5663_v55, %v2847_v35  ;;  %v6863_v35 = vld [vmem:[%s7114_s9 + $0x30] sm:$0xff] }
0x1084   :  { %v5546_v18 = vpack.i.bf16 %v6863_v35, %v6858_v56 }
0x1085   :  { %5075 = vmatmul.mubr.f32.gmra.mrb[56].mxu0 %v2877_v57 }
0x1086   :  { %5077 = vmatprep.mubr.msk.f32.mxu0 %vm5763_vm3, %v5764_v54 }
0x10f2   :  { %v2711_v21 = vpop.xlane.xlu1 %2710 }
0x10f3   :  { %v2726_v53 = vmul.f32 0.03125, %v2711_v21 }
0x10f4   :  { %v2723_v59 = vpop.xlane.xlu0 %2722 }
0x10f5   :  { %v2732_v61 = vmul.f32 %v2726_v53, %v2726_v53  ;;  %v2729_v63 = vmul.f32 0.03125, %v2723_v59  ;;  %v2738_v6 = vsub.f32 %v2702_v16, %v2726_v53  ;;  %v5358_v16 = vpack.c.bf16 %v2996_v48, %v2995_v32 }
0x10f7   :  { %v2735_v1 = vsub.f32 %v2729_v63, %v2732_v61  ;;  %5359 = vmatpush3.bf16.msra.mxu1 %v5358_v16 }
0x10f8   :  { %5361 = vmatprep.subr.bf16.mxu1 %v5360_v26 }
0x10f9   :  { %v2741_v5 = vadd.f32 1e-05, %v2735_v1 }
0x10fb   :  { %5664 = vrsqrt.f32 %v2741_v5 }
0x1105   :  { %v5665_v51 = vpop.eup %5664 }
0x1106   :  { %v2747_v7 = vmul.f32 %v5665_v51, %v2738_v6 }
0x1108   :  { %v2754_v11 = vmul.f32 %v6694_v41, %v2747_v7 }
0x110a   :  { %v2761_v50 = vadd.f32 %v6700_v29, %v2754_v11 }
0x110c   :  { %5037 = vmatmul.mubr.msk.f32.gmra.mrb[70].mxu1 %vm173_vm1, %v2761_v50 }
0x110d   :  { %5088 = vmatprep.mubr.msk.f32.mxu1 %vm5763_vm3, %v5764_v54 }
0x1154   :  { %v2949_v12 = vpop.f32.mrb[54].mxu0 }
0x1155   :  { %v5073_v40 = vpop.f32.mrb[55].mxu0  ;;  %v2950_v15 = vadd.f32 %v4459_v24, %v2949_v12 }
0x1157   :  { %v2962_v41 = vadd.f32 %v2950_v15, %v6656_v2  ;;  %v6815_v2 = vld [vmem:[%s7113_s8 + $0x8] sm:$0xff] }
0x1158   :  { %v2954_v42 = vpop.f32.mrb[56].mxu0  ;;  %v3134_v30 = vsel %vm173_vm1, %v6815_v2, 0.0  ;;  %v3138_v27 = vmul.f32 %v6815_v2, %v6815_v2 }
0x1159   :  { %v2955_v0 = vadd.f32 %v4459_v24, %v2954_v42  ;;  %v5076_v25 = vpop.f32.mrb[57].mxu0 }
0x115a   :  { %v3142_v38 = vsel %vm173_vm1, %v3138_v27, 0.0 }
0x115b   :  { %v2963_v29 = vadd.f32 %v2955_v0, %v6664_v49 }
0x115d   :  { %v6801_v39 = vsel %vm2964_vm11, %v2962_v41, %v2963_v29  ;;  %v4460_v29 = vld [vmem:[%s7111_s6 + $0x2] ss:$0 sm:$0xff] }
0x115e   :  { %v2968_v14 = vsel %vm180_vm2, %v6801_v39, 0.0  ;;  %v2971_v19 = vmul.f32 %v6801_v39, %v6801_v39 }
0x115f   :  { %2969 = vadd.xlane.f32.xlu1 %v2968_v14 }
0x1160   :  { %v2972_v49 = vsel %vm180_vm2, %v2971_v19, 0.0  ;;  %v4461_v19 = vld [vmem:[%s7111_s6 + $0x3] ss:$0 sm:$0xff] }
0x1161   :  { %2973 = vadd.xlane.f32.xlu0 %v2972_v49 }
0x1163   :  { %3132 = vadd.xlane.f32.xlu1 %v3131_v20 }
0x1165   :  { %3135 = vadd.xlane.f32.xlu0 %v3134_v30  ;;  %v5364_v30 = vpack.c.bf16 %v6863_v35, %v6858_v56 }
0x1167   :  { %3140 = vadd.xlane.f32.xlu1 %v3139_v28 }
0x1169   :  { %3143 = vadd.xlane.f32.xlu0 %v3142_v38 }
0x11df   :  { %v2851_v34 = vpop.f32.mrb[70].mxu1 }
0x11e0   :  { %v2852_v52 = vadd.f32 %v6778_v60, %v2851_v34  ;;  %v5038_v23 = vpop.f32.mrb[71].mxu1 }
0x11e2   :  { %v4458_v33 = vmul.f32 -1.702, %v2852_v52 }
0x11e4   :  { %v2865_v46 = vmul.f32 1.442695, %v4458_v33 }
0x11e6   :  { %5666 = vpow2.f32 %v2865_v46  ;;  %v4465_v46 = vld [vmem:[%s7116_s11 + $0x7] ss:$0 sm:$0xff] }
0x11ec   :  { %v2970_v62 = vpop.xlane.xlu1 %2969 }
0x11ed   :  { %v2975_v47 = vmul.f32 0.03125, %v2970_v62 }
0x11ee   :  { %v2974_v4 = vpop.xlane.xlu0 %2973 }
0x11ef   :  { %v2977_v43 = vmul.f32 %v2975_v47, %v2975_v47  ;;  %v2976_v55 = vmul.f32 0.03125, %v2974_v4  ;;  %v2979_v25 = vsub.f32 %v6801_v39, %v2975_v47  ;;  %v4463_v39 = vld [vmem:[%s7116_s11 + $0x3] ss:$0 sm:$0xff] }
0x11f0   :  { %v5667_v57 = vpop.eup %5666  ;;  %v3133_v21 = vpop.xlane.xlu1 %3132 }
0x11f1   :  { %v2869_v53 = vadd.f32 1.0, %v5667_v57  ;;  %v2978_v59 = vsub.f32 %v2976_v55, %v2977_v43  ;;  %v3145_v61 = vmul.f32 0.03125, %v3133_v21 }
0x11f2   :  { %v3136_v63 = vpop.xlane.xlu0 %3135 }
0x11f3   :  { %5668 = vrcp.f32 %v2869_v53  ;;  %v2980_v1 = vadd.f32 1e-05, %v2978_v59  ;;  %v3149_v5 = vmul.f32 %v3145_v61, %v3145_v61  ;;  %v3146_v6 = vmul.f32 0.03125, %v3136_v63 }
0x11f4   :  { %v3141_v60 = vpop.xlane.xlu1 %3140  ;;  %v3153_v20 = vsub.f32 %v6806_v36, %v3145_v61 }
0x11f5   :  { %5670 = vrsqrt.f32 %v2980_v1  ;;  %v3147_v51 = vmul.f32 0.03125, %v3141_v60  ;;  %v3150_v11 = vmul.f32 %v3146_v6, %v3146_v6  ;;  %v3154_v28 = vsub.f32 %v6815_v2, %v3146_v6 }
0x11f6   :  { %v3144_v7 = vpop.xlane.xlu0 %3143 }
0x11f7   :  { %v3151_v50 = vsub.f32 %v3147_v51, %v3149_v5  ;;  %v3148_v24 = vmul.f32 0.03125, %v3144_v7 }
0x11f9   :  { %v3155_v12 = vadd.f32 1e-05, %v3151_v50  ;;  %v3152_v40 = vsub.f32 %v3148_v24, %v3150_v11 }
0x11fb   :  { %5672 = vrsqrt.f32 %v3155_v12  ;;  %v3156_v15 = vadd.f32 1e-05, %v3152_v40 }
0x11fd   :  { %v5669_v42 = vpop.eup %5668  ;;  %5674 = vrsqrt.f32 %v3156_v15 }
0x11fe   :  { %v2878_v0 = vmul.f32 %v5669_v42, %v2852_v52 }
0x11ff   :  { %v5671_v41 = vpop.eup %5670 }
0x1200   :  { %v2982_v14 = vmul.f32 %v5671_v41, %v2979_v25  ;;  %5078 = vmatmul.mubr.f32.gmra.mrb[58].mxu0 %v2878_v0 }
0x1202   :  { %v2987_v49 = vmul.f32 %v4460_v29, %v2982_v14 }
0x1204   :  { %v2992_v22 = vadd.f32 %v4461_v19, %v2987_v49 }
0x1205   :  { %v5673_v27 = vpop.eup %5672 }
0x1206   :  { %5089 = vmatmul.mubr.msk.f32.vlgmr.msra.gmra.mrb[72].mxu1 %vm173_vm1, %v2992_v22  ;;  %v3159_v38 = vmul.f32 %v5673_v27, %v3153_v20 }
0x1207   :  { %v5675_v37 = vpop.eup %5674  ;;  %5363 = vmatpush3.bf16.msra.mxu1 %v5360_v26 }
0x1208   :  { %5365 = vmatprep.subr.bf16.mxu1 %v5364_v30  ;;  %v3160_v31 = vmul.f32 %v5675_v37, %v3154_v28  ;;  %v3165_v32 = vmul.f32 %v4463_v39, %v3159_v38 }
0x120a   :  { %v3166_v48 = vmul.f32 %v4463_v39, %v3160_v31  ;;  %v3171_v16 = vadd.f32 %v4464_v44, %v3165_v32 }
0x120b   :  { %5367 = vmatpush3.bf16.msra.mxu1 %v5364_v30 }
0x120c   :  { %v3172_v34 = vadd.f32 %v4464_v44, %v3166_v48  ;;  %5099 = vmatprep.mubr.msk.f32.mxu1 %vm173_vm1, %v3171_v16 }
0x120e   :  { %5100 = vmatmul.mubr.msk.f32.vlgmr.msra.gmra.mrb[74].mxu1 %vm173_vm1, %v3172_v34 }
0x12d3   :  { %v2959_v52 = vpop.f32.mrb[58].mxu0 }
0x12d4   :  { %v5079_v23 = vpop.f32.mrb[59].mxu0 }
0x12d9   :  { %v6888_v33 = vpop.f32.mrb[72].mxu1 }
0x12da   :  { %v5090_v26 = vpop.f32.mrb[73].mxu1 }
0x12e1   :  { %v5101_v62 = vpop.f32.mrb[74].mxu1 }
0x12e2   :  { %v3255_v47 = vadd.f32 %v5101_v62, %v4465_v46  ;;  %v3249_v4 = vpop.f32.mrb[75].mxu1 }
0x12e3   :  { %v3250_v43 = vadd.f32 %v4465_v46, %v3249_v4 }
0x12e4   :  { %v3259_v21 = vmul.f32 0.25, %v3255_v47 }
0x12e5   :  { %v5531_v55 = vpack.i.bf16 %v3255_v47, %v3250_v43  ;;  %v3258_v57 = vmul.f32 0.25, %v3250_v43 }
0x12e7   :  { %5532 = vrot.lane.b32.xlu0 %v5531_v55, %s5767_s29  ;;  %5527 = vrot.lane.b32.xlu1 %v5531_v55, %s5765_s28 }
0x12e8   :  { %5106 = vmatprep.mubr.msk.f32.mxu1 %vm474_vm4, %v3258_v57 }
0x12eb   :  { %3353 = vrot.lane.b32.xlu1 %v3258_v57, %s5766_s2 }
0x12ef   :  { %3355 = vrot.lane.b32.xlu1 %v3259_v21, %s5766_s2 }
0x1359   :  { %v5533_v53 = vpop.permute.xlu0 %5532  ;;  %v5528_v59 = vpop.permute.xlu1 %5527 }
0x135a   :  { %v5535_v61 = vunpack.i.h.bf16 %v5533_v53  ;;  %v5534_v63 = vunpack.i.l.bf16 %v5533_v53  ;;  %v5530_v1 = vunpack.i.h.bf16 %v5528_v59  ;;  %v5529_v5 = vunpack.i.l.bf16 %v5528_v59 }
0x135c   :  { %v5368_v6 = vpack.c.bf16 %v5530_v1, %v5529_v5  ;;  %v5374_v60 = vpack.c.bf16 %v5535_v61, %v5534_v63 }
0x135d   :  { %v3354_v51 = vpop.permute.xlu1 %3353 }
0x135e   :  { %5370 = vmatprep.subr.msk.bf16.mxu1 %vm6075_vm5, %v5368_v6 }
0x135f   :  { %5373 = vmatpush3.bf16.xpose.msk.msra.mxu1 %vm6075_vm5, %v5368_v6 }
0x1360   :  { %5376 = vmatprep.subr.msk.bf16.mxu1 %vm6075_vm5, %v5374_v60 }
0x1361   :  { %v3356_v7 = vpop.permute.xlu1 %3355 }
0x1366   :  { %5107 = vmatmul.mubr.msk.f32.vlgmr.msra.gmra.mrb[76].mxu1 %vm474_vm4, %v3259_v21 }
0x1367   :  { %5379 = vmatpush3.bf16.xpose.msk.msra.mxu1 %vm6075_vm5, %v5374_v60  ;;  %5113 = vmatprep.mubr.msk.f32.mxu1 %vm474_vm4, %v3354_v51  ;;  %vm3097_vm5 = vmand %vm3078_vm8, %vm3095_vm9 }
0x136e   :  { %5114 = vmatmul.mubr.msk.f32.vlgmr.msra.gmra.mrb[78].mxu1 %vm474_vm4, %v3356_v7 }
0x1439   :  { %v5108_v58 = vpop.f32.mrb[76].mxu1 }
0x143a   :  { %v3352_v11 = vsel %vm3098_vm7, %v5108_v58, -1e+30  ;;  %v3342_v50 = vpop.f32.mrb[77].mxu1 }
0x143b   :  { %v3449_v24 = vsel %vm474_vm4, %v3352_v11, -inf  ;;  %v3351_v12 = vsel %vm3097_vm5, %v3342_v50, -1e+30 }
0x143c   :  { %3450 = vmax.xlane.f32.xlu0 %v3449_v24  ;;  %v3446_v40 = vsel %vm474_vm4, %v3351_v12, -inf }
0x1440   :  { %3447 = vmax.xlane.f32.xlu0 %v3446_v40  ;;  %v4484_v40 = vld [vmem:[%s7116_s11 + $0x8] ss:$0 sm:$0xff] }
0x1441   :  { %v5115_v15 = vpop.f32.mrb[78].mxu1 }
0x1442   :  { %v3445_v42 = vsel %vm3098_vm7, %v5115_v15, -1e+30  ;;  %v3435_v10 = vpop.f32.mrb[79].mxu1 }
0x1443   :  { %v3455_v0 = vsel %vm474_vm4, %v3445_v42, -inf  ;;  %v3444_v25 = vsel %vm3097_vm5, %v3435_v10, -1e+30 }
0x1444   :  { %v3452_v8 = vsel %vm474_vm4, %v3444_v25, -inf  ;;  %3456 = vmax.xlane.f32.xlu0 %v3455_v0 }
0x1445   :  { %3453 = vmax.xlane.f32.xlu1 %v3452_v8 }
0x1456   :  { %5537 = vrot.lane.b32.xlu1 %v5531_v55, %s5768_s3 }
0x145a   :  { %5542 = vrot.lane.b32.xlu0 %v5531_v55, %s5769_s16 }
0x14c9   :  { %v3451_v9 = vpop.xlane.xlu0 %3450 }
0x14ca   :  { %v3459_v41 = vsub.f32 %v3352_v11, %v3451_v9 }
0x14cc   :  { %v3464_v29 = vmul.f32 1.442695, %v3459_v41 }
0x14cd   :  { %v3448_v14 = vpop.xlane.xlu0 %3447 }
0x14ce   :  { %5676 = vpow2.f32 %v3464_v29  ;;  %v3458_v19 = vsub.f32 %v3351_v12, %v3448_v14 }
0x14d0   :  { %v3462_v49 = vmul.f32 1.442695, %v3458_v19  ;;  %v3100_v19 = vld [vmem:[%s7114_s9 + $0x8] sm:$0xff] }
0x14d1   :  { %v3457_v20 = vpop.xlane.xlu0 %3456 }
0x14d2   :  { %5678 = vpow2.f32 %v3462_v49  ;;  %v3461_v22 = vsub.f32 %v3445_v42, %v3457_v20  ;;  %v3454_v30 = vpop.xlane.xlu1 %3453  ;;  %v3102_v49 = vld [vmem:[%s7114_s9 + $0x18] sm:$0xff]  ;;  %v3104_v20 = vld [vmem:[%s7114_s9 + $0x28] sm:$0xff] }
0x14d3   :  { %v3460_v27 = vsub.f32 %v3444_v25, %v3454_v30  ;;  %v3106_v30 = vld [vmem:[%s7114_s9 + $0x38] sm:$0xff]  ;;  %s5771_s9 = smov [#allocation4]  }
0x14d4   :  { %v3468_v39 = vmul.f32 1.442695, %v3461_v22  ;;  %v5396_v22 = vpack.c.bf16 %v3102_v49, %v3100_v19  ;;  %s4317_s5 = sshll.u32 %s5771_s9, 4  ;;  %s4318_s5 = int_to_ptr.vmem [resolvable:$true] %s4317_s5 }
0x14d5   :  { %v3466_v28 = vmul.f32 1.442695, %v3460_v27  ;;  %v5543_v38 = vpop.permute.xlu0 %5542  ;;  %v5400_v27 = vpack.c.bf16 %v3106_v30, %v3104_v20  ;;  %s5714_s7 = scalar_lea.vmem %s4318_s5, 32  ;;  %p5719_p1 = scmp.lt.s32.totalorder %s4318_s5, %s4318_s5 }
0x14d6   :  { %5680 = vpow2.f32 %v3468_v39  ;;  %v5545_v37 = vunpack.i.h.bf16 %v5543_v38  ;;  %v5544_v44 = vunpack.i.l.bf16 %v5543_v38  ;;  %v5538_v31 = vpop.permute.xlu1 %5537  ;;  %p5715_p0 = scmp.ne.s32.totalorder %s4318_s5, %s5714_s7  ;;  %p5720_p2 = scmp.lt.s32.totalorder %s5714_s7, %s5714_s7 }
0x14d7   :  { %5682 = vpow2.f32 %v3466_v28  ;;  %v5540_v32 = vunpack.i.h.bf16 %v5538_v31  ;;  %v5539_v48 = vunpack.i.l.bf16 %v5538_v31 }
0x14d8   :  { %v5677_v16 = vpop.eup %5676  ;;  %v5380_v34 = vpack.c.bf16 %v5545_v37, %v5544_v44  ;;  %p5721_p3 = por %p5720_p2, %p5719_p1 }
0x14d9   :  { %v5384_v52 = vpack.c.bf16 %v5540_v32, %v5539_v48  ;;  %v3473_v23 = vsel %vm474_vm4, %v5677_v16, 0.0 }
0x14da   :  { %3474 = vadd.xlane.f32.xlu0 %v3473_v23  ;;  %5381 = vmatprep.subr.bf16.mxu0 %v5380_v34  ;;  %p5722_p4 = pnand %p5721_p3, %p5715_p0 }
0x14db   :  { %5383 = vmatpush3.bf16.msra.mxu0 %v5380_v34  ;;  %5385 = vmatprep.subr.bf16.mxu1 %v5384_v52 }
0x14dc   :  { %v5679_v26 = vpop.eup %5678  ;;  %5387 = vmatpush3.bf16.msra.mxu1 %v5384_v52 }
0x14dd   :  { %5120 = vmatprep.mubr.msk.f32.mxu0 %vm474_vm4, %v5679_v26  ;;  %v3470_v46 = vsel %vm474_vm4, %v5679_v26, 0.0  ;;  %5397 = vmatprep.subr.bf16.mxu1 %v5396_v22 }
0x14de   :  { %3471 = vadd.xlane.f32.xlu1 %v3470_v46  ;;  %5121 = vmatmul.mubr.msk.f32.vlgmr.msra.gmra.mrb[60].mxu0 %vm474_vm4, %v5677_v16 }
0x14e0   :  { %v5681_v62 = vpop.eup %5680 }
0x14e1   :  { %v5683_v47 = vpop.eup %5682  ;;  %v3479_v4 = vsel %vm474_vm4, %v5681_v62, 0.0 }
0x14e2   :  { %5127 = vmatprep.mubr.msk.f32.mxu1 %vm474_vm4, %v5683_v47  ;;  %3480 = vadd.xlane.f32.xlu0 %v3479_v4  ;;  %v3476_v43 = vsel %vm474_vm4, %v5683_v47, 0.0 }
0x14e3   :  { %3477 = vadd.xlane.f32.xlu1 %v3476_v43  ;;  %5128 = vmatmul.mubr.msk.f32.vlgmr.msra.gmra.mrb[80].mxu1 %vm474_vm4, %v5681_v62  ;;  %v4485_v43 = vld [vmem:[%s7116_s11 + $0x5] ss:$0 sm:$0xff] }
0x14e4   :  { %5399 = vmatpush3.bf16.msra.mxu1 %v5396_v22 }
0x14e5   :  { %5401 = vmatprep.subr.bf16.mxu1 %v5400_v27 }
0x14e8   :  { %5403 = vmatpush3.bf16.msra.mxu1 %v5400_v27 }
0x14e9   :  { %5436 = vmatprep.subr.bf16.mxu1 %v5762_v3 }
0x14f4   :  { %5547 = vrot.lane.b32.xlu1 %v5546_v18, %s5770_s17 }
0x14f8   :  { %5552 = vrot.lane.b32.xlu0 %v5551_v17, %s5770_s17 }
0x1567   :  { %v3475_v55 = vpop.xlane.xlu0 %3474 }
0x1568   :  { %5684 = vrcp.f32 %v3475_v55 }
0x156b   :  { %v3472_v57 = vpop.xlane.xlu1 %3471 }
0x156c   :  { %5686 = vrcp.f32 %v3472_v57 }
0x156f   :  { %v3481_v21 = vpop.xlane.xlu0 %3480 }
0x1570   :  { %v3478_v53 = vpop.xlane.xlu1 %3477 }
0x1571   :  { %5688 = vrcp.f32 %v3478_v53  ;;  %v4486_v53 = vld [vmem:[%s7116_s11 + $0x6] ss:$0 sm:$0xff] }
0x1572   :  { %5690 = vrcp.f32 %v3481_v21  ;;  %v5685_v13 = vpop.eup %5684 }
0x1573   :  { %v5553_v59 = vpop.permute.xlu0 %5552 }
0x1574   :  { %v5548_v61 = vpop.permute.xlu1 %5547  ;;  %v5555_v63 = vunpack.i.h.bf16 %v5553_v59  ;;  %v5554_v1 = vunpack.i.l.bf16 %v5553_v59 }
0x1575   :  { %v5550_v5 = vunpack.i.h.bf16 %v5548_v61  ;;  %v5549_v6 = vunpack.i.l.bf16 %v5548_v61 }
0x1576   :  { %v5392_v51 = vpack.c.bf16 %v5555_v63, %v5554_v1  ;;  %v5687_v17 = vpop.eup %5686 }
0x1577   :  { %v5388_v60 = vpack.c.bf16 %v5550_v5, %v5549_v6  ;;  %v3107_v5 = vld [vmem:[%s7115_s10] sm:$0xff]  ;;  %v3108_v6 = vld [vmem:[%s7115_s10 + $0x8] sm:$0xff] }
0x1579   :  { %5389 = vmatprep.subr.bf16.mxu0 %v5388_v60 }
0x157a   :  { %5391 = vmatpush3.bf16.msra.mxu0 %v5388_v60  ;;  %v5404_v60 = vpack.c.bf16 %v3108_v6, %v3107_v5 }
0x157b   :  { %5393 = vmatprep.subr.bf16.mxu0 %v5392_v51  ;;  %v5689_v58 = vpop.eup %5688 }
0x157c   :  { %v5691_v50 = vpop.eup %5690 }
0x15b1   :  { %v5122_v45 = vpop.f32.mrb[60].mxu0 }
0x15b2   :  { %v3574_v56 = vmul.f32 %v5685_v13, %v5122_v45  ;;  %v3564_v35 = vpop.f32.mrb[61].mxu0  ;;  %v3110_v13 = vld [vmem:[%s7115_s10 + $0x18] sm:$0xff] }
0x15b3   :  { %v3573_v18 = vmul.f32 %v5687_v17, %v3564_v35  ;;  %v3111_v17 = vld [vmem:[%s7115_s10 + $0x20] sm:$0xff] }
0x15b6   :  { %v5129_v7 = vpop.f32.mrb[80].mxu1 }
0x15b7   :  { %v3653_v11 = vpop.f32.mrb[81].mxu1  ;;  %v3663_v12 = vmul.f32 %v5691_v50, %v5129_v7  ;;  %v3114_v7 = vld [vmem:[%s7115_s10 + $0x38] sm:$0xff]  ;;  %v3116_v50 = vld [vmem:[%s7115_s10 + $0x48] sm:$0xff] }
0x15b8   :  { %v3662_v24 = vmul.f32 %v5689_v58, %v3653_v11  ;;  %v3115_v11 = vld [vmem:[%s7115_s10 + $0x40] sm:$0xff] }
0x15ba   :  { %5134 = vmatprep.mubr.msk.f32.mxu0 %vm474_vm4, %v3662_v24  ;;  %v5420_v24 = vpack.c.bf16 %v3116_v50, %v3115_v11 }
0x15bb   :  { %5135 = vmatmul.mubr.msk.f32.vlgmr.msra.gmra.mrb[62].mxu0 %vm474_vm4, %v3663_v12  ;;  %v3117_v12 = vld [vmem:[%s7115_s10 + $0x50] sm:$0xff] }
0x15bc   :  { %5141 = vmatprep.mubr.msk.f32.mxu0 %vm474_vm4, %v3573_v18  ;;  %5395 = vmatpush3.bf16.msra.mxu0 %v5392_v51  ;;  %v3109_v51 = vld [vmem:[%s7115_s10 + $0x10] sm:$0xff] }
0x15bd   :  { %5405 = vmatprep.subr.bf16.mxu0 %v5404_v60  ;;  %v5408_v45 = vpack.c.bf16 %v3110_v13, %v3109_v51  ;;  %v3113_v18 = vld [vmem:[%s7115_s10 + $0x30] sm:$0xff] }
0x15be   :  { %v5416_v58 = vpack.c.bf16 %v3114_v7, %v3113_v18 }
0x15c3   :  { %5142 = vmatmul.mubr.msk.f32.vlgmr.msra.gmra.mrb[62].mxu0 %vm474_vm4, %v3574_v56  ;;  %v3112_v56 = vld [vmem:[%s7115_s10 + $0x28] sm:$0xff] }
0x15c4   :  { %5407 = vmatpush3.bf16.msra.mxu0 %v5404_v60  ;;  %v5412_v35 = vpack.c.bf16 %v3112_v56, %v3111_v17 }
0x15c5   :  { %5409 = vmatprep.subr.bf16.mxu0 %v5408_v45 }
0x15c8   :  { %5411 = vmatpush3.bf16.msra.mxu0 %v5408_v45 }
0x15c9   :  { %5413 = vmatprep.subr.bf16.mxu0 %v5412_v35 }
0x15cc   :  { %5415 = vmatpush3.bf16.msra.mxu0 %v5412_v35 }
0x15cd   :  { %5417 = vmatprep.subr.bf16.mxu0 %v5416_v58 }
0x15d0   :  { %5419 = vmatpush3.bf16.msra.mxu0 %v5416_v58 }
0x15d1   :  { %5421 = vmatprep.subr.bf16.mxu0 %v5420_v24 }
0x15d4   :  { %5423 = vmatpush3.bf16.msra.mxu0 %v5420_v24 }
0x1696   :  { %v5143_v15 = vpop.f32.mrb[62].mxu0 }
0x1697   :  { %v3847_v42 = vadd.f32 %v5143_v15, %v4484_v40  ;;  %v3833_v10 = vpop.f32.mrb[63].mxu0 }
0x1698   :  { %v3846_v0 = vadd.f32 %v4484_v40, %v3833_v10  ;;  %v3118_v40 = vld [vmem:[%s7115_s10 + $0x58] sm:$0xff]  ;;  %v3120_v10 = vld [vmem:[%s7115_s10 + $0x68] sm:$0xff] }
0x1699   :  { %v6946_v25 = vadd.f32 %v3847_v42, %v6815_v2  ;;  %v5424_v15 = vpack.c.bf16 %v3118_v40, %v3117_v12  ;;  %v3119_v42 = vld [vmem:[%s7115_s10 + $0x60] sm:$0xff] }
0x169a   :  { %v6949_v8 = vadd.f32 %v3846_v0, %v6806_v36  ;;  %v5428_v0 = vpack.c.bf16 %v3120_v10, %v3119_v42 }
0x169b   :  { %v3853_v9 = vsel %vm173_vm1, %v6946_v25, 0.0  ;;  %v3857_v41 = vmul.f32 %v6946_v25, %v6946_v25  ;;  %5425 = vmatprep.subr.bf16.mxu0 %v5424_v15 }
0x169c   :  { %3854 = vadd.xlane.f32.xlu0 %v3853_v9  ;;  %v3850_v29 = vsel %vm173_vm1, %v6949_v8, 0.0  ;;  %v3856_v14 = vmul.f32 %v6949_v8, %v6949_v8  ;;  %5427 = vmatpush3.bf16.msra.mxu0 %v5424_v15  ;;  %v3121_v9 = vld [vmem:[%s7115_s10 + $0x70] sm:$0xff] }
0x169d   :  { %3851 = vadd.xlane.f32.xlu1 %v3850_v29  ;;  %v3861_v2 = vsel %vm173_vm1, %v3857_v41, 0.0  ;;  %5429 = vmatprep.subr.bf16.mxu0 %v5428_v0  ;;  %v3122_v41 = vld [vmem:[%s7115_s10 + $0x78] sm:$0xff] }
0x169e   :  { %v3858_v36 = vsel %vm173_vm1, %v3856_v14, 0.0  ;;  %v5432_v29 = vpack.c.bf16 %v3122_v41, %v3121_v9  ;;  %v4487_v14 = vld [vmem:[%s7116_s11 + $0x9] ss:$0 sm:$0xff] }
0x16a0   :  { %3862 = vadd.xlane.f32.xlu0 %v3861_v2  ;;  %5431 = vmatpush3.bf16.msra.mxu0 %v5428_v0  ;;  %v4493_v0 = vld [vmem:[%s7116_s11] ss:$0 sm:$0xff] }
0x16a1   :  { %3859 = vadd.xlane.f32.xlu1 %v3858_v36  ;;  %5433 = vmatprep.subr.bf16.mxu0 %v5432_v29 }
0x16a4   :  { %5435 = vmatpush3.bf16.msra.mxu0 %v5432_v29 }
0x1729   :  { %v3855_v39 = vpop.xlane.xlu0 %3854 }
0x172a   :  { %v3865_v28 = vmul.f32 0.03125, %v3855_v39  ;;  %v3852_v38 = vpop.xlane.xlu1 %3851 }
0x172b   :  { %v3864_v37 = vmul.f32 0.03125, %v3852_v38 }
0x172c   :  { %v3869_v31 = vmul.f32 %v3865_v28, %v3865_v28  ;;  %v3873_v62 = vsub.f32 %v6946_v25, %v3865_v28 }
0x172d   :  { %v3863_v44 = vpop.xlane.xlu0 %3862  ;;  %v3868_v16 = vmul.f32 %v3864_v37, %v3864_v37  ;;  %v3872_v4 = vsub.f32 %v6949_v8, %v3864_v37 }
0x172e   :  { %v3867_v32 = vmul.f32 0.03125, %v3863_v44  ;;  %v3860_v48 = vpop.xlane.xlu1 %3859 }
0x172f   :  { %v3866_v34 = vmul.f32 0.03125, %v3860_v48 }
0x1730   :  { %v3871_v52 = vsub.f32 %v3867_v32, %v3869_v31 }
0x1731   :  { %v3870_v23 = vsub.f32 %v3866_v34, %v3868_v16  ;;  %v4492_v16 = vld [vmem:[%s7116_s11 + $0xa] ss:$0 sm:$0xff] }
0x1732   :  { %v3875_v26 = vadd.f32 1e-05, %v3871_v52 }
0x1733   :  { %v3874_v46 = vadd.f32 1e-05, %v3870_v23 }
0x1734   :  { %5692 = vrsqrt.f32 %v3875_v26 }
0x1735   :  { %5694 = vrsqrt.f32 %v3874_v46 }
0x173e   :  { %v5693_v47 = vpop.eup %5692 }
0x173f   :  { %v5695_v55 = vpop.eup %5694  ;;  %v3879_v57 = vmul.f32 %v5693_v47, %v3873_v62 }
0x1740   :  { %v3878_v21 = vmul.f32 %v5695_v55, %v3872_v4 }
0x1741   :  { %v3885_v59 = vmul.f32 %v4485_v43, %v3879_v57  ;;  %v4202_v57 = vmul.f32 %v6888_v33, %v6888_v33 }
0x1742   :  { %v3884_v61 = vmul.f32 %v4485_v43, %v3878_v21 }
0x1743   :  { %v3891_v1 = vadd.f32 %v4486_v53, %v3885_v59  ;;  %v4126_v59 = vld [vmem:[%s7117_s12 + $0x8] sm:$0xff] }
0x1744   :  { %v3890_v63 = vadd.f32 %v4486_v53, %v3884_v61  ;;  %v4127_v61 = vld [vmem:[%s7117_s12 + $0x10] sm:$0xff] }
0x1746   :  { %5152 = vmatprep.mubr.msk.f32.mxu1 %vm173_vm1, %v3890_v63 }
0x1747   :  { %5153 = vmatmul.mubr.msk.f32.vlgmr.msra.gmra.mrb[82].mxu1 %vm173_vm1, %v3891_v1  ;;  %v4128_v1 = vld [vmem:[%s7117_s12 + $0x18] sm:$0xff] }
0x1748   :  { %5198 = vmatprep.mubr.msk.f32.mxu1 %vm5763_vm3, %v5764_v54  ;;  %v5440_v5 = vpack.c.bf16 %v4128_v1, %v4127_v61 }
0x181a   :  { %v5154_v2 = vpop.f32.mrb[82].mxu1 }
0x181b   :  { %v3974_v36 = vadd.f32 %v5154_v2, %v4487_v14  ;;  %v3968_v19 = vpop.f32.mrb[83].mxu1 }
0x181c   :  { %v3969_v49 = vadd.f32 %v4487_v14, %v3968_v19  ;;  %v4494_v14 = vld [vmem:[%s7116_s11 + $0x1] ss:$0 sm:$0xff] }
0x181d   :  { %v4491_v20 = vmul.f32 -1.702, %v3974_v36 }
0x181e   :  { %v4490_v22 = vmul.f32 -1.702, %v3969_v49 }
0x181f   :  { %v3983_v30 = vmul.f32 1.442695, %v4491_v20 }
0x1820   :  { %v3981_v27 = vmul.f32 1.442695, %v4490_v22 }
0x1821   :  { %5696 = vpow2.f32 %v3983_v30 }
0x1822   :  { %5698 = vpow2.f32 %v3981_v27 }
0x182b   :  { %v5697_v39 = vpop.eup %5696 }
0x182c   :  { %v5699_v28 = vpop.eup %5698  ;;  %v3986_v38 = vadd.f32 1.0, %v5697_v39 }
0x182d   :  { %v3985_v37 = vadd.f32 1.0, %v5699_v28 }
0x182e   :  { %5700 = vrcp.f32 %v3986_v38  ;;  %v4214_v38 = vld [vmem:[%s7116_s11 + $0x2] sm:$0x1] }
0x182f   :  { %5702 = vrcp.f32 %v3985_v37  ;;  %v4215_v37 = vmul.f32 1.442695, %v4214_v38 }
0x1838   :  { %v5701_v44 = vpop.eup %5700 }
0x1839   :  { %v5703_v31 = vpop.eup %5702  ;;  %v3992_v48 = vmul.f32 %v5701_v44, %v3974_v36 }
0x183a   :  { %v3991_v32 = vmul.f32 %v5703_v31, %v3969_v49 }
0x183c   :  { %5187 = vmatprep.mubr.f32.mxu0 %v3991_v32 }
0x183d   :  { %5188 = vmatmul.mubr.f32.vlgmr.msra.gmra.mrb[64].mxu0 %v3992_v48 }
0x1910   :  { %v5189_v34 = vpop.f32.mrb[64].mxu0 }
0x1911   :  { %v4069_v52 = vadd.f32 %v5189_v34, %v4492_v16  ;;  %v4063_v23 = vpop.f32.mrb[65].mxu0 }
0x1912   :  { %v4064_v26 = vadd.f32 %v4492_v16, %v4063_v23 }
0x1913   :  { %v4073_v46 = vadd.f32 %v4069_v52, %v6946_v25  ;;  %v4203_v25 = vsel %vm180_vm2, %v4202_v57, 0.0 }
0x1914   :  { %v4072_v62 = vadd.f32 %v4064_v26, %v6949_v8  ;;  %v4125_v8 = vld [vmem:[%s7117_s12] sm:$0xff] }
0x1915   :  { %v4079_v47 = vsel %vm173_vm1, %v4073_v46, 0.0  ;;  %v4083_v4 = vmul.f32 %v4073_v46, %v4073_v46  ;;  %v5437_v63 = vpack.c.bf16 %v4126_v59, %v4125_v8 }
0x1916   :  { %4080 = vadd.xlane.f32.xlu0 %v4079_v47  ;;  %v4076_v43 = vsel %vm173_vm1, %v4072_v62, 0.0  ;;  %v4082_v55 = vmul.f32 %v4072_v62, %v4072_v62 }
0x1917   :  { %4077 = vadd.xlane.f32.xlu1 %v4076_v43  ;;  %v4087_v21 = vsel %vm173_vm1, %v4083_v4, 0.0  ;;  %5438 = vmatpush3.bf16.msra.mxu1 %v5437_v63 }
0x1918   :  { %v4084_v53 = vsel %vm173_vm1, %v4082_v55, 0.0  ;;  %5439 = vmatprep.subr.bf16.mxu1 %v5762_v3 }
0x191a   :  { %4088 = vadd.xlane.f32.xlu0 %v4087_v21 }
0x191b   :  { %4085 = vadd.xlane.f32.xlu1 %v4084_v53  ;;  %5441 = vmatpush3.bf16.msra.mxu1 %v5440_v5 }
0x191c   :  { %5201 = vmatprep.subr.mxu1 %v5764_v54 }
0x191e   :  { %4204 = vadd.xlane.f32.xlu0 %v4203_v25 }
0x19a3   :  { %v4081_v6 = vpop.xlane.xlu0 %4080 }
0x19a4   :  { %v4091_v60 = vmul.f32 0.03125, %v4081_v6  ;;  %v4078_v51 = vpop.xlane.xlu1 %4077 }
0x19a5   :  { %v4090_v13 = vmul.f32 0.03125, %v4078_v51 }
0x19a6   :  { %v4095_v17 = vmul.f32 %v4091_v60, %v4091_v60  ;;  %v4099_v40 = vsub.f32 %v4073_v46, %v4091_v60 }
0x19a7   :  { %v4089_v45 = vpop.xlane.xlu0 %4088  ;;  %v4094_v18 = vmul.f32 %v4090_v13, %v4090_v13  ;;  %v4098_v10 = vsub.f32 %v4072_v62, %v4090_v13 }
0x19a8   :  { %v4093_v56 = vmul.f32 0.03125, %v4089_v45  ;;  %v4086_v35 = vpop.xlane.xlu1 %4085 }
0x19a9   :  { %v4092_v7 = vmul.f32 0.03125, %v4086_v35 }
0x19aa   :  { %v4097_v58 = vsub.f32 %v4093_v56, %v4095_v17 }
0x19ab   :  { %v4096_v11 = vsub.f32 %v4092_v7, %v4094_v18  ;;  %v4205_v50 = vpop.xlane.xlu0 %4204 }
0x19ac   :  { %v4101_v24 = vadd.f32 1e-05, %v4097_v58  ;;  %5704 = vrsqrt.f32 %v4205_v50 }
0x19ad   :  { %v4100_v12 = vadd.f32 1e-05, %v4096_v11 }
0x19ae   :  { %5706 = vrsqrt.f32 %v4101_v24 }
0x19af   :  { %5708 = vrsqrt.f32 %v4100_v12 }
0x19b0   :  { %5710 = vpow2.f32 %v4215_v37 }
0x19b6   :  { %v5705_v3 = vpop.eup %5704 }
0x19b7   :  { %v4207_v15 = vmul.f32 %v5705_v3, %v6888_v33 }
0x19b8   :  { %v5707_v42 = vpop.eup %5706 }
0x19b9   :  { %v5709_v9 = vpop.eup %5708  ;;  %v4105_v41 = vmul.f32 %v5707_v42, %v4099_v40  ;;  %4300 = vst.msk [vmem:[#allocation4] sm:$0x3] %vm180_vm2, %v4207_v15 }
0x19ba   :  { %v4104_v29 = vmul.f32 %v5709_v9, %v4098_v10  ;;  %v5711_v44 = vpop.eup %5710 }
0x19bb   :  { %v4111_v2 = vmul.f32 %v4493_v0, %v4105_v41  ;;  %5453 = vpush %v5711_v44 }
0x19bc   :  { %v4110_v36 = vmul.f32 %v4493_v0, %v4104_v29 }
0x19bd   :  { %v4117_v19 = vadd.f32 %v4494_v14, %v4111_v2 }
0x19be   :  { %v4116_v49 = vadd.f32 %v4494_v14, %v4110_v36 }
0x19bf   :  { %v4122_v33 = vrot.slane %v4117_v19, 6 }
0x19c0   :  { %v4119_v20 = vrot.slane %v4116_v49, 5 }
0x19c2   :  { %v4124_v22 = vsel %vm2964_vm11, %v4119_v20, %v4122_v33 }
0x19c3   :  { %5199 = vmatmul.mubr.msk.f32.vlgmr.msra.gmra.mrb[84].mxu1 %vm173_vm1, %v4124_v22 }
0x19c4   :  { %5203 = vmatprep.mubr.msk.f32.mxu1 %vm5763_vm3, %v5764_v54 }
0x1a96   :  { %v4198_v30 = vpop.f32.mrb[84].mxu1 }
0x1a97   :  { %v4208_v27 = vmul.f32 %v4198_v30, %v4198_v30  ;;  %v5200_v39 = vpop.f32.mrb[85].mxu1 }
0x1a99   :  { %v4209_v28 = vsel %vm180_vm2, %v4208_v27, 0.0 }
0x1a9a   :  { %4210 = vadd.xlane.f32.xlu1 %v4209_v28 }
0x1b27   :  { %v4211_v31 = vpop.xlane.xlu1 %4210 }
0x1b28   :  { %5712 = vrsqrt.f32 %v4211_v31 }
0x1b32   :  { %v5713_v32 = vpop.eup %5712 }
0x1b33   :  { %v4213_v48 = vmul.f32 %v5713_v32, %v4198_v30 }
0x1b35   :  { %5202 = vmatpush3.xpose.msk.msra.mxu1 %vm173_vm1, %v4213_v48 }
0x1b38   :  { %5204 = vmatmul.mubr.msk.f32.vlgmr.msra.gmra.mrb[86].mxu1 %vm173_vm1, %v4207_v15 }
0x1b39   :  { %5725 = shalt.err (!%p5722_p4)
}
0x1b3a   :  { %s5726_s30 = scalar_lea.hbm %s7119_s14, 32 }
0x1b3b   :  { %p5727_p5 = scmp.ne.s32.totalorder %s7119_s14, %s5726_s30  ;;  %p5730_p6 = scmp.lt.u32.totalorder %s5726_s30, %s7119_s14 }
0x1b3d   :  { %p5732_p7 = pnand %p5730_p6, %p5727_p5 }
0x1b3f   :  { %5735 = shalt.err (!%p5732_p7)
}
0x1b40   :  { %4320 = dma.vmem_to_hbm [thread:$0]  %s4318_s5, 32, %s7119_s14, [#allocation5]   ;;  %vm4298_vm1 = vcmask 9216  }
0x1b41   :  { %s5454_s4 = spop %5453  ;;  %s5772_s10 = smov [#allocation2]  }
0x1b42   :  { %v4295_v54 = vstv %s5454_s4  ;;  %s4307_s6 = sshll.u32 %s5772_s10, 4  ;;  %s4308_s6 = int_to_ptr.vmem [resolvable:$true] %s4307_s6 }
0x1b43   :  { %s5736_s21 = scalar_lea.vmem %s4308_s6, 32  ;;  %p5741_p9 = scmp.lt.s32.totalorder %s4308_s6, %s4308_s6 }
0x1b44   :  { %p5737_p8 = scmp.ne.s32.totalorder %s4308_s6, %s5736_s21  ;;  %p5742_p10 = scmp.lt.s32.totalorder %s5736_s21, %s5736_s21 }
0x1b46   :  { %p5743_p11 = por %p5742_p10, %p5741_p9 }
0x1b48   :  { %p5744_p12 = pnand %p5743_p11, %p5737_p8 }
0x1c0b   :  { %v4289_v16 = vpop.f32.mrb[86].mxu1 }
0x1c0c   :  { %v4297_v34 = vmul.f32 %v4295_v54, %v4289_v16  ;;  %v5205_v52 = vpop.f32.mrb[87].mxu1 }
0x1c0e   :  { %4299 = vst.msk [vmem:[#allocation2] sm:$0x3] %vm4298_vm1, %v4297_v34 }
0x1c0f   :  { %5747 = shalt.err (!%p5744_p12)
}
0x1c10   :  { %s5748_s14 = scalar_lea.hbm %s7118_s13, 32 }
0x1c11   :  { %p5749_p13 = scmp.ne.s32.totalorder %s7118_s13, %s5748_s14  ;;  %p5752_p0 = scmp.lt.u32.totalorder %s5748_s14, %s7118_s13 }
0x1c13   :  { %p5754_p1 = pnand %p5752_p0, %p5749_p13 }
0x1c15   :  { %5757 = shalt.err (!%p5754_p1)
}
0x1c16   :  { %4310 = dma.vmem_to_hbm [thread:$0]  %s4308_s6, 32, %s7118_s13, [#allocation3]  }
0x1c17   :  { %5758 = dma.done.wait [#allocation3], 32  }
0x1c18   :  { %5759 = vsyncadd [#allocation3], 4294967264 }
0x1c19   :  { %5760 = dma.done.wait [#allocation5], 32  }
0x1c1a   :  { %5761 = vsyncadd [#allocation5], 4294967264 }
0x1c1b   :  { %4327 = vsyncpa [#allocation3], 1 }
0x1c1c   :  { %4328 = vsyncpa [#allocation5], 1 }

</bundles_post_ra>
